<compile_context>
chip_gen: v5e
topology: v5e:2x2
jax: 0.10.0
libtpu: 0.0.40
codegen_flags: <defaults>
</compile_context>

<pallas_src>
import functools
import re

import jax
import jax.numpy as jnp
from jax.experimental import pallas as pl
from jax.experimental.pallas import tpu as pltpu


def _round_up(x, m):
    return (x + m - 1) // m * m


def _largest_divisor_tile(n, max_tile, quantum):
    """Largest multiple of `quantum` <= max_tile that divides n (n % quantum == 0)."""
    t = max(quantum, min(n, max_tile))
    t -= t % quantum
    while n % t:
        t -= quantum
    return t


def _tpu_generation():
    try:
        kind = jax.devices()[0].device_kind.lower()
        m = re.search(r"(\d+)", kind)
        if m:
            return int(m.group(1))
    except Exception:
        pass
    return 6


def _vmem_limit_bytes():
    """~3/4 of physical VMEM, capped at 96 MiB (v5e/v6e: 128 MiB, v7x: 64 MiB)."""
    try:
        cap = pltpu.get_tpu_info().vmem_capacity_bytes
        return int(min(96 << 20, cap * 3 // 4))
    except Exception:
        return (48 << 20) if _tpu_generation() >= 7 else (96 << 20)


def lstm_fc_kernel(x_ref, wih0_ref, b0_ref, wbig_ref, b1_ref, wfc_ref, bfc_ref,
                   out_ref, c1_ref, c2_ref, r0_ref, hcat_ref):
    """One (batch-tile, time-chunk) grid step of the skewed stacked LSTM + FC forward.

    x_ref:    (TT, TB, D)   f32   time-major chunk
    wih0_ref: (D,  4Hp)     bf16  layer-0 input weights (gate-padded, i/f/o pre-scaled 0.5)
    b0_ref:   (1,  4Hp)     f32   layer-0 fused bias (i/f/o pre-scaled)
    wbig_ref: (2Hp, 8Hp)    bf16  [[whh0 | wih1], [0 | whh1]]  (i/f/o pre-scaled)
    b1_ref:   (1,  4Hp)     f32   layer-1 fused bias (i/f/o pre-scaled)
    wfc_ref:  (Hp, Op)      bf16  final Linear weight (pre-transposed)
    bfc_ref:  (1,  Op)      f32
    out_ref:  (TB, Op)      f32   written only on the last time chunk (lane-dense)
    c1/c2:    (TB, Hp)      f32   cell states, carried across time chunks
    r0_ref:   (TB, 4Hp)     f32   h1(t-1) @ whh0 (layer-0 recurrent term), carried
    hcat_ref: (TB, 2Hp)     bf16  [h1 | h2] staging buffer; h2 half carries across chunks
    """
    t_idx = pl.program_id(1)
    TT, TB, D = x_ref.shape
    Hp = c1_ref.shape[1]

    @pl.when(t_idx == 0)
    def _init():
        c1_ref[...] = jnp.zeros_like(c1_ref)
        c2_ref[...] = jnp.zeros_like(c2_ref)
        r0_ref[...] = jnp.zeros_like(r0_ref)
        hcat_ref[...] = jnp.zeros_like(hcat_ref)

    # Hoisted layer-0 input projection: ONE big (TT*TB, D) @ (D, 4Hp) MXU GEMM
    # per time chunk, bias folded in.  Stored bf16 (when sublane-tile aligned)
    # to halve the chunk-lifetime VMEM footprint.
    xp_dt = jnp.bfloat16 if TB % 16 == 0 else jnp.float32
    xc = x_ref[...].reshape(TT * TB, D).astype(jnp.bfloat16)
    xp = (jnp.dot(xc, wih0_ref[...], preferred_element_type=jnp.float32)
          + b0_ref[...]).astype(xp_dt)

    wbig = wbig_ref[...]
    b1 = jnp.broadcast_to(b1_ref[...], (TB, 4 * Hp))    # broadcast hoisted out of loop

    c1 = c1_ref[...]
    c2 = c2_ref[...]
    r0 = r0_ref[...]

    def gates(z, c):
        # i/f/o weight columns + biases were pre-scaled by 0.5 at prep time, so
        # sigmoid(z_orig) == 0.5*tanh(z) + 0.5 with no per-step pre-multiply.
        i = 0.5 * jnp.tanh(z[:, 0 * Hp:1 * Hp]) + 0.5
        f = 0.5 * jnp.tanh(z[:, 1 * Hp:2 * Hp]) + 0.5
        g = jnp.tanh(z[:, 2 * Hp:3 * Hp])
        o = 0.5 * jnp.tanh(z[:, 3 * Hp:4 * Hp]) + 0.5
        c_new = f * c + i * g
        h_new = o * jnp.tanh(c_new)
        return h_new, c_new

    h2 = None
    # Skewed recurrence, fully unrolled (tile_t is capped in the wrapper).
    # Per step: gates(layer0) -> one fused GEMM -> gates(layer1); layer-1's
    # gate work is off the next step's critical path.
    for tt in range(TT):
        # Layer 0, step t: the xp slice is a contiguous leading-dim view.
        z0 = xp[tt * TB:(tt + 1) * TB, :] + r0
        h1, c1 = gates(z0, c1)
        hcat_ref[:, 0:Hp] = h1.astype(jnp.bfloat16)       # h2 half still holds h2(t-1)
        # Fused GEMM: [h1(t) | h2(t-1)] @ [[whh0 | wih1],[0 | whh1]].
        zz = jnp.dot(hcat_ref[...], wbig, preferred_element_type=jnp.float32)
        r0 = zz[:, 0:4 * Hp]                              # layer-0 recurrent term for t+1
        # Layer 1, step t.
        h2, c2 = gates(zz[:, 4 * Hp:8 * Hp] + b1, c2)
        hcat_ref[:, Hp:2 * Hp] = h2.astype(jnp.bfloat16)

    c1_ref[...] = c1
    c2_ref[...] = c2
    r0_ref[...] = r0

    # Dropout is identity in eval mode; final Linear on the last hidden state.
    @pl.when(t_idx == pl.num_programs(1) - 1)
    def _final():
        out_ref[...] = (jnp.dot(h2.astype(jnp.bfloat16), wfc_ref[...],
                                preferred_element_type=jnp.float32)
                        + bfc_ref[...])


_GATE_SCALE = (0.5, 0.5, 1.0, 0.5)   # i, f, g, o — sigmoid gates pre-scaled (exact in fp)


def _pad_gate_matrix(w, k_pad, h, hp, dtype):
    """PyTorch (4H, K) gate-stacked weight -> transposed (k_pad, 4*Hp), per-gate padded,
    with the i/f/o gate rows pre-scaled by 0.5."""
    k = w.shape[1]
    w4 = w.reshape(4, h, k) * jnp.asarray(_GATE_SCALE, w.dtype)[:, None, None]
    w4 = jnp.pad(w4, ((0, 0), (0, hp - h), (0, 0)))
    wt = jnp.transpose(w4, (2, 0, 1)).reshape(k, 4 * hp)
    return jnp.pad(wt, ((0, k_pad - k), (0, 0))).astype(dtype)


def _pad_gate_bias(b, h, hp):
    b4 = b.reshape(4, h) * jnp.asarray(_GATE_SCALE, b.dtype)[:, None]
    b4 = jnp.pad(b4, ((0, 0), (0, hp - h)))
    return b4.reshape(1, 4 * hp).astype(jnp.float32)


@functools.partial(jax.jit, static_argnames=("tile_t", "tile_b"))
def lstm_model_forward(x, params, *, tile_t=None, tile_b=None):
    """x: (B, T, D) float32 -> (B, O) float32 (eval-mode forward)."""
    B, T, D = x.shape
    H = params["whh0"].shape[1]           # whh0 is (4H, H) in PyTorch layout
    O = params["wfc"].shape[0]

    Hp = _round_up(H, 128)                # lane-aligned gate blocks
    Op = _round_up(O, 128)                # lane-dense output store
    Bp = _round_up(B, 8)                  # sublane-padded batch

    gen = _tpu_generation()
    if tile_b is None:
        # 256 LHS rows fill the 2x256x256 MXU on v6e/v7x; 128 on v5e-class MXUs.
        tile_b = _largest_divisor_tile(Bp, 256 if gen >= 6 else 128, 8)
    if tile_t is None:
        # Cap the chunk so the (bf16) xp buffer stays <= ~8 MiB and unroll stays modest.
        xp_cap = max(1, (8 << 20) // (tile_b * 4 * Hp * 2))
        tile_t = _largest_divisor_tile(T, min(32, xp_cap), 1)
    assert Bp % tile_b == 0 and tile_b % 8 == 0
    assert T % tile_t == 0

    wdt = jnp.bfloat16                    # bf16 weights, f32 MXU accumulation

    # Weight prep: transpose / gate-padding / bias-fusion / 0.5 gate pre-scale,
    # all done once outside the kernel.
    wih0 = _pad_gate_matrix(params["wih0"], D, H, Hp, wdt)                   # (D, 4Hp)
    whh0 = _pad_gate_matrix(params["whh0"], Hp, H, Hp, wdt)                  # (Hp, 4Hp)
    wih1 = _pad_gate_matrix(params["wih1"], Hp, H, Hp, wdt)                  # (Hp, 4Hp)
    whh1 = _pad_gate_matrix(params["whh1"], Hp, H, Hp, wdt)                  # (Hp, 4Hp)
    # Skewed fused recurrent weight: [h1(t) | h2(t-1)] @ [[whh0 | wih1],[0 | whh1]].
    wbig = jnp.concatenate(
        [jnp.concatenate([whh0, wih1], axis=1),
         jnp.concatenate([jnp.zeros_like(whh1), whh1], axis=1)], axis=0)     # (2Hp, 8Hp)
    b0 = _pad_gate_bias(params["bih0"] + params["bhh0"], H, Hp)              # (1, 4Hp)
    b1 = _pad_gate_bias(params["bih1"] + params["bhh1"], H, Hp)              # (1, 4Hp)
    wfc = jnp.pad(params["wfc"].T, ((0, Hp - H), (0, Op - O))).astype(wdt)   # (Hp, Op)
    bfc = jnp.pad(params["bfc"], (0, Op - O))[None, :].astype(jnp.float32)   # (1, Op)

    # Time-major layout: per-step xp slices become contiguous row blocks in the kernel.
    x_tm = jnp.pad(jnp.transpose(x, (1, 0, 2)), ((0, 0), (0, Bp - B), (0, 0)))  # (T, Bp, D)

    const2 = lambda b, t: (0, 0)
    # Constant-index weights/biases: single-buffered (never re-DMA'd, halves footprint).
    wspec = lambda shape: pl.BlockSpec(shape, const2, pipeline_mode=pl.Buffered(1))

    # Grid: batch tiles outermost ("parallel"), time chunks innermost & sequential
    # ("arbitrary") — required for the VMEM state carry across time chunks.
    grid_spec = pltpu.PrefetchScalarGridSpec(
        num_scalar_prefetch=0,
        grid=(Bp // tile_b, T // tile_t),
        in_specs=[
            pl.BlockSpec((tile_t, tile_b, D), lambda b, t: (t, b, 0)),  # streamed x chunk
            wspec((D, 4 * Hp)),
            wspec((1, 4 * Hp)),
            wspec((2 * Hp, 8 * Hp)),
            wspec((1, 4 * Hp)),
            wspec((Hp, Op)),
            wspec((1, Op)),
        ],
        out_specs=pl.BlockSpec((tile_b, Op), lambda b, t: (b, 0)),
        scratch_shapes=[
            pltpu.VMEM((tile_b, Hp), jnp.float32),        # c1
            pltpu.VMEM((tile_b, Hp), jnp.float32),        # c2
            pltpu.VMEM((tile_b, 4 * Hp), jnp.float32),    # r0 = h1 @ whh0 carry
            pltpu.VMEM((tile_b, 2 * Hp), jnp.bfloat16),   # [h1 | h2] bf16 staging/carry
        ],
    )

    out_p = pl.pallas_call(
        lstm_fc_kernel,
        out_shape=jax.ShapeDtypeStruct((Bp, Op), jnp.float32),
        grid_spec=grid_spec,
        compiler_params=pltpu.CompilerParams(
            dimension_semantics=("parallel", "arbitrary"),
            vmem_limit_bytes=_vmem_limit_bytes(),
        ),
    )(x_tm, wih0, b0, wbig, b1, wfc, bfc)

    return out_p[:B, :O]


def init_params(key, input_dim, hidden_dim, output_dim):
    """Deterministic init mimicking PyTorch's U(-1/sqrt(H), 1/sqrt(H))."""
    H = hidden_dim
    bound = 1.0 / jnp.sqrt(jnp.float32(H))
    ks = jax.random.split(key, 10)

    def u(k, shape):
        return jax.random.uniform(k, shape, jnp.float32, -bound, bound)

    return {
        "wih0": u(ks[0], (4 * H, input_dim)),
        "whh0": u(ks[1], (4 * H, H)),
        "bih0": u(ks[2], (4 * H,)),
        "bhh0": u(ks[3], (4 * H,)),
        "wih1": u(ks[4], (4 * H, H)),
        "whh1": u(ks[5], (4 * H, H)),
        "bih1": u(ks[6], (4 * H,)),
        "bhh1": u(ks[7], (4 * H,)),
        "wfc":  u(ks[8], (output_dim, H)),
        "bfc":  u(ks[9], (output_dim,)),
    }


def reference_forward(x, params):
    """Pure-JAX f32 reference matching PyTorch nn.LSTM(batch_first) + Linear (eval)."""
    B, T, D = x.shape
    H = params["whh0"].shape[1]

    def cell(x_t, h, c, wih, whh, bih, bhh):
        z = x_t @ wih.T + h @ whh.T + bih + bhh
        i = jax.nn.sigmoid(z[:, 0 * H:1 * H])
        f = jax.nn.sigmoid(z[:, 1 * H:2 * H])
        g = jnp.tanh(z[:, 2 * H:3 * H])
        o = jax.nn.sigmoid(z[:, 3 * H:4 * H])
        c = f * c + i * g
        h = o * jnp.tanh(c)
        return h, c

    h1 = c1 = h2 = c2 = jnp.zeros((B, H), jnp.float32)
    for t in range(T):
        h1, c1 = cell(x[:, t, :], h1, c1,
                      params["wih0"], params["whh0"], params["bih0"], params["bhh0"])
        h2, c2 = cell(h1, h2, c2,
                      params["wih1"], params["whh1"], params["bih1"], params["bhh1"])
    return h2 @ params["wfc"].T + params["bfc"]


if __name__ == "__main__":
    root = jax.random.PRNGKey(0)
    k1, k2, k3, k4 = jax.random.split(root, 4)

    # Config 1: the spec's small shapes (batch=2, seq=8, input=16, hidden=32, out=4).
    B, T, D, H, O = 2, 8, 16, 32, 4
    x = jax.random.normal(k1, (B, T, D), jnp.float32)
    params = init_params(k2, D, H, O)
    out = jax.block_until_ready(lstm_model_forward(x, params))
    ref = reference_forward(x, params)
    assert out.shape == (B, O)
    # bf16 weights/activations with f32 accumulation -> loose-but-meaningful tolerance.
    assert jnp.allclose(out, ref, rtol=4e-2, atol=4e-2), (
        float(jnp.max(jnp.abs(out - ref))), out, ref)

    # Config 2: exercises batch padding (9 -> 16), a 2x2 (batch, time) grid, and
    # carrying c1/c2/r0/[h1|h2] across multiple time chunks.
    B2, T2 = 9, 16
    x2 = jax.random.normal(k3, (B2, T2, D), jnp.float32)
    params2 = init_params(k4, D, H, O)
    out2 = jax.block_until_ready(lstm_model_forward(x2, params2, tile_t=8, tile_b=8))
    ref2 = reference_forward(x2, params2)
    assert out2.shape == (B2, O)
    assert jnp.allclose(out2, ref2, rtol=4e-2, atol=4e-2), (
        float(jnp.max(jnp.abs(out2 - ref2))), out2, ref2)

    print("KERNEL_OK")
</pallas_src>

<mosaic_0001>
module attributes {stable_mosaic.version = 11 : i64} {
  func.func @lstm_fc_kernel(%arg0: i32, %arg1: i32, %arg2: memref<8x8x16xf32, #tpu.memory_space<vmem>>, %arg3: memref<16x512xbf16, #tpu.memory_space<vmem>>, %arg4: memref<1x512xf32, #tpu.memory_space<vmem>>, %arg5: memref<256x1024xbf16, #tpu.memory_space<vmem>>, %arg6: memref<1x512xf32, #tpu.memory_space<vmem>>, %arg7: memref<128x128xbf16, #tpu.memory_space<vmem>>, %arg8: memref<1x128xf32, #tpu.memory_space<vmem>>, %arg9: memref<8x128xf32, #tpu.memory_space<vmem>>, %arg10: memref<8x128xf32, #tpu.memory_space<vmem>>, %arg11: memref<8x128xf32, #tpu.memory_space<vmem>>, %arg12: memref<8x512xf32, #tpu.memory_space<vmem>>, %arg13: memref<8x256xbf16, #tpu.memory_space<vmem>>) attributes {dimension_semantics = [#tpu.dimension_semantics<parallel>, #tpu.dimension_semantics<arbitrary>], iteration_bounds = array<i64: 1, 1>, scalar_prefetch = 0 : i64, scratch_operands = 4 : i64, tpu.core_type = #tpu.core_type<tc>, window_params = [{transform_indices = @transform_0, window_bounds = array<i64: 8, 8, 16>}, {pipeline_mode = #tpu.pipeline_mode<synchronous>, transform_indices = @transform_1, window_bounds = array<i64: 16, 512>}, {pipeline_mode = #tpu.pipeline_mode<synchronous>, transform_indices = @transform_2, window_bounds = array<i64: 1, 512>}, {pipeline_mode = #tpu.pipeline_mode<synchronous>, transform_indices = @transform_3, window_bounds = array<i64: 256, 1024>}, {pipeline_mode = #tpu.pipeline_mode<synchronous>, transform_indices = @transform_4, window_bounds = array<i64: 1, 512>}, {pipeline_mode = #tpu.pipeline_mode<synchronous>, transform_indices = @transform_5, window_bounds = array<i64: 128, 128>}, {pipeline_mode = #tpu.pipeline_mode<synchronous>, transform_indices = @transform_6, window_bounds = array<i64: 1, 128>}, {transform_indices = @transform_7, window_bounds = array<i64: 8, 128>}]} {
    %c0_i32 = arith.constant 0 : i32
    %0 = arith.cmpi eq, %arg1, %c0_i32 : i32
    %1 = arith.extui %0 : i1 to i32
    %c0_i32_0 = arith.constant 0 : i32
    %2 = arith.cmpi ne, %1, %c0_i32_0 : i32
    scf.if %2 {
      %cst_176 = arith.constant 0.000000e+00 : f32
      %512 = vector.broadcast %cst_176 : f32 to vector<8x128xf32>
      %c0_177 = arith.constant 0 : index
      %c0_178 = arith.constant 0 : index
      %513 = vector.load %arg10[%c0_177, %c0_178] : memref<8x128xf32, #tpu.memory_space<vmem>>, vector<8x128xf32>
      tpu.vector_store %arg10[%c0_177, %c0_178], %512 {strides = array<i32>} : memref<8x128xf32, #tpu.memory_space<vmem>>, vector<8x128xf32>,
      %cst_179 = arith.constant 0.000000e+00 : f32
      %514 = vector.broadcast %cst_179 : f32 to vector<8x128xf32>
      %c0_180 = arith.constant 0 : index
      %c0_181 = arith.constant 0 : index
      %515 = vector.load %arg11[%c0_180, %c0_181] : memref<8x128xf32, #tpu.memory_space<vmem>>, vector<8x128xf32>
      tpu.vector_store %arg11[%c0_180, %c0_181], %514 {strides = array<i32>} : memref<8x128xf32, #tpu.memory_space<vmem>>, vector<8x128xf32>,
      %cst_182 = arith.constant 0.000000e+00 : f32
      %516 = vector.broadcast %cst_182 : f32 to vector<8x512xf32>
      %c0_183 = arith.constant 0 : index
      %c0_184 = arith.constant 0 : index
      %517 = vector.load %arg12[%c0_183, %c0_184] : memref<8x512xf32, #tpu.memory_space<vmem>>, vector<8x512xf32>
      tpu.vector_store %arg12[%c0_183, %c0_184], %516 {strides = array<i32>} : memref<8x512xf32, #tpu.memory_space<vmem>>, vector<8x512xf32>,
      %cst_185 = arith.constant 0.000000e+00 : bf16
      %518 = vector.broadcast %cst_185 : bf16 to vector<8x256xbf16>
      %c0_186 = arith.constant 0 : index
      %c0_187 = arith.constant 0 : index
      %519 = vector.load %arg13[%c0_186, %c0_187] : memref<8x256xbf16, #tpu.memory_space<vmem>>, vector<8x256xbf16>
      tpu.vector_store %arg13[%c0_186, %c0_187], %518 {strides = array<i32>} : memref<8x256xbf16, #tpu.memory_space<vmem>>, vector<8x256xbf16>,
    } else {
    }
    %c0 = arith.constant 0 : index
    %c0_1 = arith.constant 0 : index
    %c0_2 = arith.constant 0 : index
    %3 = vector.load %arg2[%c0, %c0_1, %c0_2] : memref<8x8x16xf32, #tpu.memory_space<vmem>>, vector<8x8x16xf32>
    %4 = vector.shape_cast %3 : vector<8x8x16xf32> to vector<64x16xf32>
    %5 = arith.truncf %4 : vector<64x16xf32> to vector<64x16xbf16>
    %c0_3 = arith.constant 0 : index
    %c0_4 = arith.constant 0 : index
    %6 = vector.load %arg3[%c0_3, %c0_4] : memref<16x512xbf16, #tpu.memory_space<vmem>>, vector<16x512xbf16>
    %cst = arith.constant dense<0.000000e+00> : vector<64x512xf32>
    %7 = tpu.matmul %5, %6, %cst {dimension_numbers = #tpu.dot_dimension_numbers<[1], [0], [0], [1], [0, 0, 1, 1], [], []>} : vector<64x16xbf16>, vector<16x512xbf16>, vector<64x512xf32> -> vector<64x512xf32>
    %c0_5 = arith.constant 0 : index
    %c0_6 = arith.constant 0 : index
    %8 = vector.load %arg4[%c0_5, %c0_6] : memref<1x512xf32, #tpu.memory_space<vmem>>, vector<1x512xf32>
    %9 = vector.broadcast %8 : vector<1x512xf32> to vector<64x512xf32>
    %10 = arith.addf %7, %9 : vector<64x512xf32>
    %c0_7 = arith.constant 0 : index
    %c0_8 = arith.constant 0 : index
    %11 = vector.load %arg5[%c0_7, %c0_8] : memref<256x1024xbf16, #tpu.memory_space<vmem>>, vector<256x1024xbf16>
    %c0_9 = arith.constant 0 : index
    %c0_10 = arith.constant 0 : index
    %12 = vector.load %arg6[%c0_9, %c0_10] : memref<1x512xf32, #tpu.memory_space<vmem>>, vector<1x512xf32>
    %13 = vector.shape_cast %12 : vector<1x512xf32> to vector<1x512xf32>
    %14 = vector.broadcast %13 : vector<1x512xf32> to vector<8x512xf32>
    %c0_11 = arith.constant 0 : index
    %c0_12 = arith.constant 0 : index
    %15 = vector.load %arg10[%c0_11, %c0_12] : memref<8x128xf32, #tpu.memory_space<vmem>>, vector<8x128xf32>
    %c0_13 = arith.constant 0 : index
    %c0_14 = arith.constant 0 : index
    %16 = vector.load %arg11[%c0_13, %c0_14] : memref<8x128xf32, #tpu.memory_space<vmem>>, vector<8x128xf32>
    %c0_15 = arith.constant 0 : index
    %c0_16 = arith.constant 0 : index
    %17 = vector.load %arg12[%c0_15, %c0_16] : memref<8x512xf32, #tpu.memory_space<vmem>>, vector<8x512xf32>
    %18 = vector.extract_strided_slice %10 {offsets = [0, 0], sizes = [8, 512], strides = [1, 1]} : vector<64x512xf32> to vector<8x512xf32>
    %19 = arith.addf %18, %17 : vector<8x512xf32>
    %20 = vector.extract_strided_slice %19 {offsets = [0, 0], sizes = [8, 128], strides = [1, 1]} : vector<8x512xf32> to vector<8x128xf32>
    %21 = math.tanh %20 : vector<8x128xf32>
    %cst_17 = arith.constant 5.000000e-01 : f32
    %22 = vector.broadcast %cst_17 : f32 to vector<8x128xf32>
    %23 = arith.mulf %22, %21 : vector<8x128xf32>
    %cst_18 = arith.constant 5.000000e-01 : f32
    %24 = vector.broadcast %cst_18 : f32 to vector<8x128xf32>
    %25 = arith.addf %23, %24 : vector<8x128xf32>
    %26 = vector.extract_strided_slice %19 {offsets = [0, 128], sizes = [8, 128], strides = [1, 1]} : vector<8x512xf32> to vector<8x128xf32>
    %27 = math.tanh %26 : vector<8x128xf32>
    %cst_19 = arith.constant 5.000000e-01 : f32
    %28 = vector.broadcast %cst_19 : f32 to vector<8x128xf32>
    %29 = arith.mulf %28, %27 : vector<8x128xf32>
    %cst_20 = arith.constant 5.000000e-01 : f32
    %30 = vector.broadcast %cst_20 : f32 to vector<8x128xf32>
    %31 = arith.addf %29, %30 : vector<8x128xf32>
    %32 = vector.extract_strided_slice %19 {offsets = [0, 256], sizes = [8, 128], strides = [1, 1]} : vector<8x512xf32> to vector<8x128xf32>
    %33 = math.tanh %32 : vector<8x128xf32>
    %34 = vector.extract_strided_slice %19 {offsets = [0, 384], sizes = [8, 128], strides = [1, 1]} : vector<8x512xf32> to vector<8x128xf32>
    %35 = math.tanh %34 : vector<8x128xf32>
    %cst_21 = arith.constant 5.000000e-01 : f32
    %36 = vector.broadcast %cst_21 : f32 to vector<8x128xf32>
    %37 = arith.mulf %36, %35 : vector<8x128xf32>
    %cst_22 = arith.constant 5.000000e-01 : f32
    %38 = vector.broadcast %cst_22 : f32 to vector<8x128xf32>
    %39 = arith.addf %37, %38 : vector<8x128xf32>
    %40 = arith.mulf %31, %15 : vector<8x128xf32>
    %41 = arith.mulf %25, %33 : vector<8x128xf32>
    %42 = arith.addf %40, %41 : vector<8x128xf32>
    %43 = math.tanh %42 : vector<8x128xf32>
    %44 = arith.mulf %39, %43 : vector<8x128xf32>
    %45 = arith.truncf %44 : vector<8x128xf32> to vector<8x128xbf16>
    %c0_23 = arith.constant 0 : index
    %c0_24 = arith.constant 0 : index
    %46 = vector.load %arg13[%c0_23, %c0_24] : memref<8x256xbf16, #tpu.memory_space<vmem>>, vector<8x128xbf16>
    tpu.vector_store %arg13[%c0_23, %c0_24], %45 {strides = array<i32>} : memref<8x256xbf16, #tpu.memory_space<vmem>>, vector<8x128xbf16>,
    %c0_25 = arith.constant 0 : index
    %c0_26 = arith.constant 0 : index
    %47 = vector.load %arg13[%c0_25, %c0_26] : memref<8x256xbf16, #tpu.memory_space<vmem>>, vector<8x256xbf16>
    %cst_27 = arith.constant dense<0.000000e+00> : vector<8x1024xf32>
    %48 = tpu.matmul %47, %11, %cst_27 {dimension_numbers = #tpu.dot_dimension_numbers<[1], [0], [0], [1], [0, 0, 1, 1], [], []>} : vector<8x256xbf16>, vector<256x1024xbf16>, vector<8x1024xf32> -> vector<8x1024xf32>
    %49 = vector.extract_strided_slice %48 {offsets = [0, 0], sizes = [8, 512], strides = [1, 1]} : vector<8x1024xf32> to vector<8x512xf32>
    %50 = vector.extract_strided_slice %48 {offsets = [0, 512], sizes = [8, 512], strides = [1, 1]} : vector<8x1024xf32> to vector<8x512xf32>
    %51 = arith.addf %50, %14 : vector<8x512xf32>
    %52 = vector.extract_strided_slice %51 {offsets = [0, 0], sizes = [8, 128], strides = [1, 1]} : vector<8x512xf32> to vector<8x128xf32>
    %53 = math.tanh %52 : vector<8x128xf32>
    %cst_28 = arith.constant 5.000000e-01 : f32
    %54 = vector.broadcast %cst_28 : f32 to vector<8x128xf32>
    %55 = arith.mulf %54, %53 : vector<8x128xf32>
    %cst_29 = arith.constant 5.000000e-01 : f32
    %56 = vector.broadcast %cst_29 : f32 to vector<8x128xf32>
    %57 = arith.addf %55, %56 : vector<8x128xf32>
    %58 = vector.extract_strided_slice %51 {offsets = [0, 128], sizes = [8, 128], strides = [1, 1]} : vector<8x512xf32> to vector<8x128xf32>
    %59 = math.tanh %58 : vector<8x128xf32>
    %cst_30 = arith.constant 5.000000e-01 : f32
    %60 = vector.broadcast %cst_30 : f32 to vector<8x128xf32>
    %61 = arith.mulf %60, %59 : vector<8x128xf32>
    %cst_31 = arith.constant 5.000000e-01 : f32
    %62 = vector.broadcast %cst_31 : f32 to vector<8x128xf32>
    %63 = arith.addf %61, %62 : vector<8x128xf32>
    %64 = vector.extract_strided_slice %51 {offsets = [0, 256], sizes = [8, 128], strides = [1, 1]} : vector<8x512xf32> to vector<8x128xf32>
    %65 = math.tanh %64 : vector<8x128xf32>
    %66 = vector.extract_strided_slice %51 {offsets = [0, 384], sizes = [8, 128], strides = [1, 1]} : vector<8x512xf32> to vector<8x128xf32>
    %67 = math.tanh %66 : vector<8x128xf32>
    %cst_32 = arith.constant 5.000000e-01 : f32
    %68 = vector.broadcast %cst_32 : f32 to vector<8x128xf32>
    %69 = arith.mulf %68, %67 : vector<8x128xf32>
    %cst_33 = arith.constant 5.000000e-01 : f32
    %70 = vector.broadcast %cst_33 : f32 to vector<8x128xf32>
    %71 = arith.addf %69, %70 : vector<8x128xf32>
    %72 = arith.mulf %63, %16 : vector<8x128xf32>
    %73 = arith.mulf %57, %65 : vector<8x128xf32>
    %74 = arith.addf %72, %73 : vector<8x128xf32>
    %75 = math.tanh %74 : vector<8x128xf32>
    %76 = arith.mulf %71, %75 : vector<8x128xf32>
    %77 = arith.truncf %76 : vector<8x128xf32> to vector<8x128xbf16>
    %c0_34 = arith.constant 0 : index
    %c128 = arith.constant 128 : index
    %78 = vector.load %arg13[%c0_34, %c128] : memref<8x256xbf16, #tpu.memory_space<vmem>>, vector<8x128xbf16>
    tpu.vector_store %arg13[%c0_34, %c128], %77 {strides = array<i32>} : memref<8x256xbf16, #tpu.memory_space<vmem>>, vector<8x128xbf16>,
    %79 = vector.extract_strided_slice %10 {offsets = [8, 0], sizes = [8, 512], strides = [1, 1]} : vector<64x512xf32> to vector<8x512xf32>
    %80 = arith.addf %79, %49 : vector<8x512xf32>
    %81 = vector.extract_strided_slice %80 {offsets = [0, 0], sizes = [8, 128], strides = [1, 1]} : vector<8x512xf32> to vector<8x128xf32>
    %82 = math.tanh %81 : vector<8x128xf32>
    %cst_35 = arith.constant 5.000000e-01 : f32
    %83 = vector.broadcast %cst_35 : f32 to vector<8x128xf32>
    %84 = arith.mulf %83, %82 : vector<8x128xf32>
    %cst_36 = arith.constant 5.000000e-01 : f32
    %85 = vector.broadcast %cst_36 : f32 to vector<8x128xf32>
    %86 = arith.addf %84, %85 : vector<8x128xf32>
    %87 = vector.extract_strided_slice %80 {offsets = [0, 128], sizes = [8, 128], strides = [1, 1]} : vector<8x512xf32> to vector<8x128xf32>
    %88 = math.tanh %87 : vector<8x128xf32>
    %cst_37 = arith.constant 5.000000e-01 : f32
    %89 = vector.broadcast %cst_37 : f32 to vector<8x128xf32>
    %90 = arith.mulf %89, %88 : vector<8x128xf32>
    %cst_38 = arith.constant 5.000000e-01 : f32
    %91 = vector.broadcast %cst_38 : f32 to vector<8x128xf32>
    %92 = arith.addf %90, %91 : vector<8x128xf32>
    %93 = vector.extract_strided_slice %80 {offsets = [0, 256], sizes = [8, 128], strides = [1, 1]} : vector<8x512xf32> to vector<8x128xf32>
    %94 = math.tanh %93 : vector<8x128xf32>
    %95 = vector.extract_strided_slice %80 {offsets = [0, 384], sizes = [8, 128], strides = [1, 1]} : vector<8x512xf32> to vector<8x128xf32>
    %96 = math.tanh %95 : vector<8x128xf32>
    %cst_39 = arith.constant 5.000000e-01 : f32
    %97 = vector.broadcast %cst_39 : f32 to vector<8x128xf32>
    %98 = arith.mulf %97, %96 : vector<8x128xf32>
    %cst_40 = arith.constant 5.000000e-01 : f32
    %99 = vector.broadcast %cst_40 : f32 to vector<8x128xf32>
    %100 = arith.addf %98, %99 : vector<8x128xf32>
    %101 = arith.mulf %92, %42 : vector<8x128xf32>
    %102 = arith.mulf %86, %94 : vector<8x128xf32>
    %103 = arith.addf %101, %102 : vector<8x128xf32>
    %104 = math.tanh %103 : vector<8x128xf32>
    %105 = arith.mulf %100, %104 : vector<8x128xf32>
    %106 = arith.truncf %105 : vector<8x128xf32> to vector<8x128xbf16>
    %c0_41 = arith.constant 0 : index
    %c0_42 = arith.constant 0 : index
    %107 = vector.load %arg13[%c0_41, %c0_42] : memref<8x256xbf16, #tpu.memory_space<vmem>>, vector<8x128xbf16>
    tpu.vector_store %arg13[%c0_41, %c0_42], %106 {strides = array<i32>} : memref<8x256xbf16, #tpu.memory_space<vmem>>, vector<8x128xbf16>,
    %c0_43 = arith.constant 0 : index
    %c0_44 = arith.constant 0 : index
    %108 = vector.load %arg13[%c0_43, %c0_44] : memref<8x256xbf16, #tpu.memory_space<vmem>>, vector<8x256xbf16>
    %cst_45 = arith.constant dense<0.000000e+00> : vector<8x1024xf32>
    %109 = tpu.matmul %108, %11, %cst_45 {dimension_numbers = #tpu.dot_dimension_numbers<[1], [0], [0], [1], [0, 0, 1, 1], [], []>} : vector<8x256xbf16>, vector<256x1024xbf16>, vector<8x1024xf32> -> vector<8x1024xf32>
    %110 = vector.extract_strided_slice %109 {offsets = [0, 0], sizes = [8, 512], strides = [1, 1]} : vector<8x1024xf32> to vector<8x512xf32>
    %111 = vector.extract_strided_slice %109 {offsets = [0, 512], sizes = [8, 512], strides = [1, 1]} : vector<8x1024xf32> to vector<8x512xf32>
    %112 = arith.addf %111, %14 : vector<8x512xf32>
    %113 = vector.extract_strided_slice %112 {offsets = [0, 0], sizes = [8, 128], strides = [1, 1]} : vector<8x512xf32> to vector<8x128xf32>
    %114 = math.tanh %113 : vector<8x128xf32>
    %cst_46 = arith.constant 5.000000e-01 : f32
    %115 = vector.broadcast %cst_46 : f32 to vector<8x128xf32>
    %116 = arith.mulf %115, %114 : vector<8x128xf32>
    %cst_47 = arith.constant 5.000000e-01 : f32
    %117 = vector.broadcast %cst_47 : f32 to vector<8x128xf32>
    %118 = arith.addf %116, %117 : vector<8x128xf32>
    %119 = vector.extract_strided_slice %112 {offsets = [0, 128], sizes = [8, 128], strides = [1, 1]} : vector<8x512xf32> to vector<8x128xf32>
    %120 = math.tanh %119 : vector<8x128xf32>
    %cst_48 = arith.constant 5.000000e-01 : f32
    %121 = vector.broadcast %cst_48 : f32 to vector<8x128xf32>
    %122 = arith.mulf %121, %120 : vector<8x128xf32>
    %cst_49 = arith.constant 5.000000e-01 : f32
    %123 = vector.broadcast %cst_49 : f32 to vector<8x128xf32>
    %124 = arith.addf %122, %123 : vector<8x128xf32>
    %125 = vector.extract_strided_slice %112 {offsets = [0, 256], sizes = [8, 128], strides = [1, 1]} : vector<8x512xf32> to vector<8x128xf32>
    %126 = math.tanh %125 : vector<8x128xf32>
    %127 = vector.extract_strided_slice %112 {offsets = [0, 384], sizes = [8, 128], strides = [1, 1]} : vector<8x512xf32> to vector<8x128xf32>
    %128 = math.tanh %127 : vector<8x128xf32>
    %cst_50 = arith.constant 5.000000e-01 : f32
    %129 = vector.broadcast %cst_50 : f32 to vector<8x128xf32>
    %130 = arith.mulf %129, %128 : vector<8x128xf32>
    %cst_51 = arith.constant 5.000000e-01 : f32
    %131 = vector.broadcast %cst_51 : f32 to vector<8x128xf32>
    %132 = arith.addf %130, %131 : vector<8x128xf32>
    %133 = arith.mulf %124, %74 : vector<8x128xf32>
    %134 = arith.mulf %118, %126 : vector<8x128xf32>
    %135 = arith.addf %133, %134 : vector<8x128xf32>
    %136 = math.tanh %135 : vector<8x128xf32>
    %137 = arith.mulf %132, %136 : vector<8x128xf32>
    %138 = arith.truncf %137 : vector<8x128xf32> to vector<8x128xbf16>
    %c0_52 = arith.constant 0 : index
    %c128_53 = arith.constant 128 : index
    %139 = vector.load %arg13[%c0_52, %c128_53] : memref<8x256xbf16, #tpu.memory_space<vmem>>, vector<8x128xbf16>
    tpu.vector_store %arg13[%c0_52, %c128_53], %138 {strides = array<i32>} : memref<8x256xbf16, #tpu.memory_space<vmem>>, vector<8x128xbf16>,
    %140 = vector.extract_strided_slice %10 {offsets = [16, 0], sizes = [8, 512], strides = [1, 1]} : vector<64x512xf32> to vector<8x512xf32>
    %141 = arith.addf %140, %110 : vector<8x512xf32>
    %142 = vector.extract_strided_slice %141 {offsets = [0, 0], sizes = [8, 128], strides = [1, 1]} : vector<8x512xf32> to vector<8x128xf32>
    %143 = math.tanh %142 : vector<8x128xf32>
    %cst_54 = arith.constant 5.000000e-01 : f32
    %144 = vector.broadcast %cst_54 : f32 to vector<8x128xf32>
    %145 = arith.mulf %144, %143 : vector<8x128xf32>
    %cst_55 = arith.constant 5.000000e-01 : f32
    %146 = vector.broadcast %cst_55 : f32 to vector<8x128xf32>
    %147 = arith.addf %145, %146 : vector<8x128xf32>
    %148 = vector.extract_strided_slice %141 {offsets = [0, 128], sizes = [8, 128], strides = [1, 1]} : vector<8x512xf32> to vector<8x128xf32>
    %149 = math.tanh %148 : vector<8x128xf32>
    %cst_56 = arith.constant 5.000000e-01 : f32
    %150 = vector.broadcast %cst_56 : f32 to vector<8x128xf32>
    %151 = arith.mulf %150, %149 : vector<8x128xf32>
    %cst_57 = arith.constant 5.000000e-01 : f32
    %152 = vector.broadcast %cst_57 : f32 to vector<8x128xf32>
    %153 = arith.addf %151, %152 : vector<8x128xf32>
    %154 = vector.extract_strided_slice %141 {offsets = [0, 256], sizes = [8, 128], strides = [1, 1]} : vector<8x512xf32> to vector<8x128xf32>
    %155 = math.tanh %154 : vector<8x128xf32>
    %156 = vector.extract_strided_slice %141 {offsets = [0, 384], sizes = [8, 128], strides = [1, 1]} : vector<8x512xf32> to vector<8x128xf32>
    %157 = math.tanh %156 : vector<8x128xf32>
    %cst_58 = arith.constant 5.000000e-01 : f32
    %158 = vector.broadcast %cst_58 : f32 to vector<8x128xf32>
    %159 = arith.mulf %158, %157 : vector<8x128xf32>
    %cst_59 = arith.constant 5.000000e-01 : f32
    %160 = vector.broadcast %cst_59 : f32 to vector<8x128xf32>
    %161 = arith.addf %159, %160 : vector<8x128xf32>
    %162 = arith.mulf %153, %103 : vector<8x128xf32>
    %163 = arith.mulf %147, %155 : vector<8x128xf32>
    %164 = arith.addf %162, %163 : vector<8x128xf32>
    %165 = math.tanh %164 : vector<8x128xf32>
    %166 = arith.mulf %161, %165 : vector<8x128xf32>
    %167 = arith.truncf %166 : vector<8x128xf32> to vector<8x128xbf16>
    %c0_60 = arith.constant 0 : index
    %c0_61 = arith.constant 0 : index
    %168 = vector.load %arg13[%c0_60, %c0_61] : memref<8x256xbf16, #tpu.memory_space<vmem>>, vector<8x128xbf16>
    tpu.vector_store %arg13[%c0_60, %c0_61], %167 {strides = array<i32>} : memref<8x256xbf16, #tpu.memory_space<vmem>>, vector<8x128xbf16>,
    %c0_62 = arith.constant 0 : index
    %c0_63 = arith.constant 0 : index
    %169 = vector.load %arg13[%c0_62, %c0_63] : memref<8x256xbf16, #tpu.memory_space<vmem>>, vector<8x256xbf16>
    %cst_64 = arith.constant dense<0.000000e+00> : vector<8x1024xf32>
    %170 = tpu.matmul %169, %11, %cst_64 {dimension_numbers = #tpu.dot_dimension_numbers<[1], [0], [0], [1], [0, 0, 1, 1], [], []>} : vector<8x256xbf16>, vector<256x1024xbf16>, vector<8x1024xf32> -> vector<8x1024xf32>
    %171 = vector.extract_strided_slice %170 {offsets = [0, 0], sizes = [8, 512], strides = [1, 1]} : vector<8x1024xf32> to vector<8x512xf32>
    %172 = vector.extract_strided_slice %170 {offsets = [0, 512], sizes = [8, 512], strides = [1, 1]} : vector<8x1024xf32> to vector<8x512xf32>
    %173 = arith.addf %172, %14 : vector<8x512xf32>
    %174 = vector.extract_strided_slice %173 {offsets = [0, 0], sizes = [8, 128], strides = [1, 1]} : vector<8x512xf32> to vector<8x128xf32>
    %175 = math.tanh %174 : vector<8x128xf32>
    %cst_65 = arith.constant 5.000000e-01 : f32
    %176 = vector.broadcast %cst_65 : f32 to vector<8x128xf32>
    %177 = arith.mulf %176, %175 : vector<8x128xf32>
    %cst_66 = arith.constant 5.000000e-01 : f32
    %178 = vector.broadcast %cst_66 : f32 to vector<8x128xf32>
    %179 = arith.addf %177, %178 : vector<8x128xf32>
    %180 = vector.extract_strided_slice %173 {offsets = [0, 128], sizes = [8, 128], strides = [1, 1]} : vector<8x512xf32> to vector<8x128xf32>
    %181 = math.tanh %180 : vector<8x128xf32>
    %cst_67 = arith.constant 5.000000e-01 : f32
    %182 = vector.broadcast %cst_67 : f32 to vector<8x128xf32>
    %183 = arith.mulf %182, %181 : vector<8x128xf32>
    %cst_68 = arith.constant 5.000000e-01 : f32
    %184 = vector.broadcast %cst_68 : f32 to vector<8x128xf32>
    %185 = arith.addf %183, %184 : vector<8x128xf32>
    %186 = vector.extract_strided_slice %173 {offsets = [0, 256], sizes = [8, 128], strides = [1, 1]} : vector<8x512xf32> to vector<8x128xf32>
    %187 = math.tanh %186 : vector<8x128xf32>
    %188 = vector.extract_strided_slice %173 {offsets = [0, 384], sizes = [8, 128], strides = [1, 1]} : vector<8x512xf32> to vector<8x128xf32>
    %189 = math.tanh %188 : vector<8x128xf32>
    %cst_69 = arith.constant 5.000000e-01 : f32
    %190 = vector.broadcast %cst_69 : f32 to vector<8x128xf32>
    %191 = arith.mulf %190, %189 : vector<8x128xf32>
    %cst_70 = arith.constant 5.000000e-01 : f32
    %192 = vector.broadcast %cst_70 : f32 to vector<8x128xf32>
    %193 = arith.addf %191, %192 : vector<8x128xf32>
    %194 = arith.mulf %185, %135 : vector<8x128xf32>
    %195 = arith.mulf %179, %187 : vector<8x128xf32>
    %196 = arith.addf %194, %195 : vector<8x128xf32>
    %197 = math.tanh %196 : vector<8x128xf32>
    %198 = arith.mulf %193, %197 : vector<8x128xf32>
    %199 = arith.truncf %198 : vector<8x128xf32> to vector<8x128xbf16>
    %c0_71 = arith.constant 0 : index
    %c128_72 = arith.constant 128 : index
    %200 = vector.load %arg13[%c0_71, %c128_72] : memref<8x256xbf16, #tpu.memory_space<vmem>>, vector<8x128xbf16>
    tpu.vector_store %arg13[%c0_71, %c128_72], %199 {strides = array<i32>} : memref<8x256xbf16, #tpu.memory_space<vmem>>, vector<8x128xbf16>,
    %201 = vector.extract_strided_slice %10 {offsets = [24, 0], sizes = [8, 512], strides = [1, 1]} : vector<64x512xf32> to vector<8x512xf32>
    %202 = arith.addf %201, %171 : vector<8x512xf32>
    %203 = vector.extract_strided_slice %202 {offsets = [0, 0], sizes = [8, 128], strides = [1, 1]} : vector<8x512xf32> to vector<8x128xf32>
    %204 = math.tanh %203 : vector<8x128xf32>
    %cst_73 = arith.constant 5.000000e-01 : f32
    %205 = vector.broadcast %cst_73 : f32 to vector<8x128xf32>
    %206 = arith.mulf %205, %204 : vector<8x128xf32>
    %cst_74 = arith.constant 5.000000e-01 : f32
    %207 = vector.broadcast %cst_74 : f32 to vector<8x128xf32>
    %208 = arith.addf %206, %207 : vector<8x128xf32>
    %209 = vector.extract_strided_slice %202 {offsets = [0, 128], sizes = [8, 128], strides = [1, 1]} : vector<8x512xf32> to vector<8x128xf32>
    %210 = math.tanh %209 : vector<8x128xf32>
    %cst_75 = arith.constant 5.000000e-01 : f32
    %211 = vector.broadcast %cst_75 : f32 to vector<8x128xf32>
    %212 = arith.mulf %211, %210 : vector<8x128xf32>
    %cst_76 = arith.constant 5.000000e-01 : f32
    %213 = vector.broadcast %cst_76 : f32 to vector<8x128xf32>
    %214 = arith.addf %212, %213 : vector<8x128xf32>
    %215 = vector.extract_strided_slice %202 {offsets = [0, 256], sizes = [8, 128], strides = [1, 1]} : vector<8x512xf32> to vector<8x128xf32>
    %216 = math.tanh %215 : vector<8x128xf32>
    %217 = vector.extract_strided_slice %202 {offsets = [0, 384], sizes = [8, 128], strides = [1, 1]} : vector<8x512xf32> to vector<8x128xf32>
    %218 = math.tanh %217 : vector<8x128xf32>
    %cst_77 = arith.constant 5.000000e-01 : f32
    %219 = vector.broadcast %cst_77 : f32 to vector<8x128xf32>
    %220 = arith.mulf %219, %218 : vector<8x128xf32>
    %cst_78 = arith.constant 5.000000e-01 : f32
    %221 = vector.broadcast %cst_78 : f32 to vector<8x128xf32>
    %222 = arith.addf %220, %221 : vector<8x128xf32>
    %223 = arith.mulf %214, %164 : vector<8x128xf32>
    %224 = arith.mulf %208, %216 : vector<8x128xf32>
    %225 = arith.addf %223, %224 : vector<8x128xf32>
    %226 = math.tanh %225 : vector<8x128xf32>
    %227 = arith.mulf %222, %226 : vector<8x128xf32>
    %228 = arith.truncf %227 : vector<8x128xf32> to vector<8x128xbf16>
    %c0_79 = arith.constant 0 : index
    %c0_80 = arith.constant 0 : index
    %229 = vector.load %arg13[%c0_79, %c0_80] : memref<8x256xbf16, #tpu.memory_space<vmem>>, vector<8x128xbf16>
    tpu.vector_store %arg13[%c0_79, %c0_80], %228 {strides = array<i32>} : memref<8x256xbf16, #tpu.memory_space<vmem>>, vector<8x128xbf16>,
    %c0_81 = arith.constant 0 : index
    %c0_82 = arith.constant 0 : index
    %230 = vector.load %arg13[%c0_81, %c0_82] : memref<8x256xbf16, #tpu.memory_space<vmem>>, vector<8x256xbf16>
    %cst_83 = arith.constant dense<0.000000e+00> : vector<8x1024xf32>
    %231 = tpu.matmul %230, %11, %cst_83 {dimension_numbers = #tpu.dot_dimension_numbers<[1], [0], [0], [1], [0, 0, 1, 1], [], []>} : vector<8x256xbf16>, vector<256x1024xbf16>, vector<8x1024xf32> -> vector<8x1024xf32>
    %232 = vector.extract_strided_slice %231 {offsets = [0, 0], sizes = [8, 512], strides = [1, 1]} : vector<8x1024xf32> to vector<8x512xf32>
    %233 = vector.extract_strided_slice %231 {offsets = [0, 512], sizes = [8, 512], strides = [1, 1]} : vector<8x1024xf32> to vector<8x512xf32>
    %234 = arith.addf %233, %14 : vector<8x512xf32>
    %235 = vector.extract_strided_slice %234 {offsets = [0, 0], sizes = [8, 128], strides = [1, 1]} : vector<8x512xf32> to vector<8x128xf32>
    %236 = math.tanh %235 : vector<8x128xf32>
    %cst_84 = arith.constant 5.000000e-01 : f32
    %237 = vector.broadcast %cst_84 : f32 to vector<8x128xf32>
    %238 = arith.mulf %237, %236 : vector<8x128xf32>
    %cst_85 = arith.constant 5.000000e-01 : f32
    %239 = vector.broadcast %cst_85 : f32 to vector<8x128xf32>
    %240 = arith.addf %238, %239 : vector<8x128xf32>
    %241 = vector.extract_strided_slice %234 {offsets = [0, 128], sizes = [8, 128], strides = [1, 1]} : vector<8x512xf32> to vector<8x128xf32>
    %242 = math.tanh %241 : vector<8x128xf32>
    %cst_86 = arith.constant 5.000000e-01 : f32
    %243 = vector.broadcast %cst_86 : f32 to vector<8x128xf32>
    %244 = arith.mulf %243, %242 : vector<8x128xf32>
    %cst_87 = arith.constant 5.000000e-01 : f32
    %245 = vector.broadcast %cst_87 : f32 to vector<8x128xf32>
    %246 = arith.addf %244, %245 : vector<8x128xf32>
    %247 = vector.extract_strided_slice %234 {offsets = [0, 256], sizes = [8, 128], strides = [1, 1]} : vector<8x512xf32> to vector<8x128xf32>
    %248 = math.tanh %247 : vector<8x128xf32>
    %249 = vector.extract_strided_slice %234 {offsets = [0, 384], sizes = [8, 128], strides = [1, 1]} : vector<8x512xf32> to vector<8x128xf32>
    %250 = math.tanh %249 : vector<8x128xf32>
    %cst_88 = arith.constant 5.000000e-01 : f32
    %251 = vector.broadcast %cst_88 : f32 to vector<8x128xf32>
    %252 = arith.mulf %251, %250 : vector<8x128xf32>
    %cst_89 = arith.constant 5.000000e-01 : f32
    %253 = vector.broadcast %cst_89 : f32 to vector<8x128xf32>
    %254 = arith.addf %252, %253 : vector<8x128xf32>
    %255 = arith.mulf %246, %196 : vector<8x128xf32>
    %256 = arith.mulf %240, %248 : vector<8x128xf32>
    %257 = arith.addf %255, %256 : vector<8x128xf32>
    %258 = math.tanh %257 : vector<8x128xf32>
    %259 = arith.mulf %254, %258 : vector<8x128xf32>
    %260 = arith.truncf %259 : vector<8x128xf32> to vector<8x128xbf16>
    %c0_90 = arith.constant 0 : index
    %c128_91 = arith.constant 128 : index
    %261 = vector.load %arg13[%c0_90, %c128_91] : memref<8x256xbf16, #tpu.memory_space<vmem>>, vector<8x128xbf16>
    tpu.vector_store %arg13[%c0_90, %c128_91], %260 {strides = array<i32>} : memref<8x256xbf16, #tpu.memory_space<vmem>>, vector<8x128xbf16>,
    %262 = vector.extract_strided_slice %10 {offsets = [32, 0], sizes = [8, 512], strides = [1, 1]} : vector<64x512xf32> to vector<8x512xf32>
    %263 = arith.addf %262, %232 : vector<8x512xf32>
    %264 = vector.extract_strided_slice %263 {offsets = [0, 0], sizes = [8, 128], strides = [1, 1]} : vector<8x512xf32> to vector<8x128xf32>
    %265 = math.tanh %264 : vector<8x128xf32>
    %cst_92 = arith.constant 5.000000e-01 : f32
    %266 = vector.broadcast %cst_92 : f32 to vector<8x128xf32>
    %267 = arith.mulf %266, %265 : vector<8x128xf32>
    %cst_93 = arith.constant 5.000000e-01 : f32
    %268 = vector.broadcast %cst_93 : f32 to vector<8x128xf32>
    %269 = arith.addf %267, %268 : vector<8x128xf32>
    %270 = vector.extract_strided_slice %263 {offsets = [0, 128], sizes = [8, 128], strides = [1, 1]} : vector<8x512xf32> to vector<8x128xf32>
    %271 = math.tanh %270 : vector<8x128xf32>
    %cst_94 = arith.constant 5.000000e-01 : f32
    %272 = vector.broadcast %cst_94 : f32 to vector<8x128xf32>
    %273 = arith.mulf %272, %271 : vector<8x128xf32>
    %cst_95 = arith.constant 5.000000e-01 : f32
    %274 = vector.broadcast %cst_95 : f32 to vector<8x128xf32>
    %275 = arith.addf %273, %274 : vector<8x128xf32>
    %276 = vector.extract_strided_slice %263 {offsets = [0, 256], sizes = [8, 128], strides = [1, 1]} : vector<8x512xf32> to vector<8x128xf32>
    %277 = math.tanh %276 : vector<8x128xf32>
    %278 = vector.extract_strided_slice %263 {offsets = [0, 384], sizes = [8, 128], strides = [1, 1]} : vector<8x512xf32> to vector<8x128xf32>
    %279 = math.tanh %278 : vector<8x128xf32>
    %cst_96 = arith.constant 5.000000e-01 : f32
    %280 = vector.broadcast %cst_96 : f32 to vector<8x128xf32>
    %281 = arith.mulf %280, %279 : vector<8x128xf32>
    %cst_97 = arith.constant 5.000000e-01 : f32
    %282 = vector.broadcast %cst_97 : f32 to vector<8x128xf32>
    %283 = arith.addf %281, %282 : vector<8x128xf32>
    %284 = arith.mulf %275, %225 : vector<8x128xf32>
    %285 = arith.mulf %269, %277 : vector<8x128xf32>
    %286 = arith.addf %284, %285 : vector<8x128xf32>
    %287 = math.tanh %286 : vector<8x128xf32>
    %288 = arith.mulf %283, %287 : vector<8x128xf32>
    %289 = arith.truncf %288 : vector<8x128xf32> to vector<8x128xbf16>
    %c0_98 = arith.constant 0 : index
    %c0_99 = arith.constant 0 : index
    %290 = vector.load %arg13[%c0_98, %c0_99] : memref<8x256xbf16, #tpu.memory_space<vmem>>, vector<8x128xbf16>
    tpu.vector_store %arg13[%c0_98, %c0_99], %289 {strides = array<i32>} : memref<8x256xbf16, #tpu.memory_space<vmem>>, vector<8x128xbf16>,
    %c0_100 = arith.constant 0 : index
    %c0_101 = arith.constant 0 : index
    %291 = vector.load %arg13[%c0_100, %c0_101] : memref<8x256xbf16, #tpu.memory_space<vmem>>, vector<8x256xbf16>
    %cst_102 = arith.constant dense<0.000000e+00> : vector<8x1024xf32>
    %292 = tpu.matmul %291, %11, %cst_102 {dimension_numbers = #tpu.dot_dimension_numbers<[1], [0], [0], [1], [0, 0, 1, 1], [], []>} : vector<8x256xbf16>, vector<256x1024xbf16>, vector<8x1024xf32> -> vector<8x1024xf32>
    %293 = vector.extract_strided_slice %292 {offsets = [0, 0], sizes = [8, 512], strides = [1, 1]} : vector<8x1024xf32> to vector<8x512xf32>
    %294 = vector.extract_strided_slice %292 {offsets = [0, 512], sizes = [8, 512], strides = [1, 1]} : vector<8x1024xf32> to vector<8x512xf32>
    %295 = arith.addf %294, %14 : vector<8x512xf32>
    %296 = vector.extract_strided_slice %295 {offsets = [0, 0], sizes = [8, 128], strides = [1, 1]} : vector<8x512xf32> to vector<8x128xf32>
    %297 = math.tanh %296 : vector<8x128xf32>
    %cst_103 = arith.constant 5.000000e-01 : f32
    %298 = vector.broadcast %cst_103 : f32 to vector<8x128xf32>
    %299 = arith.mulf %298, %297 : vector<8x128xf32>
    %cst_104 = arith.constant 5.000000e-01 : f32
    %300 = vector.broadcast %cst_104 : f32 to vector<8x128xf32>
    %301 = arith.addf %299, %300 : vector<8x128xf32>
    %302 = vector.extract_strided_slice %295 {offsets = [0, 128], sizes = [8, 128], strides = [1, 1]} : vector<8x512xf32> to vector<8x128xf32>
    %303 = math.tanh %302 : vector<8x128xf32>
    %cst_105 = arith.constant 5.000000e-01 : f32
    %304 = vector.broadcast %cst_105 : f32 to vector<8x128xf32>
    %305 = arith.mulf %304, %303 : vector<8x128xf32>
    %cst_106 = arith.constant 5.000000e-01 : f32
    %306 = vector.broadcast %cst_106 : f32 to vector<8x128xf32>
    %307 = arith.addf %305, %306 : vector<8x128xf32>
    %308 = vector.extract_strided_slice %295 {offsets = [0, 256], sizes = [8, 128], strides = [1, 1]} : vector<8x512xf32> to vector<8x128xf32>
    %309 = math.tanh %308 : vector<8x128xf32>
    %310 = vector.extract_strided_slice %295 {offsets = [0, 384], sizes = [8, 128], strides = [1, 1]} : vector<8x512xf32> to vector<8x128xf32>
    %311 = math.tanh %310 : vector<8x128xf32>
    %cst_107 = arith.constant 5.000000e-01 : f32
    %312 = vector.broadcast %cst_107 : f32 to vector<8x128xf32>
    %313 = arith.mulf %312, %311 : vector<8x128xf32>
    %cst_108 = arith.constant 5.000000e-01 : f32
    %314 = vector.broadcast %cst_108 : f32 to vector<8x128xf32>
    %315 = arith.addf %313, %314 : vector<8x128xf32>
    %316 = arith.mulf %307, %257 : vector<8x128xf32>
    %317 = arith.mulf %301, %309 : vector<8x128xf32>
    %318 = arith.addf %316, %317 : vector<8x128xf32>
    %319 = math.tanh %318 : vector<8x128xf32>
    %320 = arith.mulf %315, %319 : vector<8x128xf32>
    %321 = arith.truncf %320 : vector<8x128xf32> to vector<8x128xbf16>
    %c0_109 = arith.constant 0 : index
    %c128_110 = arith.constant 128 : index
    %322 = vector.load %arg13[%c0_109, %c128_110] : memref<8x256xbf16, #tpu.memory_space<vmem>>, vector<8x128xbf16>
    tpu.vector_store %arg13[%c0_109, %c128_110], %321 {strides = array<i32>} : memref<8x256xbf16, #tpu.memory_space<vmem>>, vector<8x128xbf16>,
    %323 = vector.extract_strided_slice %10 {offsets = [40, 0], sizes = [8, 512], strides = [1, 1]} : vector<64x512xf32> to vector<8x512xf32>
    %324 = arith.addf %323, %293 : vector<8x512xf32>
    %325 = vector.extract_strided_slice %324 {offsets = [0, 0], sizes = [8, 128], strides = [1, 1]} : vector<8x512xf32> to vector<8x128xf32>
    %326 = math.tanh %325 : vector<8x128xf32>
    %cst_111 = arith.constant 5.000000e-01 : f32
    %327 = vector.broadcast %cst_111 : f32 to vector<8x128xf32>
    %328 = arith.mulf %327, %326 : vector<8x128xf32>
    %cst_112 = arith.constant 5.000000e-01 : f32
    %329 = vector.broadcast %cst_112 : f32 to vector<8x128xf32>
    %330 = arith.addf %328, %329 : vector<8x128xf32>
    %331 = vector.extract_strided_slice %324 {offsets = [0, 128], sizes = [8, 128], strides = [1, 1]} : vector<8x512xf32> to vector<8x128xf32>
    %332 = math.tanh %331 : vector<8x128xf32>
    %cst_113 = arith.constant 5.000000e-01 : f32
    %333 = vector.broadcast %cst_113 : f32 to vector<8x128xf32>
    %334 = arith.mulf %333, %332 : vector<8x128xf32>
    %cst_114 = arith.constant 5.000000e-01 : f32
    %335 = vector.broadcast %cst_114 : f32 to vector<8x128xf32>
    %336 = arith.addf %334, %335 : vector<8x128xf32>
    %337 = vector.extract_strided_slice %324 {offsets = [0, 256], sizes = [8, 128], strides = [1, 1]} : vector<8x512xf32> to vector<8x128xf32>
    %338 = math.tanh %337 : vector<8x128xf32>
    %339 = vector.extract_strided_slice %324 {offsets = [0, 384], sizes = [8, 128], strides = [1, 1]} : vector<8x512xf32> to vector<8x128xf32>
    %340 = math.tanh %339 : vector<8x128xf32>
    %cst_115 = arith.constant 5.000000e-01 : f32
    %341 = vector.broadcast %cst_115 : f32 to vector<8x128xf32>
    %342 = arith.mulf %341, %340 : vector<8x128xf32>
    %cst_116 = arith.constant 5.000000e-01 : f32
    %343 = vector.broadcast %cst_116 : f32 to vector<8x128xf32>
    %344 = arith.addf %342, %343 : vector<8x128xf32>
    %345 = arith.mulf %336, %286 : vector<8x128xf32>
    %346 = arith.mulf %330, %338 : vector<8x128xf32>
    %347 = arith.addf %345, %346 : vector<8x128xf32>
    %348 = math.tanh %347 : vector<8x128xf32>
    %349 = arith.mulf %344, %348 : vector<8x128xf32>
    %350 = arith.truncf %349 : vector<8x128xf32> to vector<8x128xbf16>
    %c0_117 = arith.constant 0 : index
    %c0_118 = arith.constant 0 : index
    %351 = vector.load %arg13[%c0_117, %c0_118] : memref<8x256xbf16, #tpu.memory_space<vmem>>, vector<8x128xbf16>
    tpu.vector_store %arg13[%c0_117, %c0_118], %350 {strides = array<i32>} : memref<8x256xbf16, #tpu.memory_space<vmem>>, vector<8x128xbf16>,
    %c0_119 = arith.constant 0 : index
    %c0_120 = arith.constant 0 : index
    %352 = vector.load %arg13[%c0_119, %c0_120] : memref<8x256xbf16, #tpu.memory_space<vmem>>, vector<8x256xbf16>
    %cst_121 = arith.constant dense<0.000000e+00> : vector<8x1024xf32>
    %353 = tpu.matmul %352, %11, %cst_121 {dimension_numbers = #tpu.dot_dimension_numbers<[1], [0], [0], [1], [0, 0, 1, 1], [], []>} : vector<8x256xbf16>, vector<256x1024xbf16>, vector<8x1024xf32> -> vector<8x1024xf32>
    %354 = vector.extract_strided_slice %353 {offsets = [0, 0], sizes = [8, 512], strides = [1, 1]} : vector<8x1024xf32> to vector<8x512xf32>
    %355 = vector.extract_strided_slice %353 {offsets = [0, 512], sizes = [8, 512], strides = [1, 1]} : vector<8x1024xf32> to vector<8x512xf32>
    %356 = arith.addf %355, %14 : vector<8x512xf32>
    %357 = vector.extract_strided_slice %356 {offsets = [0, 0], sizes = [8, 128], strides = [1, 1]} : vector<8x512xf32> to vector<8x128xf32>
    %358 = math.tanh %357 : vector<8x128xf32>
    %cst_122 = arith.constant 5.000000e-01 : f32
    %359 = vector.broadcast %cst_122 : f32 to vector<8x128xf32>
    %360 = arith.mulf %359, %358 : vector<8x128xf32>
    %cst_123 = arith.constant 5.000000e-01 : f32
    %361 = vector.broadcast %cst_123 : f32 to vector<8x128xf32>
    %362 = arith.addf %360, %361 : vector<8x128xf32>
    %363 = vector.extract_strided_slice %356 {offsets = [0, 128], sizes = [8, 128], strides = [1, 1]} : vector<8x512xf32> to vector<8x128xf32>
    %364 = math.tanh %363 : vector<8x128xf32>
    %cst_124 = arith.constant 5.000000e-01 : f32
    %365 = vector.broadcast %cst_124 : f32 to vector<8x128xf32>
    %366 = arith.mulf %365, %364 : vector<8x128xf32>
    %cst_125 = arith.constant 5.000000e-01 : f32
    %367 = vector.broadcast %cst_125 : f32 to vector<8x128xf32>
    %368 = arith.addf %366, %367 : vector<8x128xf32>
    %369 = vector.extract_strided_slice %356 {offsets = [0, 256], sizes = [8, 128], strides = [1, 1]} : vector<8x512xf32> to vector<8x128xf32>
    %370 = math.tanh %369 : vector<8x128xf32>
    %371 = vector.extract_strided_slice %356 {offsets = [0, 384], sizes = [8, 128], strides = [1, 1]} : vector<8x512xf32> to vector<8x128xf32>
    %372 = math.tanh %371 : vector<8x128xf32>
    %cst_126 = arith.constant 5.000000e-01 : f32
    %373 = vector.broadcast %cst_126 : f32 to vector<8x128xf32>
    %374 = arith.mulf %373, %372 : vector<8x128xf32>
    %cst_127 = arith.constant 5.000000e-01 : f32
    %375 = vector.broadcast %cst_127 : f32 to vector<8x128xf32>
    %376 = arith.addf %374, %375 : vector<8x128xf32>
    %377 = arith.mulf %368, %318 : vector<8x128xf32>
    %378 = arith.mulf %362, %370 : vector<8x128xf32>
    %379 = arith.addf %377, %378 : vector<8x128xf32>
    %380 = math.tanh %379 : vector<8x128xf32>
    %381 = arith.mulf %376, %380 : vector<8x128xf32>
    %382 = arith.truncf %381 : vector<8x128xf32> to vector<8x128xbf16>
    %c0_128 = arith.constant 0 : index
    %c128_129 = arith.constant 128 : index
    %383 = vector.load %arg13[%c0_128, %c128_129] : memref<8x256xbf16, #tpu.memory_space<vmem>>, vector<8x128xbf16>
    tpu.vector_store %arg13[%c0_128, %c128_129], %382 {strides = array<i32>} : memref<8x256xbf16, #tpu.memory_space<vmem>>, vector<8x128xbf16>,
    %384 = vector.extract_strided_slice %10 {offsets = [48, 0], sizes = [8, 512], strides = [1, 1]} : vector<64x512xf32> to vector<8x512xf32>
    %385 = arith.addf %384, %354 : vector<8x512xf32>
    %386 = vector.extract_strided_slice %385 {offsets = [0, 0], sizes = [8, 128], strides = [1, 1]} : vector<8x512xf32> to vector<8x128xf32>
    %387 = math.tanh %386 : vector<8x128xf32>
    %cst_130 = arith.constant 5.000000e-01 : f32
    %388 = vector.broadcast %cst_130 : f32 to vector<8x128xf32>
    %389 = arith.mulf %388, %387 : vector<8x128xf32>
    %cst_131 = arith.constant 5.000000e-01 : f32
    %390 = vector.broadcast %cst_131 : f32 to vector<8x128xf32>
    %391 = arith.addf %389, %390 : vector<8x128xf32>
    %392 = vector.extract_strided_slice %385 {offsets = [0, 128], sizes = [8, 128], strides = [1, 1]} : vector<8x512xf32> to vector<8x128xf32>
    %393 = math.tanh %392 : vector<8x128xf32>
    %cst_132 = arith.constant 5.000000e-01 : f32
    %394 = vector.broadcast %cst_132 : f32 to vector<8x128xf32>
    %395 = arith.mulf %394, %393 : vector<8x128xf32>
    %cst_133 = arith.constant 5.000000e-01 : f32
    %396 = vector.broadcast %cst_133 : f32 to vector<8x128xf32>
    %397 = arith.addf %395, %396 : vector<8x128xf32>
    %398 = vector.extract_strided_slice %385 {offsets = [0, 256], sizes = [8, 128], strides = [1, 1]} : vector<8x512xf32> to vector<8x128xf32>
    %399 = math.tanh %398 : vector<8x128xf32>
    %400 = vector.extract_strided_slice %385 {offsets = [0, 384], sizes = [8, 128], strides = [1, 1]} : vector<8x512xf32> to vector<8x128xf32>
    %401 = math.tanh %400 : vector<8x128xf32>
    %cst_134 = arith.constant 5.000000e-01 : f32
    %402 = vector.broadcast %cst_134 : f32 to vector<8x128xf32>
    %403 = arith.mulf %402, %401 : vector<8x128xf32>
    %cst_135 = arith.constant 5.000000e-01 : f32
    %404 = vector.broadcast %cst_135 : f32 to vector<8x128xf32>
    %405 = arith.addf %403, %404 : vector<8x128xf32>
    %406 = arith.mulf %397, %347 : vector<8x128xf32>
    %407 = arith.mulf %391, %399 : vector<8x128xf32>
    %408 = arith.addf %406, %407 : vector<8x128xf32>
    %409 = math.tanh %408 : vector<8x128xf32>
    %410 = arith.mulf %405, %409 : vector<8x128xf32>
    %411 = arith.truncf %410 : vector<8x128xf32> to vector<8x128xbf16>
    %c0_136 = arith.constant 0 : index
    %c0_137 = arith.constant 0 : index
    %412 = vector.load %arg13[%c0_136, %c0_137] : memref<8x256xbf16, #tpu.memory_space<vmem>>, vector<8x128xbf16>
    tpu.vector_store %arg13[%c0_136, %c0_137], %411 {strides = array<i32>} : memref<8x256xbf16, #tpu.memory_space<vmem>>, vector<8x128xbf16>,
    %c0_138 = arith.constant 0 : index
    %c0_139 = arith.constant 0 : index
    %413 = vector.load %arg13[%c0_138, %c0_139] : memref<8x256xbf16, #tpu.memory_space<vmem>>, vector<8x256xbf16>
    %cst_140 = arith.constant dense<0.000000e+00> : vector<8x1024xf32>
    %414 = tpu.matmul %413, %11, %cst_140 {dimension_numbers = #tpu.dot_dimension_numbers<[1], [0], [0], [1], [0, 0, 1, 1], [], []>} : vector<8x256xbf16>, vector<256x1024xbf16>, vector<8x1024xf32> -> vector<8x1024xf32>
    %415 = vector.extract_strided_slice %414 {offsets = [0, 0], sizes = [8, 512], strides = [1, 1]} : vector<8x1024xf32> to vector<8x512xf32>
    %416 = vector.extract_strided_slice %414 {offsets = [0, 512], sizes = [8, 512], strides = [1, 1]} : vector<8x1024xf32> to vector<8x512xf32>
    %417 = arith.addf %416, %14 : vector<8x512xf32>
    %418 = vector.extract_strided_slice %417 {offsets = [0, 0], sizes = [8, 128], strides = [1, 1]} : vector<8x512xf32> to vector<8x128xf32>
    %419 = math.tanh %418 : vector<8x128xf32>
    %cst_141 = arith.constant 5.000000e-01 : f32
    %420 = vector.broadcast %cst_141 : f32 to vector<8x128xf32>
    %421 = arith.mulf %420, %419 : vector<8x128xf32>
    %cst_142 = arith.constant 5.000000e-01 : f32
    %422 = vector.broadcast %cst_142 : f32 to vector<8x128xf32>
    %423 = arith.addf %421, %422 : vector<8x128xf32>
    %424 = vector.extract_strided_slice %417 {offsets = [0, 128], sizes = [8, 128], strides = [1, 1]} : vector<8x512xf32> to vector<8x128xf32>
    %425 = math.tanh %424 : vector<8x128xf32>
    %cst_143 = arith.constant 5.000000e-01 : f32
    %426 = vector.broadcast %cst_143 : f32 to vector<8x128xf32>
    %427 = arith.mulf %426, %425 : vector<8x128xf32>
    %cst_144 = arith.constant 5.000000e-01 : f32
    %428 = vector.broadcast %cst_144 : f32 to vector<8x128xf32>
    %429 = arith.addf %427, %428 : vector<8x128xf32>
    %430 = vector.extract_strided_slice %417 {offsets = [0, 256], sizes = [8, 128], strides = [1, 1]} : vector<8x512xf32> to vector<8x128xf32>
    %431 = math.tanh %430 : vector<8x128xf32>
    %432 = vector.extract_strided_slice %417 {offsets = [0, 384], sizes = [8, 128], strides = [1, 1]} : vector<8x512xf32> to vector<8x128xf32>
    %433 = math.tanh %432 : vector<8x128xf32>
    %cst_145 = arith.constant 5.000000e-01 : f32
    %434 = vector.broadcast %cst_145 : f32 to vector<8x128xf32>
    %435 = arith.mulf %434, %433 : vector<8x128xf32>
    %cst_146 = arith.constant 5.000000e-01 : f32
    %436 = vector.broadcast %cst_146 : f32 to vector<8x128xf32>
    %437 = arith.addf %435, %436 : vector<8x128xf32>
    %438 = arith.mulf %429, %379 : vector<8x128xf32>
    %439 = arith.mulf %423, %431 : vector<8x128xf32>
    %440 = arith.addf %438, %439 : vector<8x128xf32>
    %441 = math.tanh %440 : vector<8x128xf32>
    %442 = arith.mulf %437, %441 : vector<8x128xf32>
    %443 = arith.truncf %442 : vector<8x128xf32> to vector<8x128xbf16>
    %c0_147 = arith.constant 0 : index
    %c128_148 = arith.constant 128 : index
    %444 = vector.load %arg13[%c0_147, %c128_148] : memref<8x256xbf16, #tpu.memory_space<vmem>>, vector<8x128xbf16>
    tpu.vector_store %arg13[%c0_147, %c128_148], %443 {strides = array<i32>} : memref<8x256xbf16, #tpu.memory_space<vmem>>, vector<8x128xbf16>,
    %445 = vector.extract_strided_slice %10 {offsets = [56, 0], sizes = [8, 512], strides = [1, 1]} : vector<64x512xf32> to vector<8x512xf32>
    %446 = arith.addf %445, %415 : vector<8x512xf32>
    %447 = vector.extract_strided_slice %446 {offsets = [0, 0], sizes = [8, 128], strides = [1, 1]} : vector<8x512xf32> to vector<8x128xf32>
    %448 = math.tanh %447 : vector<8x128xf32>
    %cst_149 = arith.constant 5.000000e-01 : f32
    %449 = vector.broadcast %cst_149 : f32 to vector<8x128xf32>
    %450 = arith.mulf %449, %448 : vector<8x128xf32>
    %cst_150 = arith.constant 5.000000e-01 : f32
    %451 = vector.broadcast %cst_150 : f32 to vector<8x128xf32>
    %452 = arith.addf %450, %451 : vector<8x128xf32>
    %453 = vector.extract_strided_slice %446 {offsets = [0, 128], sizes = [8, 128], strides = [1, 1]} : vector<8x512xf32> to vector<8x128xf32>
    %454 = math.tanh %453 : vector<8x128xf32>
    %cst_151 = arith.constant 5.000000e-01 : f32
    %455 = vector.broadcast %cst_151 : f32 to vector<8x128xf32>
    %456 = arith.mulf %455, %454 : vector<8x128xf32>
    %cst_152 = arith.constant 5.000000e-01 : f32
    %457 = vector.broadcast %cst_152 : f32 to vector<8x128xf32>
    %458 = arith.addf %456, %457 : vector<8x128xf32>
    %459 = vector.extract_strided_slice %446 {offsets = [0, 256], sizes = [8, 128], strides = [1, 1]} : vector<8x512xf32> to vector<8x128xf32>
    %460 = math.tanh %459 : vector<8x128xf32>
    %461 = vector.extract_strided_slice %446 {offsets = [0, 384], sizes = [8, 128], strides = [1, 1]} : vector<8x512xf32> to vector<8x128xf32>
    %462 = math.tanh %461 : vector<8x128xf32>
    %cst_153 = arith.constant 5.000000e-01 : f32
    %463 = vector.broadcast %cst_153 : f32 to vector<8x128xf32>
    %464 = arith.mulf %463, %462 : vector<8x128xf32>
    %cst_154 = arith.constant 5.000000e-01 : f32
    %465 = vector.broadcast %cst_154 : f32 to vector<8x128xf32>
    %466 = arith.addf %464, %465 : vector<8x128xf32>
    %467 = arith.mulf %458, %408 : vector<8x128xf32>
    %468 = arith.mulf %452, %460 : vector<8x128xf32>
    %469 = arith.addf %467, %468 : vector<8x128xf32>
    %470 = math.tanh %469 : vector<8x128xf32>
    %471 = arith.mulf %466, %470 : vector<8x128xf32>
    %472 = arith.truncf %471 : vector<8x128xf32> to vector<8x128xbf16>
    %c0_155 = arith.constant 0 : index
    %c0_156 = arith.constant 0 : index
    %473 = vector.load %arg13[%c0_155, %c0_156] : memref<8x256xbf16, #tpu.memory_space<vmem>>, vector<8x128xbf16>
    tpu.vector_store %arg13[%c0_155, %c0_156], %472 {strides = array<i32>} : memref<8x256xbf16, #tpu.memory_space<vmem>>, vector<8x128xbf16>,
    %c0_157 = arith.constant 0 : index
    %c0_158 = arith.constant 0 : index
    %474 = vector.load %arg13[%c0_157, %c0_158] : memref<8x256xbf16, #tpu.memory_space<vmem>>, vector<8x256xbf16>
    %cst_159 = arith.constant dense<0.000000e+00> : vector<8x1024xf32>
    %475 = tpu.matmul %474, %11, %cst_159 {dimension_numbers = #tpu.dot_dimension_numbers<[1], [0], [0], [1], [0, 0, 1, 1], [], []>} : vector<8x256xbf16>, vector<256x1024xbf16>, vector<8x1024xf32> -> vector<8x1024xf32>
    %476 = vector.extract_strided_slice %475 {offsets = [0, 0], sizes = [8, 512], strides = [1, 1]} : vector<8x1024xf32> to vector<8x512xf32>
    %477 = vector.extract_strided_slice %475 {offsets = [0, 512], sizes = [8, 512], strides = [1, 1]} : vector<8x1024xf32> to vector<8x512xf32>
    %478 = arith.addf %477, %14 : vector<8x512xf32>
    %479 = vector.extract_strided_slice %478 {offsets = [0, 0], sizes = [8, 128], strides = [1, 1]} : vector<8x512xf32> to vector<8x128xf32>
    %480 = math.tanh %479 : vector<8x128xf32>
    %cst_160 = arith.constant 5.000000e-01 : f32
    %481 = vector.broadcast %cst_160 : f32 to vector<8x128xf32>
    %482 = arith.mulf %481, %480 : vector<8x128xf32>
    %cst_161 = arith.constant 5.000000e-01 : f32
    %483 = vector.broadcast %cst_161 : f32 to vector<8x128xf32>
    %484 = arith.addf %482, %483 : vector<8x128xf32>
    %485 = vector.extract_strided_slice %478 {offsets = [0, 128], sizes = [8, 128], strides = [1, 1]} : vector<8x512xf32> to vector<8x128xf32>
    %486 = math.tanh %485 : vector<8x128xf32>
    %cst_162 = arith.constant 5.000000e-01 : f32
    %487 = vector.broadcast %cst_162 : f32 to vector<8x128xf32>
    %488 = arith.mulf %487, %486 : vector<8x128xf32>
    %cst_163 = arith.constant 5.000000e-01 : f32
    %489 = vector.broadcast %cst_163 : f32 to vector<8x128xf32>
    %490 = arith.addf %488, %489 : vector<8x128xf32>
    %491 = vector.extract_strided_slice %478 {offsets = [0, 256], sizes = [8, 128], strides = [1, 1]} : vector<8x512xf32> to vector<8x128xf32>
    %492 = math.tanh %491 : vector<8x128xf32>
    %493 = vector.extract_strided_slice %478 {offsets = [0, 384], sizes = [8, 128], strides = [1, 1]} : vector<8x512xf32> to vector<8x128xf32>
    %494 = math.tanh %493 : vector<8x128xf32>
    %cst_164 = arith.constant 5.000000e-01 : f32
    %495 = vector.broadcast %cst_164 : f32 to vector<8x128xf32>
    %496 = arith.mulf %495, %494 : vector<8x128xf32>
    %cst_165 = arith.constant 5.000000e-01 : f32
    %497 = vector.broadcast %cst_165 : f32 to vector<8x128xf32>
    %498 = arith.addf %496, %497 : vector<8x128xf32>
    %499 = arith.mulf %490, %440 : vector<8x128xf32>
    %500 = arith.mulf %484, %492 : vector<8x128xf32>
    %501 = arith.addf %499, %500 : vector<8x128xf32>
    %502 = math.tanh %501 : vector<8x128xf32>
    %503 = arith.mulf %498, %502 : vector<8x128xf32>
    %504 = arith.truncf %503 : vector<8x128xf32> to vector<8x128xbf16>
    %c0_166 = arith.constant 0 : index
    %c128_167 = arith.constant 128 : index
    %505 = vector.load %arg13[%c0_166, %c128_167] : memref<8x256xbf16, #tpu.memory_space<vmem>>, vector<8x128xbf16>
    tpu.vector_store %arg13[%c0_166, %c128_167], %504 {strides = array<i32>} : memref<8x256xbf16, #tpu.memory_space<vmem>>, vector<8x128xbf16>,
    %c0_168 = arith.constant 0 : index
    %c0_169 = arith.constant 0 : index
    %506 = vector.load %arg10[%c0_168, %c0_169] : memref<8x128xf32, #tpu.memory_space<vmem>>, vector<8x128xf32>
    tpu.vector_store %arg10[%c0_168, %c0_169], %469 {strides = array<i32>} : memref<8x128xf32, #tpu.memory_space<vmem>>, vector<8x128xf32>,
    %c0_170 = arith.constant 0 : index
    %c0_171 = arith.constant 0 : index
    %507 = vector.load %arg11[%c0_170, %c0_171] : memref<8x128xf32, #tpu.memory_space<vmem>>, vector<8x128xf32>
    tpu.vector_store %arg11[%c0_170, %c0_171], %501 {strides = array<i32>} : memref<8x128xf32, #tpu.memory_space<vmem>>, vector<8x128xf32>,
    %c0_172 = arith.constant 0 : index
    %c0_173 = arith.constant 0 : index
    %508 = vector.load %arg12[%c0_172, %c0_173] : memref<8x512xf32, #tpu.memory_space<vmem>>, vector<8x512xf32>
    tpu.vector_store %arg12[%c0_172, %c0_173], %476 {strides = array<i32>} : memref<8x512xf32, #tpu.memory_space<vmem>>, vector<8x512xf32>,
    %c0_i32_174 = arith.constant 0 : i32
    %509 = arith.cmpi eq, %arg1, %c0_i32_174 : i32
    %510 = arith.extui %509 : i1 to i32
    %c0_i32_175 = arith.constant 0 : i32
    %511 = arith.cmpi ne, %510, %c0_i32_175 : i32
    scf.if %511 {
      %512 = arith.truncf %503 : vector<8x128xf32> to vector<8x128xbf16>
      %c0_176 = arith.constant 0 : index
      %c0_177 = arith.constant 0 : index
      %513 = vector.load %arg7[%c0_176, %c0_177] : memref<128x128xbf16, #tpu.memory_space<vmem>>, vector<128x128xbf16>
      %cst_178 = arith.constant dense<0.000000e+00> : vector<8x128xf32>
      %514 = tpu.matmul %512, %513, %cst_178 {dimension_numbers = #tpu.dot_dimension_numbers<[1], [0], [0], [1], [0, 0, 1, 1], [], []>} : vector<8x128xbf16>, vector<128x128xbf16>, vector<8x128xf32> -> vector<8x128xf32>
      %c0_179 = arith.constant 0 : index
      %c0_180 = arith.constant 0 : index
      %515 = vector.load %arg8[%c0_179, %c0_180] : memref<1x128xf32, #tpu.memory_space<vmem>>, vector<1x128xf32>
      %516 = vector.broadcast %515 : vector<1x128xf32> to vector<8x128xf32>
      %517 = arith.addf %514, %516 : vector<8x128xf32>
      %c0_181 = arith.constant 0 : index
      %c0_182 = arith.constant 0 : index
      %518 = vector.load %arg9[%c0_181, %c0_182] : memref<8x128xf32, #tpu.memory_space<vmem>>, vector<8x128xf32>
      tpu.vector_store %arg9[%c0_181, %c0_182], %517 {strides = array<i32>} : memref<8x128xf32, #tpu.memory_space<vmem>>, vector<8x128xf32>,
    } else {
    }
    return
  }
  func.func @transform_0(%arg0: i32, %arg1: i32) -> (i32, i32, i32) {
    %c0_i32 = arith.constant 0 : i32
    %c0_i32_0 = arith.constant 0 : i32
    return %arg1, %arg0, %c0_i32 : i32, i32, i32
  }
  func.func @transform_1(%arg0: i32, %arg1: i32) -> (i32, i32) {
    %c0_i32 = arith.constant 0 : i32
    %c0_i32_0 = arith.constant 0 : i32
    %c0_i32_1 = arith.constant 0 : i32
    return %c0_i32, %c0_i32_0 : i32, i32
  }
  func.func @transform_2(%arg0: i32, %arg1: i32) -> (i32, i32) {
    %c0_i32 = arith.constant 0 : i32
    %c0_i32_0 = arith.constant 0 : i32
    %c0_i32_1 = arith.constant 0 : i32
    return %c0_i32, %c0_i32_0 : i32, i32
  }
  func.func @transform_3(%arg0: i32, %arg1: i32) -> (i32, i32) {
    %c0_i32 = arith.constant 0 : i32
    %c0_i32_0 = arith.constant 0 : i32
    %c0_i32_1 = arith.constant 0 : i32
    return %c0_i32, %c0_i32_0 : i32, i32
  }
  func.func @transform_4(%arg0: i32, %arg1: i32) -> (i32, i32) {
    %c0_i32 = arith.constant 0 : i32
    %c0_i32_0 = arith.constant 0 : i32
    %c0_i32_1 = arith.constant 0 : i32
    return %c0_i32, %c0_i32_0 : i32, i32
  }
  func.func @transform_5(%arg0: i32, %arg1: i32) -> (i32, i32) {
    %c0_i32 = arith.constant 0 : i32
    %c0_i32_0 = arith.constant 0 : i32
    %c0_i32_1 = arith.constant 0 : i32
    return %c0_i32, %c0_i32_0 : i32, i32
  }
  func.func @transform_6(%arg0: i32, %arg1: i32) -> (i32, i32) {
    %c0_i32 = arith.constant 0 : i32
    %c0_i32_0 = arith.constant 0 : i32
    %c0_i32_1 = arith.constant 0 : i32
    return %c0_i32, %c0_i32_0 : i32, i32
  }
  func.func @transform_7(%arg0: i32, %arg1: i32) -> (i32, i32) {
    %c0_i32 = arith.constant 0 : i32
    %c0_i32_0 = arith.constant 0 : i32
    return %arg0, %c0_i32 : i32, i32
  }
}

</mosaic_0001>

<bundles_post_ra>
// kernel: lstm_model_forward.1
= control target key start
LH: loop header
LB: loop body
LE: loop exit
PB: predicated region body
PF: predicated region fallthrough
CT: control target
= control target key end

     0   :  { %vm84_vm0 = vcmask 130048   ;;  %s6616_s1 = inlined_call_operand.vmem [shape: bf16[16,512], index: 1, kind: input, shape index: {}]   ;;  %s6617_s0 = inlined_call_operand.vmem [shape: f32[8,8,16], index: 0, kind: input, shape index: {}]   ;;  %s6618_s3 = inlined_call_operand.vmem [shape: bf16[256,1024], index: 3, kind: input, shape index: {}]   ;;  %s6619_s2 = inlined_call_operand.vmem [shape: f32[1,512], index: 2, kind: input, shape index: {}]   ;;  %s6620_s4 = inlined_call_operand.vmem [shape: f32[1,512], index: 4, kind: input, shape index: {}]   ;;  %s6621_s6 = inlined_call_operand.vmem [shape: f32[1,128], index: 6, kind: input, shape index: {}]   ;;  %s6622_s5 = inlined_call_operand.vmem [shape: bf16[128,128], index: 5, kind: input, shape index: {}]   ;;  %s6623_s7 = inlined_call_operand.vmem [shape: f32[8,128], index: 7, kind: output, shape index: {}]  }
   0x1   :  { %v3158_v0 = vld [vmem:[%s6616_s1] sm:$0xf]  ;;  %v3734_v1 = vld [vmem:[%s6616_s1 + $0xc] sm:$0xf0]  ;;  %v45_v4 = vld [vmem:[%s6617_s0 + $0x38] sm:$0xff] }
   0x2   :  { %v44_v2 = vld [vmem:[%s6617_s0 + $0x30] sm:$0xff]  ;;  %v3159_v3 = vor.u32 %v3734_v1, %v3158_v0  ;;  %v3166_v5 = vld [vmem:[%s6616_s1 + $0x8] sm:$0xf]  ;;  %v3735_v6 = vld [vmem:[%s6616_s1 + $0x14] sm:$0xf0] }
   0x3   :  { %v4094_v7 = vpack.c.bf16 %v45_v4, %v44_v2  ;;  %v3167_v8 = vor.u32 %v3735_v6, %v3166_v5  ;;  %v38_v9 = vld [vmem:[%s6617_s0] sm:$0xff]  ;;  %v39_v10 = vld [vmem:[%s6617_s0 + $0x8] sm:$0xff]  ;;  %v3168_v13 = vld [vmem:[%s6616_s1 + $0x18] sm:$0xf0] }
   0x4   :  { %v3733_v11 = vld [vmem:[%s6616_s1 + $0xc] sm:$0xf]  ;;  %3872 = vmatpush.bf16.msra.mxu1 %v3159_v3  ;;  %104 = vmatpush.bf16.msra.mxu0 %v3159_v3  ;;  %v46_v12 = vpack.c.bf16 %v39_v10, %v38_v9  ;;  %v3732_v14 = vld [vmem:[%s6616_s1 + $0x4] sm:$0xf]  ;;  %v3160_v15 = vld [vmem:[%s6616_s1 + $0x10] sm:$0xf0] }
   0x5   :  { %162 = vmatpush.bf16.msra.mxu2 %v3167_v8  ;;  %v3171_v16 = vor.u32 %v3733_v11, %v3168_v13  ;;  %v3163_v17 = vor.u32 %v3732_v14, %v3160_v15  ;;  %v3414_v18 = vld [vmem:[%s6618_s3 + $0x1c0] sm:$0xf]  ;;  %v3792_v23 = vld [vmem:[%s6618_s3 + $0x1c4] sm:$0xf]  ;;  %v40_v30 = vld [vmem:[%s6617_s0 + $0x10] sm:$0xff] }
   0x6   :  { %v3796_v19 = vld [vmem:[%s6618_s3 + $0x1dc] sm:$0xf0]  ;;  %v3416_v24 = vld [vmem:[%s6618_s3 + $0x1e0] sm:$0xf0]  ;;  %v41_v31 = vld [vmem:[%s6617_s0 + $0x18] sm:$0xff] }
   0x7   :  { %v3670_v20 = vld [vmem:[%s6618_s3 + $0x3c0] sm:$0xf]  ;;  %v4123_v21 = vor.u32 %v3796_v19, %v3414_v18  ;;  %3175 = vmatmul.msk.bf16.vlgmr.msra.gmra.mxu1 %vm84_vm0, %v4094_v7  ;;  %3172 = vmatmul.msk.bf16.vlgmr.msra.gmra.mxu0 %vm84_vm0, %v46_v12  ;;  %v4139_v26 = vor.u32 %v3792_v23, %v3416_v24  ;;  %v3856_v27 = vld [vmem:[%s6618_s3 + $0x3c4] sm:$0xf]  ;;  %v47_v32 = vpack.c.bf16 %v41_v31, %v40_v30  ;;  %v43_v19 = vld [vmem:[%s6617_s0 + $0x28] sm:$0xff] }
   0x8   :  { %v3860_v22 = vld [vmem:[%s6618_s3 + $0x3dc] sm:$0xf0]  ;;  %v3672_v28 = vld [vmem:[%s6618_s3 + $0x3e0] sm:$0xf0]  ;;  %3180 = vmatmul.msk.bf16.vlgmr.msra.gmra.mxu2 %vm84_vm0, %v46_v12  ;;  %191 = vmatpush.bf16.msra.mxu3 %v3171_v16 }
   0x9   :  { %6917 = vst [vmem:[#allocation6_spill] sm:$0xff] %v4123_v21  ;;  %v4137_v25 = vor.u32 %v3860_v22, %v3670_v20  ;;  %v4148_v29 = vor.u32 %v3856_v27, %v3672_v28  ;;  %133 = vmatpush.bf16.msrb.mxu1 %v3163_v17  ;;  %1026 = vmatpush.bf16.msrb.mxu0 %v4123_v21  ;;  %v3382_v33 = vld [vmem:[%s6618_s3 + $0x180] sm:$0xf]  ;;  %v3784_v38 = vld [vmem:[%s6618_s3 + $0x184] sm:$0xf] }
   0xa   :  { %6919 = vst [vmem:[#allocation8_spill] sm:$0xff] %v4139_v26  ;;  %1052 = vmatpush.bf16.msrb.mxu2 %v4139_v26  ;;  %v3788_v34 = vld [vmem:[%s6618_s3 + $0x19c] sm:$0xf0]  ;;  %v3384_v39 = vld [vmem:[%s6618_s3 + $0x1a0] sm:$0xf0] }
   0xb   :  { %6918 = vst [vmem:[#allocation7_spill] sm:$0xff] %v4137_v25  ;;  %3184 = vmatmul.msk.bf16.vlgmr.msra.gmra.mxu3 %vm84_vm0, %v46_v12  ;;  %v3638_v35 = vld [vmem:[%s6618_s3 + $0x380] sm:$0xf]  ;;  %v4173_v36 = vor.u32 %v3788_v34, %v3382_v33  ;;  %v4187_v41 = vor.u32 %v3784_v38, %v3384_v39  ;;  %v3848_v42 = vld [vmem:[%s6618_s3 + $0x384] sm:$0xf] }
   0xc   :  { %6920 = vst [vmem:[#allocation9_spill] sm:$0xff] %v4148_v29  ;;  %1065 = vmatpush.bf16.msrb.mxu3 %v4148_v29  ;;  %v3852_v37 = vld [vmem:[%s6618_s3 + $0x39c] sm:$0xf0]  ;;  %v3640_v43 = vld [vmem:[%s6618_s3 + $0x3a0] sm:$0xf0] }
   0xd   :  { %1039 = vmatpush.bf16.msra.mxu1 %v4137_v25  ;;  %6921 = vst [vmem:[#allocation10_spill] sm:$0xff] %v4173_v36  ;;  %v4185_v40 = vor.u32 %v3852_v37, %v3638_v35  ;;  %v3350_v44 = vld [vmem:[%s6618_s3 + $0x140] sm:$0xf]  ;;  %1027 = vmatpush.bf16.msrb.mxu0 %v4173_v36  ;;  %v4200_v45 = vor.u32 %v3848_v42, %v3640_v43  ;;  %v3776_v51 = vld [vmem:[%s6618_s3 + $0x144] sm:$0xf] }
   0xe   :  { %6923 = vst [vmem:[#allocation12_spill] sm:$0xff] %v4187_v41  ;;  %v3780_v46 = vld [vmem:[%s6618_s3 + $0x15c] sm:$0xf0]  ;;  %1053 = vmatpush.bf16.msrb.mxu2 %v4187_v41  ;;  %v3352_v52 = vld [vmem:[%s6618_s3 + $0x160] sm:$0xf0] }
   0xf   :  { %6922 = vst [vmem:[#allocation11_spill] sm:$0xff] %v4185_v40  ;;  %v3606_v47 = vld [vmem:[%s6618_s3 + $0x340] sm:$0xf]  ;;  %v4213_v49 = vor.u32 %v3780_v46, %v3350_v44  ;;  %v3840_v53 = vld [vmem:[%s6618_s3 + $0x344] sm:$0xf]  ;;  %v4227_v54 = vor.u32 %v3776_v51, %v3352_v52 }
  0x10   :  { %6924 = vst [vmem:[#allocation13_spill] sm:$0xff] %v4200_v45  ;;  %v3844_v48 = vld [vmem:[%s6618_s3 + $0x35c] sm:$0xf0]  ;;  %1066 = vmatpush.bf16.msrb.mxu3 %v4200_v45  ;;  %v3608_v55 = vld [vmem:[%s6618_s3 + $0x360] sm:$0xf0] }
  0x11   :  { %1040 = vmatpush.bf16.msra.mxu1 %v4185_v40  ;;  %6925 = vst [vmem:[#allocation14_spill] sm:$0xff] %v4213_v49  ;;  %v4215_v50 = vor.u32 %v3844_v48, %v3606_v47  ;;  %v4232_v56 = vor.u32 %v3840_v53, %v3608_v55  ;;  %1028 = vmatpush.bf16.msrb.mxu0 %v4213_v49  ;;  %v3318_v57 = vld [vmem:[%s6618_s3 + $0x100] sm:$0xf]  ;;  %v3768_v62 = vld [vmem:[%s6618_s3 + $0x104] sm:$0xf] }
  0x12   :  { %6927 = vst [vmem:[#allocation16_spill] sm:$0xff] %v4227_v54  ;;  %1054 = vmatpush.bf16.msrb.mxu2 %v4227_v54  ;;  %v3772_v58 = vld [vmem:[%s6618_s3 + $0x11c] sm:$0xf0]  ;;  %v3320_v63 = vld [vmem:[%s6618_s3 + $0x120] sm:$0xf0] }
  0x13   :  { %6926 = vst [vmem:[#allocation15_spill] sm:$0xff] %v4215_v50  ;;  %v3574_v59 = vld [vmem:[%s6618_s3 + $0x300] sm:$0xf]  ;;  %v4247_v60 = vor.u32 %v3772_v58, %v3318_v57  ;;  %v4260_v1 = vor.u32 %v3768_v62, %v3320_v63  ;;  %v3832_v2 = vld [vmem:[%s6618_s3 + $0x304] sm:$0xf] }
  0x14   :  { %6928 = vst [vmem:[#allocation17_spill] sm:$0xff] %v4232_v56  ;;  %1067 = vmatpush.bf16.msrb.mxu3 %v4232_v56  ;;  %v3836_v61 = vld [vmem:[%s6618_s3 + $0x31c] sm:$0xf0]  ;;  %v3576_v3 = vld [vmem:[%s6618_s3 + $0x320] sm:$0xf0] }
  0x15   :  { %1041 = vmatpush.bf16.msra.mxu1 %v4215_v50  ;;  %6929 = vst [vmem:[#allocation18_spill] sm:$0xff] %v4247_v60  ;;  %v4258_v0 = vor.u32 %v3836_v61, %v3574_v59  ;;  %1029 = vmatpush.bf16.msrb.mxu0 %v4247_v60  ;;  %v4269_v4 = vor.u32 %v3832_v2, %v3576_v3  ;;  %v3286_v5 = vld [vmem:[%s6618_s3 + $0xc0] sm:$0xf]  ;;  %v3760_v11 = vld [vmem:[%s6618_s3 + $0xc4] sm:$0xf] }
  0x16   :  { %6931 = vst [vmem:[#allocation20_spill] sm:$0xff] %v4260_v1  ;;  %1055 = vmatpush.bf16.msrb.mxu2 %v4260_v1  ;;  %v3764_v6 = vld [vmem:[%s6618_s3 + $0xdc] sm:$0xf0]  ;;  %v3288_v13 = vld [vmem:[%s6618_s3 + $0xe0] sm:$0xf0] }
  0x17   :  { %3176 = vmatmul.msk.bf16.vlgmr.msrb.gmra.mxu1 %vm84_vm0, %v46_v12  ;;  %3173 = vmatmul.msk.bf16.gmra.mxu0 %vm84_vm0, %v47_v32  ;;  %6930 = vst [vmem:[#allocation19_spill] sm:$0xff] %v4258_v0  ;;  %v4280_v8 = vor.u32 %v3764_v6, %v3286_v5  ;;  %v3542_v9 = vld [vmem:[%s6618_s3 + $0x2c0] sm:$0xf]  ;;  %v3824_v14 = vld [vmem:[%s6618_s3 + $0x2c4] sm:$0xf]  ;;  %v4303_v16 = vor.u32 %v3760_v11, %v3288_v13 }
  0x18   :  { %3181 = vmatmul.msk.bf16.gmra.mxu2 %vm84_vm0, %v47_v32  ;;  %6932 = vst [vmem:[#allocation21_spill] sm:$0xff] %v4269_v4  ;;  %1068 = vmatpush.bf16.msrb.mxu3 %v4269_v4  ;;  %v3828_v10 = vld [vmem:[%s6618_s3 + $0x2dc] sm:$0xf0]  ;;  %v3544_v15 = vld [vmem:[%s6618_s3 + $0x2e0] sm:$0xf0] }
  0x19   :  { %1042 = vmatpush.bf16.msra.mxu1 %v4258_v0  ;;  %6933 = vst [vmem:[#allocation22_spill] sm:$0xff] %v4280_v8  ;;  %v4291_v12 = vor.u32 %v3828_v10, %v3542_v9  ;;  %1030 = vmatpush.bf16.msrb.mxu0 %v4280_v8  ;;  %v4305_v17 = vor.u32 %v3824_v14, %v3544_v15  ;;  %v42_v18 = vld [vmem:[%s6617_s0 + $0x20] sm:$0xff]  ;;  %v3422_v11 = vld [vmem:[%s6618_s3 + $0x1c8] sm:$0xf] }
  0x1a   :  { %6935 = vst [vmem:[#allocation24_spill] sm:$0xff] %v4303_v16  ;;  %v48_v20 = vpack.c.bf16 %v43_v19, %v42_v18  ;;  %v3254_v22 = vld [vmem:[%s6618_s3 + $0x80] sm:$0xf]  ;;  %1056 = vmatpush.bf16.msrb.mxu2 %v4303_v16  ;;  %v3752_v30 = vld [vmem:[%s6618_s3 + $0x84] sm:$0xf] }
  0x1b   :  { %3185 = vmatmul.msk.bf16.gmra.mxu3 %vm84_vm0, %v47_v32  ;;  %6934 = vst [vmem:[#allocation23_spill] sm:$0xff] %v4291_v12  ;;  %v3756_v23 = vld [vmem:[%s6618_s3 + $0x9c] sm:$0xf0]  ;;  %v3256_v31 = vld [vmem:[%s6618_s3 + $0xa0] sm:$0xf0] }
  0x1c   :  { %6936 = vst [vmem:[#allocation25_spill] sm:$0xff] %v4305_v17  ;;  %v3510_v24 = vld [vmem:[%s6618_s3 + $0x280] sm:$0xf]  ;;  %1069 = vmatpush.bf16.msrb.mxu3 %v4305_v17  ;;  %v4325_v27 = vor.u32 %v3756_v23, %v3254_v22  ;;  %v4340_v33 = vor.u32 %v3752_v30, %v3256_v31  ;;  %v3816_v34 = vld [vmem:[%s6618_s3 + $0x284] sm:$0xf] }
  0x1d   :  { %1043 = vmatpush.bf16.msra.mxu1 %v4291_v12  ;;  %v3820_v28 = vld [vmem:[%s6618_s3 + $0x29c] sm:$0xf0]  ;;  %v3512_v35 = vld [vmem:[%s6618_s3 + $0x2a0] sm:$0xf0]  ;;  %v3797_v13 = vld [vmem:[%s6618_s3 + $0x1e4] sm:$0xf0] }
  0x1e   :  { %6937 = vst [vmem:[#allocation26_spill] sm:$0xff] %v4325_v27  ;;  %1031 = vmatpush.bf16.msrb.mxu0 %v4325_v27  ;;  %v4350_v37 = vor.u32 %v3816_v34, %v3512_v35  ;;  %v3222_v38 = vld [vmem:[%s6618_s3 + $0x40] sm:$0xf]  ;;  %1057 = vmatpush.bf16.msrb.mxu2 %v4340_v33  ;;  %v3744_v46 = vld [vmem:[%s6618_s3 + $0x44] sm:$0xf]  ;;  %v4435_v15 = vor.u32 %v3797_v13, %v3422_v11  ;;  %v4035_v13 = vmov 0  }
  0x1f   :  { %6939 = vst [vmem:[#allocation28_spill] sm:$0xff] %v4340_v33  ;;  %v3748_v39 = vld [vmem:[%s6618_s3 + $0x5c] sm:$0xf0]  ;;  %v3224_v47 = vld [vmem:[%s6618_s3 + $0x60] sm:$0xf0] }
  0x20   :  { %6940 = vst [vmem:[#allocation29_spill] sm:$0xff] %v4350_v37  ;;  %v3478_v42 = vld [vmem:[%s6618_s3 + $0x240] sm:$0xf]  ;;  %1070 = vmatpush.bf16.msrb.mxu3 %v4350_v37  ;;  %v4365_v43 = vor.u32 %v3748_v39, %v3222_v38  ;;  %v4378_v51 = vor.u32 %v3744_v46, %v3224_v47  ;;  %v3808_v52 = vld [vmem:[%s6618_s3 + $0x244] sm:$0xf] }
  0x21   :  { %v3812_v44 = vld [vmem:[%s6618_s3 + $0x25c] sm:$0xf0]  ;;  %v3480_v53 = vld [vmem:[%s6618_s3 + $0x260] sm:$0xf0]  ;;  %v3678_v14 = vld [vmem:[%s6618_s3 + $0x3c8] sm:$0xf] }
  0x22   :  { %6941 = vst [vmem:[#allocation30_spill] sm:$0xff] %v4365_v43  ;;  %v4376_v48 = vor.u32 %v3812_v44, %v3478_v42  ;;  %1032 = vmatpush.bf16.msrb.mxu0 %v4365_v43  ;;  %v4387_v55 = vor.u32 %v3808_v52, %v3480_v53  ;;  %v3190_v57 = vld [vmem:[%s6618_s3] sm:$0xf]  ;;  %1058 = vmatpush.bf16.msrb.mxu2 %v4378_v51  ;;  %v3736_v63 = vld [vmem:[%s6618_s3 + $0x4] sm:$0xf] }
  0x23   :  { %6943 = vst [vmem:[#allocation32_spill] sm:$0xff] %v4378_v51  ;;  %v3740_v58 = vld [vmem:[%s6618_s3 + $0x1c] sm:$0xf0]  ;;  %v3192_v2 = vld [vmem:[%s6618_s3 + $0x20] sm:$0xf0] }
  0x24   :  { %6942 = vst [vmem:[#allocation31_spill] sm:$0xff] %v4376_v48  ;;  %v3446_v59 = vld [vmem:[%s6618_s3 + $0x200] sm:$0xf]  ;;  %1071 = vmatpush.bf16.msrb.mxu3 %v4387_v55  ;;  %v4401_v61 = vor.u32 %v3740_v58, %v3190_v57  ;;  %v4414_v5 = vor.u32 %v3736_v63, %v3192_v2  ;;  %v3800_v6 = vld [vmem:[%s6618_s3 + $0x204] sm:$0xf] }
  0x25   :  { %6944 = vst [vmem:[#allocation33_spill] sm:$0xff] %v4387_v55  ;;  %v3804_v62 = vld [vmem:[%s6618_s3 + $0x21c] sm:$0xf0]  ;;  %v3448_v9 = vld [vmem:[%s6618_s3 + $0x220] sm:$0xf0] }
  0x26   :  { %6945 = vst [vmem:[#allocation34_spill] sm:$0xff] %v4401_v61  ;;  %v4412_v3 = vor.u32 %v3804_v62, %v3446_v59  ;;  %1033 = vmatpush.bf16.msrb.mxu0 %v4401_v61  ;;  %v4423_v10 = vor.u32 %v3800_v6, %v3448_v9  ;;  %v3861_v18 = vld [vmem:[%s6618_s3 + $0x3e4] sm:$0xf0]  ;;  %v3793_v19 = vld [vmem:[%s6618_s3 + $0x1cc] sm:$0xf]  ;;  %1059 = vmatpush.bf16.msrb.mxu2 %v4414_v5 }
  0x27   :  { %3177 = vmatmul.msk.bf16.gmra.mxu1 %vm84_vm0, %v47_v32  ;;  %v4338_v32 = vor.u32 %v3820_v28, %v3510_v24  ;;  %3174 = vmatmul.msk.bf16.gmra.mxu0 %vm84_vm0, %v48_v20  ;;  %6947 = vst [vmem:[#allocation36_spill] sm:$0xff] %v4414_v5  ;;  %v4448_v22 = vor.u32 %v3861_v18, %v3678_v14  ;;  %v3857_v24 = vld [vmem:[%s6618_s3 + $0x3cc] sm:$0xf]  ;;  %v3390_v30 = vld [vmem:[%s6618_s3 + $0x188] sm:$0xf] }
  0x28   :  { %3182 = vmatmul.msk.bf16.gmra.mxu2 %vm84_vm0, %v48_v20  ;;  %6946 = vst [vmem:[#allocation35_spill] sm:$0xff] %v4412_v3  ;;  %1072 = vmatpush.bf16.msrb.mxu3 %v4423_v10  ;;  %v3680_v28 = vld [vmem:[%s6618_s3 + $0x3e8] sm:$0xf0]  ;;  %v3789_v34 = vld [vmem:[%s6618_s3 + $0x1a4] sm:$0xf0] }
  0x29   :  { %6938 = vst [vmem:[#allocation27_spill] sm:$0xff] %v4338_v32  ;;  %1044 = vmatpush.bf16.msra.mxu1 %v4338_v32  ;;  %v4462_v31 = vor.u32 %v3857_v24, %v3680_v28  ;;  %v3646_v35 = vld [vmem:[%s6618_s3 + $0x388] sm:$0xf]  ;;  %v4475_v39 = vor.u32 %v3789_v34, %v3390_v30  ;;  %v3785_v44 = vld [vmem:[%s6618_s3 + $0x18c] sm:$0xf] }
  0x2a   :  { %6948 = vst [vmem:[#allocation37_spill] sm:$0xff] %v4423_v10  ;;  %1078 = vmatpush.bf16.msra.mxu0 %v4435_v15  ;;  %v3853_v38 = vld [vmem:[%s6618_s3 + $0x3a4] sm:$0xf0]  ;;  %v3392_v46 = vld [vmem:[%s6618_s3 + $0x1a8] sm:$0xf0] }
  0x2b   :  { %3186 = vmatmul.msk.bf16.gmra.mxu3 %vm84_vm0, %v48_v20  ;;  %6949 = vst [vmem:[#allocation38_spill] sm:$0xff] %v4435_v15  ;;  %v4477_v42 = vor.u32 %v3853_v38, %v3646_v35  ;;  %v3849_v47 = vld [vmem:[%s6618_s3 + $0x38c] sm:$0xf]  ;;  %v4491_v52 = vld [vmem:[%s6619_s2] sm:$0xf]  ;;  %v4496_v57 = vor.u32 %v3785_v44, %v3392_v46 }
  0x2c   :  { %6950 = vst [vmem:[#allocation39_spill] sm:$0xff] %v4448_v22  ;;  %1117 = vmatpush.bf16.msra.mxu3 %v4462_v31  ;;  %v3648_v58 = vld [vmem:[%s6618_s3 + $0x3a8] sm:$0xf0]  ;;  %v3358_v62 = vld [vmem:[%s6618_s3 + $0x148] sm:$0xf] }
  0x2d   :  { %1045 = vmatpush.bf16.msra.mxu1 %v4376_v48  ;;  %6952 = vst [vmem:[#allocation41_spill] sm:$0xff] %v4462_v31  ;;  %v4501_v59 = vor.u32 %v3849_v47, %v3648_v58  ;;  %v3781_v63 = vld [vmem:[%s6618_s3 + $0x164] sm:$0xf0]  ;;  %v3777_v11 = vld [vmem:[%s6618_s3 + $0x14c] sm:$0xf] }
  0x2e   :  { %6953 = vst [vmem:[#allocation42_spill] sm:$0xff] %v4475_v39  ;;  %v3614_v2 = vld [vmem:[%s6618_s3 + $0x348] sm:$0xf]  ;;  %1079 = vmatpush.bf16.msra.mxu0 %v4475_v39  ;;  %v4515_v6 = vor.u32 %v3781_v63, %v3358_v62  ;;  %v3360_v18 = vld [vmem:[%s6618_s3 + $0x168] sm:$0xf0] }
  0x2f   :  { %6954 = vst [vmem:[#allocation43_spill] sm:$0xff] %v4477_v42  ;;  %v3845_v9 = vld [vmem:[%s6618_s3 + $0x364] sm:$0xf0]  ;;  %v4539_v24 = vor.u32 %v3777_v11, %v3360_v18  ;;  %v3616_v28 = vld [vmem:[%s6618_s3 + $0x368] sm:$0xf0] }
  0x30   :  { %6956 = vst [vmem:[#allocation45_spill] sm:$0xff] %v4496_v57  ;;  %v4525_v14 = vor.u32 %v3845_v9, %v3614_v2  ;;  %1118 = vmatpush.bf16.msra.mxu3 %v4501_v59  ;;  %v3326_v34 = vld [vmem:[%s6618_s3 + $0x108] sm:$0xf]  ;;  %v3769_v47 = vld [vmem:[%s6618_s3 + $0x10c] sm:$0xf] }
  0x31   :  { %1046 = vmatpush.bf16.msra.mxu1 %v4412_v3  ;;  %6957 = vst [vmem:[#allocation46_spill] sm:$0xff] %v4501_v59  ;;  %v3773_v35 = vld [vmem:[%s6618_s3 + $0x124] sm:$0xf0]  ;;  %v3328_v58 = vld [vmem:[%s6618_s3 + $0x128] sm:$0xf0] }
  0x32   :  { %6958 = vst [vmem:[#allocation47_spill] sm:$0xff] %v4515_v6  ;;  %v3582_v38 = vld [vmem:[%s6618_s3 + $0x308] sm:$0xf]  ;;  %1080 = vmatpush.bf16.msra.mxu0 %v4515_v6  ;;  %v4558_v46 = vor.u32 %v3773_v35, %v3326_v34  ;;  %v4574_v2 = vor.u32 %v3769_v47, %v3328_v58  ;;  %v3833_v9 = vld [vmem:[%s6618_s3 + $0x30c] sm:$0xf]  ;;  %v4597_v35 = vperm.slane %v4491_v52, 2 }
  0x33   :  { %37 = vst [vmem:[#allocation5] sm:$0xff] %v4035_v13  ;;  %v3584_v11 = vld [vmem:[%s6618_s3 + $0x328] sm:$0xf0]  ;;  %v3550_v34 = vld [vmem:[%s6618_s3 + $0x2c8] sm:$0xf] }
  0x34   :  { %6959 = vst [vmem:[#allocation48_spill] sm:$0xff] %v4525_v14  ;;  %v4585_v18 = vor.u32 %v3833_v9, %v3584_v11  ;;  %v3296_v58 = vld [vmem:[%s6618_s3 + $0xe8] sm:$0xf0]  ;;  %v3696_v6 = vld [vmem:[%s6618_s3 + $0x3f8] sm:$0xf0] }
  0x35   :  { %1091 = vmatpush.bf16.msrb.mxu1 %v4448_v22  ;;  %6961 = vst [vmem:[#allocation50_spill] sm:$0xff] %v4539_v24  ;;  %v3825_v9 = vld [vmem:[%s6618_s3 + $0x2cc] sm:$0xf] }
  0x36   :  { %6963 = vst [vmem:[#allocation52_spill] sm:$0xff] %v4558_v46  ;;  %1081 = vmatpush.bf16.msra.mxu0 %v4558_v46  ;;  %v3552_v11 = vld [vmem:[%s6618_s3 + $0x2e8] sm:$0xf0]  ;;  %v3806_v46 = vld [vmem:[%s6618_s3 + $0x22c] sm:$0xf0] }
  0x37   :  { %3178 = vmatmul.msk.bf16.gmra.mxu1 %vm84_vm0, %v48_v20  ;;  %v3424_v20 = vld [vmem:[%s6618_s3 + $0x1e8] sm:$0xf0]  ;;  %6965 = vst [vmem:[#allocation54_spill] sm:$0xff] %v4574_v2 }
  0x38   :  { %v4450_v23 = vor.u32 %v3793_v19, %v3424_v20  ;;  %v3841_v19 = vld [vmem:[%s6618_s3 + $0x34c] sm:$0xf]  ;;  %v4534_v20 = vperm.slane %v4491_v52, 0  ;;  %3183 = vmatmul.msk.bf16.gmra.mxu2 %vm84_vm0, %v4094_v7  ;;  %6967 = vst [vmem:[#allocation56_spill] sm:$0xff] %v4585_v18 }
  0x39   :  { %1092 = vmatpush.bf16.msrb.mxu1 %v4477_v42  ;;  %v4546_v30 = vor.u32 %v3841_v19, %v3616_v28  ;;  %v3294_v19 = vld [vmem:[%s6618_s3 + $0xc8] sm:$0xf]  ;;  %6968 = vst [vmem:[#allocation57_spill] sm:$0xff] %v4597_v35 }
  0x3a   :  { %6951 = vst [vmem:[#allocation40_spill] sm:$0xff] %v4450_v23  ;;  %1104 = vmatpush.bf16.msra.mxu2 %v4450_v23  ;;  %v3765_v28 = vld [vmem:[%s6618_s3 + $0xe4] sm:$0xf0] }
  0x3b   :  { %6960 = vst [vmem:[#allocation49_spill] sm:$0xff] %v4534_v20  ;;  %3187 = vmatmul.msk.bf16.gmra.mxu3 %vm84_vm0, %v4094_v7 }
  0x3c   :  { %6962 = vst [vmem:[#allocation51_spill] sm:$0xff] %v4546_v30  ;;  %1119 = vmatpush.bf16.msra.mxu3 %v4546_v30 }
  0x3d   :  { %1093 = vmatpush.bf16.msrb.mxu1 %v4525_v14  ;;  %v3859_v14 = vld [vmem:[%s6618_s3 + $0x3dc] sm:$0xf] }
  0x3e   :  { %1105 = vmatpush.bf16.msra.mxu2 %v4496_v57 }
  0x40   :  { %1120 = vmatpush.bf16.msra.mxu3 %v4585_v18  ;;  %v4664_v18 = vperm.slane %v4491_v52, 3 }
  0x42   :  { %1106 = vmatpush.bf16.msra.mxu2 %v4539_v24  ;;  %6977 = vst [vmem:[#allocation66_spill] sm:$0xff] %v4664_v18  ;;  %v3440_v24 = vld [vmem:[%s6618_s3 + $0x1f8] sm:$0xf0] }
  0x46   :  { %1107 = vmatpush.bf16.msra.mxu2 %v4574_v2 }
  0x47   :  { %3179 = vmatmul.msk.bf16.gmra.mxu1 %vm84_vm0, %v4094_v7  ;;  %v3837_v7 = vld [vmem:[%s6618_s3 + $0x324] sm:$0xf0] }
  0x48   :  { %v4572_v63 = vor.u32 %v3837_v7, %v3582_v38  ;;  %v4600_v38 = vor.u32 %v3765_v28, %v3294_v19  ;;  %v3761_v7 = vld [vmem:[%s6618_s3 + $0xcc] sm:$0xf]  ;;  %v4627_v28 = vor.u32 %v3825_v9, %v3552_v11 }
  0x49   :  { %v4625_v19 = vor.u32 %v3761_v7, %v3296_v58  ;;  %v3821_v58 = vld [vmem:[%s6618_s3 + $0x2a4] sm:$0xf0]  ;;  %v3753_v9 = vld [vmem:[%s6618_s3 + $0x8c] sm:$0xf] }
  0x4a   :  { %6964 = vst [vmem:[#allocation53_spill] sm:$0xff] %v4572_v63  ;;  %1094 = vmatpush.bf16.msrb.mxu1 %v4572_v63  ;;  %1082 = vmatpush.bf16.msra.mxu0 %v4600_v38  ;;  %v3264_v11 = vld [vmem:[%s6618_s3 + $0xa8] sm:$0xf0] }
  0x4b   :  { %6969 = vst [vmem:[#allocation58_spill] sm:$0xff] %v4600_v38  ;;  %1108 = vmatpush.bf16.msra.mxu2 %v4625_v19  ;;  %1121 = vmatpush.bf16.msra.mxu3 %v4627_v28 }
  0x4c   :  { %6972 = vst [vmem:[#allocation61_spill] sm:$0xff] %v4625_v19 }
  0x4d   :  { %6973 = vst [vmem:[#allocation62_spill] sm:$0xff] %v4627_v28 }
  0x84   :  { %v4493_v53 = vpop.f32.mrf.mxu1  ;;  %v106_v44 = vpop.f32.mrf.mxu0 }
  0x85   :  { %6955 = vst [vmem:[#allocation44_spill] sm:$0xff] %v4493_v53  ;;  %v107_v62 = vadd.f32 %v106_v44, %v4534_v20  ;;  %v3829_v44 = vld [vmem:[%s6618_s3 + $0x2e4] sm:$0xf0] }
  0x86   :  { %v4610_v47 = vor.u32 %v3829_v44, %v3550_v34  ;;  %v3262_v44 = vld [vmem:[%s6618_s3 + $0x88] sm:$0xf] }
  0x87   :  { %3875 = vtanh.f32 %v107_v62  ;;  %v4622_v62 = vperm.slane %v4491_v52, 1  ;;  %v3518_v53 = vld [vmem:[%s6618_s3 + $0x288] sm:$0xf] }
  0x88   :  { %6970 = vst [vmem:[#allocation59_spill] sm:$0xff] %v4610_v47  ;;  %1095 = vmatpush.bf16.msrb.mxu1 %v4610_v47  ;;  %v3486_v52 = vld [vmem:[%s6618_s3 + $0x248] sm:$0xf] }
  0x89   :  { %6971 = vst [vmem:[#allocation60_spill] sm:$0xff] %v4622_v62 }
  0x8b   :  { %v164_v34 = vpop.f32.mrf.mxu2 }
  0x8c   :  { %v4582_v13 = vpop.f32.mrf.mxu1  ;;  %v165_v20 = vadd.f32 %v164_v34, %v4597_v35  ;;  %v4653_v34 = vor.u32 %v3821_v58, %v3518_v53  ;;  %v3520_v35 = vld [vmem:[%s6618_s3 + $0x2a8] sm:$0xf0] }
  0x8d   :  { %6966 = vst [vmem:[#allocation55_spill] sm:$0xff] %v4582_v13  ;;  %v3757_v13 = vld [vmem:[%s6618_s3 + $0xa4] sm:$0xf0]  ;;  %v3876_v53 = vpop.eup %3875 }
  0x8e   :  { %v4640_v7 = vor.u32 %v3757_v13, %v3262_v44  ;;  %6975 = vst [vmem:[#allocation64_spill] sm:$0xff] %v4653_v34  ;;  %v4655_v13 = vor.u32 %v3753_v9, %v3264_v11  ;;  %v3817_v44 = vld [vmem:[%s6618_s3 + $0x28c] sm:$0xf]  ;;  %v3230_v9 = vld [vmem:[%s6618_s3 + $0x48] sm:$0xf]  ;;  %3877 = vtanh.f32 %v165_v20  ;;  %v193_v28 = vpop.f32.mrf.mxu3  ;;  %1096 = vmatpush.bf16.msrb.mxu1 %v4653_v34  ;;  %v362_v19 = vmul.f32 0.5, %v3876_v53 }
  0x8f   :  { %v4667_v47 = vor.u32 %v3817_v44, %v3520_v35  ;;  %v3749_v11 = vld [vmem:[%s6618_s3 + $0x64] sm:$0xf0]  ;;  %v3745_v44 = vld [vmem:[%s6618_s3 + $0x4c] sm:$0xf] }
  0x90   :  { %6974 = vst [vmem:[#allocation63_spill] sm:$0xff] %v4640_v7  ;;  %1083 = vmatpush.bf16.msra.mxu0 %v4640_v7  ;;  %v4680_v35 = vor.u32 %v3749_v11, %v3230_v9  ;;  %1109 = vmatpush.bf16.msra.mxu2 %v4655_v13  ;;  %v3809_v11 = vld [vmem:[%s6618_s3 + $0x24c] sm:$0xf] }
  0x91   :  { %6976 = vst [vmem:[#allocation65_spill] sm:$0xff] %v4655_v13  ;;  %v3488_v7 = vld [vmem:[%s6618_s3 + $0x268] sm:$0xf0]  ;;  %1122 = vmatpush.bf16.msra.mxu3 %v4667_v47 }
  0x92   :  { %6978 = vst [vmem:[#allocation67_spill] sm:$0xff] %v4667_v47  ;;  %v4705_v34 = vor.u32 %v3809_v11, %v3488_v7  ;;  %v3737_v7 = vld [vmem:[%s6618_s3 + $0xc] sm:$0xf] }
  0x93   :  { %6979 = vst [vmem:[#allocation68_spill] sm:$0xff] %v4680_v35  ;;  %v3801_v11 = vld [vmem:[%s6618_s3 + $0x20c] sm:$0xf] }
  0x94   :  { %v135_v38 = vpop.f32.mrf.mxu1  ;;  %6982 = vst [vmem:[#allocation71_spill] sm:$0xff] %v4705_v34  ;;  %1084 = vmatpush.bf16.msra.mxu0 %v4680_v35  ;;  %v363_v35 = vadd.f32 0.5, %v362_v19 }
  0x95   :  { %v136_v58 = vadd.f32 %v135_v38, %v4622_v62  ;;  %v3813_v38 = vld [vmem:[%s6618_s3 + $0x264] sm:$0xf0]  ;;  %v3232_v62 = vld [vmem:[%s6618_s3 + $0x68] sm:$0xf0]  ;;  %1123 = vmatpush.bf16.msra.mxu3 %v4705_v34 }
  0x96   :  { %v4693_v20 = vor.u32 %v3813_v38, %v3486_v52  ;;  %v4695_v9 = vor.u32 %v3745_v44, %v3232_v62  ;;  %v3198_v62 = vld [vmem:[%s6618_s3 + $0x8] sm:$0xf]  ;;  %v3200_v44 = vld [vmem:[%s6618_s3 + $0x28] sm:$0xf0] }
  0x97   :  { %3879 = vtanh.f32 %v136_v58  ;;  %v194_v58 = vadd.f32 %v193_v28, %v4664_v18  ;;  %v3741_v52 = vld [vmem:[%s6618_s3 + $0x24] sm:$0xf0]  ;;  %v4735_v47 = vor.u32 %v3737_v7, %v3200_v44 }
  0x98   :  { %6980 = vst [vmem:[#allocation69_spill] sm:$0xff] %v4693_v20  ;;  %v3454_v38 = vld [vmem:[%s6618_s3 + $0x208] sm:$0xf]  ;;  %v4723_v53 = vor.u32 %v3741_v52, %v3198_v62  ;;  %1097 = vmatpush.bf16.msrb.mxu1 %v4693_v20  ;;  %1110 = vmatpush.bf16.msra.mxu2 %v4695_v9  ;;  %v3456_v62 = vld [vmem:[%s6618_s3 + $0x228] sm:$0xf0]  ;;  %v3878_v52 = vpop.eup %3877 }
  0x99   :  { %6981 = vst [vmem:[#allocation70_spill] sm:$0xff] %v4695_v9  ;;  %v3805_v28 = vld [vmem:[%s6618_s3 + $0x224] sm:$0xf0]  ;;  %3881 = vtanh.f32 %v194_v58  ;;  %v4741_v13 = vor.u32 %v3801_v11, %v3456_v62 }
  0x9a   :  { %6983 = vst [vmem:[#allocation72_spill] sm:$0xff] %v4723_v53  ;;  %v4733_v18 = vor.u32 %v3805_v28, %v3454_v38  ;;  %1085 = vmatpush.bf16.msra.mxu0 %v4723_v53  ;;  %v372_v28 = vmul.f32 %v3878_v52, %v363_v35  ;;  %v3686_v35 = vld [vmem:[%s6618_s3 + $0x3d0] sm:$0xf] }
  0x9b   :  { %6985 = vst [vmem:[#allocation74_spill] sm:$0xff] %v4735_v47  ;;  %1124 = vmatpush.bf16.msra.mxu3 %v4741_v13 }
  0x9c   :  { %6984 = vst [vmem:[#allocation73_spill] sm:$0xff] %v4733_v18  ;;  %1098 = vmatpush.bf16.msrb.mxu1 %v4733_v18  ;;  %1111 = vmatpush.bf16.msra.mxu2 %v4735_v47  ;;  %v3430_v47 = vld [vmem:[%s6618_s3 + $0x1d0] sm:$0xf] }
  0x9d   :  { %6986 = vst [vmem:[#allocation75_spill] sm:$0xff] %v4741_v13  ;;  %v3880_v2 = vpop.eup %3879  ;;  %v3790_v18 = vld [vmem:[%s6618_s3 + $0x1ac] sm:$0xf0] }
  0x9e   :  { %v365_v63 = vmul.f32 0.5, %v3880_v2 }
  0x9f   :  { %v3882_v7 = vpop.eup %3881 }
  0xa0   :  { %v366_v38 = vadd.f32 0.5, %v365_v63  ;;  %v369_v58 = vmul.f32 0.5, %v3882_v7  ;;  %v3798_v63 = vld [vmem:[%s6618_s3 + $0x1ec] sm:$0xf0] }
  0xa2   :  { %v371_v44 = vmul.f32 0.0, %v366_v38  ;;  %v370_v11 = vadd.f32 0.5, %v369_v58  ;;  %v3862_v38 = vld [vmem:[%s6618_s3 + $0x3ec] sm:$0xf0]  ;;  %v3858_v58 = vld [vmem:[%s6618_s3 + $0x3d4] sm:$0xf] }
  0xa3   :  { %v4780_v13 = vor.u32 %v3862_v38, %v3686_v35  ;;  %v3400_v35 = vld [vmem:[%s6618_s3 + $0x1b0] sm:$0xf0] }
  0xa4   :  { %v4747_v19 = vadd.f32 %v372_v28, %v371_v44  ;;  %v3432_v44 = vld [vmem:[%s6618_s3 + $0x1f0] sm:$0xf0] }
  0xa5   :  { %6989 = vst [vmem:[#allocation78_spill] sm:$0xff] %v4780_v13  ;;  %v3850_v38 = vld [vmem:[%s6618_s3 + $0x394] sm:$0xf] }
  0xa6   :  { %6987 = vst [vmem:[#allocation76_spill] sm:$0xff] %v4747_v19  ;;  %3883 = vtanh.f32 %v4747_v19  ;;  %v4778_v19 = vor.u32 %v3798_v63, %v3430_v47  ;;  %v3854_v47 = vld [vmem:[%s6618_s3 + $0x3ac] sm:$0xf0]  ;;  %v3786_v63 = vld [vmem:[%s6618_s3 + $0x194] sm:$0xf] }
  0xa7   :  { %v4828_v20 = vor.u32 %v3786_v63, %v3400_v35  ;;  %v3842_v63 = vld [vmem:[%s6618_s3 + $0x354] sm:$0xf] }
  0xa8   :  { %6988 = vst [vmem:[#allocation77_spill] sm:$0xff] %v4778_v19  ;;  %v3624_v35 = vld [vmem:[%s6618_s3 + $0x370] sm:$0xf0] }
  0xa9   :  { %6994 = vst [vmem:[#allocation83_spill] sm:$0xff] %v4828_v20 }
  0xac   :  { %v3884_v62 = vpop.eup %3883 }
  0xad   :  { %v375_v2 = vmul.f32 %v3884_v62, %v370_v11  ;;  %v3688_v11 = vld [vmem:[%s6618_s3 + $0x3f0] sm:$0xf0] }
  0xae   :  { %v4790_v9 = vor.u32 %v3858_v58, %v3688_v11  ;;  %v3366_v58 = vld [vmem:[%s6618_s3 + $0x150] sm:$0xf] }
  0xaf   :  { %v376_v34 = vpack.c.bf16 %v375_v2, %v375_v2  ;;  %v3782_v11 = vld [vmem:[%s6618_s3 + $0x16c] sm:$0xf0] }
  0xb0   :  { %6991 = vst [vmem:[#allocation80_spill] sm:$0xff] %v4790_v9 }
  0xb1   :  { %377 = vst [vmem:[#allocation5] sm:$0xf] %v376_v34  ;;  %v3794_v34 = vld [vmem:[%s6618_s3 + $0x1d4] sm:$0xf] }
  0xb2   :  { %v4788_v53 = vor.u32 %v3794_v34, %v3432_v44  ;;  %v3656_v34 = vld [vmem:[%s6618_s3 + $0x3b0] sm:$0xf0] }
  0xb4   :  { %6990 = vst [vmem:[#allocation79_spill] sm:$0xff] %v4788_v53 }
  0xb8   :  { %v378_v52 = vld [vmem:[#allocation5] sm:$0xff] }
  0xb9   :  { %v380_v28 = vunpack.c.l.b16 %v378_v52  ;;  %v381_v7 = vunpack.c.h.b16 %v378_v52  ;;  %v3398_v52 = vld [vmem:[%s6618_s3 + $0x190] sm:$0xf] }
  0xbb   :  { %v4774_v62 = vpack.c.b16 %v380_v28, %v380_v28  ;;  %v4776_v2 = vpack.c.b16 %v381_v7, %v381_v7  ;;  %v3654_v28 = vld [vmem:[%s6618_s3 + $0x390] sm:$0xf]  ;;  %v4816_v7 = vor.u32 %v3790_v18, %v3398_v52 }
  0xbc   :  { %v4818_v44 = vor.u32 %v3854_v47, %v3654_v28  ;;  %v3622_v18 = vld [vmem:[%s6618_s3 + $0x350] sm:$0xf]  ;;  %v3778_v28 = vld [vmem:[%s6618_s3 + $0x154] sm:$0xf] }
  0xbd   :  { %1034 = vmatmul.bf16.vlgmr.msrb.gmra.mxu0 %v4774_v62  ;;  %1047 = vmatmul.bf16.vlgmr.msra.gmra.mxu1 %v4776_v2  ;;  %6992 = vst [vmem:[#allocation81_spill] sm:$0xff] %v4816_v7  ;;  %v3846_v52 = vld [vmem:[%s6618_s3 + $0x36c] sm:$0xf0]  ;;  %v3368_v47 = vld [vmem:[%s6618_s3 + $0x170] sm:$0xf0] }
  0xbe   :  { %1060 = vmatmul.bf16.vlgmr.msrb.gmra.mxu2 %v4774_v62  ;;  %1073 = vmatmul.bf16.vlgmr.msrb.gmra.mxu3 %v4776_v2  ;;  %6993 = vst [vmem:[#allocation82_spill] sm:$0xff] %v4818_v44 }
  0xbf   :  { %1130 = vmatpush.bf16.msrb.mxu0 %v4778_v19  ;;  %1143 = vmatpush.bf16.msra.mxu1 %v4780_v13  ;;  %v4830_v19 = vor.u32 %v3850_v38, %v3656_v34  ;;  %v4852_v38 = vor.u32 %v3782_v11, %v3366_v58  ;;  %v4854_v34 = vor.u32 %v3846_v52, %v3622_v18  ;;  %v3590_v58 = vld [vmem:[%s6618_s3 + $0x310] sm:$0xf]  ;;  %v3770_v18 = vld [vmem:[%s6618_s3 + $0x114] sm:$0xf] }
  0xc0   :  { %1156 = vmatpush.bf16.msrb.mxu2 %v4788_v53  ;;  %1169 = vmatpush.bf16.msrb.mxu3 %v4790_v9  ;;  %v3334_v9 = vld [vmem:[%s6618_s3 + $0x110] sm:$0xf]  ;;  %v4864_v13 = vor.u32 %v3778_v28, %v3368_v47  ;;  %v3336_v52 = vld [vmem:[%s6618_s3 + $0x130] sm:$0xf0] }
  0xc1   :  { %6995 = vst [vmem:[#allocation84_spill] sm:$0xff] %v4830_v19  ;;  %v3774_v53 = vld [vmem:[%s6618_s3 + $0x12c] sm:$0xf0]  ;;  %v3834_v28 = vld [vmem:[%s6618_s3 + $0x314] sm:$0xf] }
  0xc2   :  { %6996 = vst [vmem:[#allocation85_spill] sm:$0xff] %v4852_v38  ;;  %v3838_v11 = vld [vmem:[%s6618_s3 + $0x32c] sm:$0xf0]  ;;  %v3592_v47 = vld [vmem:[%s6618_s3 + $0x330] sm:$0xf0] }
  0xc3   :  { %1131 = vmatpush.bf16.msrb.mxu0 %v4816_v7  ;;  %1144 = vmatpush.bf16.msra.mxu1 %v4818_v44  ;;  %6997 = vst [vmem:[#allocation86_spill] sm:$0xff] %v4854_v34  ;;  %v4866_v7 = vor.u32 %v3842_v63, %v3624_v35  ;;  %v4888_v63 = vor.u32 %v3774_v53, %v3334_v9  ;;  %v3558_v9 = vld [vmem:[%s6618_s3 + $0x2d0] sm:$0xf] }
  0xc4   :  { %1157 = vmatpush.bf16.msrb.mxu2 %v4828_v20  ;;  %1170 = vmatpush.bf16.msrb.mxu3 %v4830_v19  ;;  %6998 = vst [vmem:[#allocation87_spill] sm:$0xff] %v4864_v13  ;;  %v4890_v35 = vor.u32 %v3838_v11, %v3590_v58  ;;  %v3302_v19 = vld [vmem:[%s6618_s3 + $0xd0] sm:$0xf]  ;;  %v4900_v44 = vor.u32 %v3770_v18, %v3336_v52  ;;  %v3762_v58 = vld [vmem:[%s6618_s3 + $0xd4] sm:$0xf] }
  0xc5   :  { %6999 = vst [vmem:[#allocation88_spill] sm:$0xff] %v4866_v7  ;;  %v3766_v20 = vld [vmem:[%s6618_s3 + $0xec] sm:$0xf0]  ;;  %v3304_v11 = vld [vmem:[%s6618_s3 + $0xf0] sm:$0xf0] }
  0xc6   :  { %7000 = vst [vmem:[#allocation89_spill] sm:$0xff] %v4888_v63  ;;  %v3830_v53 = vld [vmem:[%s6618_s3 + $0x2ec] sm:$0xf0]  ;;  %v3826_v18 = vld [vmem:[%s6618_s3 + $0x2d4] sm:$0xf] }
  0xc7   :  { %1132 = vmatpush.bf16.msrb.mxu0 %v4852_v38  ;;  %1145 = vmatpush.bf16.msra.mxu1 %v4854_v34  ;;  %7001 = vst [vmem:[#allocation90_spill] sm:$0xff] %v4890_v35  ;;  %v4902_v38 = vor.u32 %v3834_v28, %v3592_v47  ;;  %v3560_v52 = vld [vmem:[%s6618_s3 + $0x2f0] sm:$0xf0]  ;;  %v4924_v28 = vor.u32 %v3766_v20, %v3302_v19  ;;  %v3526_v20 = vld [vmem:[%s6618_s3 + $0x290] sm:$0xf] }
  0xc8   :  { %1158 = vmatpush.bf16.msrb.mxu2 %v4864_v13  ;;  %1171 = vmatpush.bf16.msrb.mxu3 %v4866_v7  ;;  %7002 = vst [vmem:[#allocation91_spill] sm:$0xff] %v4900_v44  ;;  %v4926_v47 = vor.u32 %v3830_v53, %v3558_v9  ;;  %v3270_v7 = vld [vmem:[%s6618_s3 + $0x90] sm:$0xf]  ;;  %v4936_v34 = vor.u32 %v3762_v58, %v3304_v11  ;;  %v3754_v9 = vld [vmem:[%s6618_s3 + $0x94] sm:$0xf] }
  0xc9   :  { %7003 = vst [vmem:[#allocation92_spill] sm:$0xff] %v4902_v38  ;;  %v3758_v13 = vld [vmem:[%s6618_s3 + $0xac] sm:$0xf0]  ;;  %v3272_v53 = vld [vmem:[%s6618_s3 + $0xb0] sm:$0xf0] }
  0xca   :  { %7004 = vst [vmem:[#allocation93_spill] sm:$0xff] %v4924_v28  ;;  %v3822_v19 = vld [vmem:[%s6618_s3 + $0x2ac] sm:$0xf0]  ;;  %v3818_v58 = vld [vmem:[%s6618_s3 + $0x294] sm:$0xf] }
  0xcb   :  { %1133 = vmatpush.bf16.msrb.mxu0 %v4888_v63  ;;  %1146 = vmatpush.bf16.msra.mxu1 %v4890_v35  ;;  %7005 = vst [vmem:[#allocation94_spill] sm:$0xff] %v4926_v47  ;;  %v4938_v63 = vor.u32 %v3826_v18, %v3560_v52  ;;  %v3528_v11 = vld [vmem:[%s6618_s3 + $0x2b0] sm:$0xf0]  ;;  %v4964_v18 = vor.u32 %v3758_v13, %v3270_v7  ;;  %v3494_v13 = vld [vmem:[%s6618_s3 + $0x250] sm:$0xf] }
  0xcc   :  { %1159 = vmatpush.bf16.msrb.mxu2 %v4900_v44  ;;  %1172 = vmatpush.bf16.msrb.mxu3 %v4902_v38  ;;  %7006 = vst [vmem:[#allocation95_spill] sm:$0xff] %v4936_v34  ;;  %v4966_v52 = vor.u32 %v3822_v19, %v3526_v20  ;;  %v3238_v38 = vld [vmem:[%s6618_s3 + $0x50] sm:$0xf]  ;;  %v4976_v35 = vor.u32 %v3754_v9, %v3272_v53  ;;  %v3746_v20 = vld [vmem:[%s6618_s3 + $0x54] sm:$0xf] }
  0xcd   :  { %7007 = vst [vmem:[#allocation96_spill] sm:$0xff] %v4938_v63  ;;  %1086 = vmatmul.bf16.vlgmr.msra.gmra.mxu0 %v4774_v62  ;;  %1099 = vmatmul.bf16.vlgmr.msrb.gmra.mxu1 %v4776_v2  ;;  %v3750_v44 = vld [vmem:[%s6618_s3 + $0x6c] sm:$0xf0]  ;;  %v3240_v19 = vld [vmem:[%s6618_s3 + $0x70] sm:$0xf0] }
  0xce   :  { %1112 = vmatmul.bf16.vlgmr.msra.gmra.mxu2 %v4774_v62  ;;  %1125 = vmatmul.bf16.vlgmr.msra.gmra.mxu3 %v4776_v2  ;;  %7008 = vst [vmem:[#allocation97_spill] sm:$0xff] %v4964_v18  ;;  %v3814_v7 = vld [vmem:[%s6618_s3 + $0x26c] sm:$0xf0]  ;;  %v3810_v9 = vld [vmem:[%s6618_s3 + $0x254] sm:$0xf] }
  0xcf   :  { %1134 = vmatpush.bf16.msrb.mxu0 %v4924_v28  ;;  %1147 = vmatpush.bf16.msra.mxu1 %v4926_v47  ;;  %7009 = vst [vmem:[#allocation98_spill] sm:$0xff] %v4966_v52  ;;  %v4978_v28 = vor.u32 %v3818_v58, %v3528_v11  ;;  %v3496_v53 = vld [vmem:[%s6618_s3 + $0x270] sm:$0xf0]  ;;  %v3206_v58 = vld [vmem:[%s6618_s3 + $0x10] sm:$0xf]  ;;  %v5003_v11 = vor.u32 %v3750_v44, %v3238_v38 }
  0xd0   :  { %1160 = vmatpush.bf16.msrb.mxu2 %v4936_v34  ;;  %1173 = vmatpush.bf16.msrb.mxu3 %v4938_v63  ;;  %7010 = vst [vmem:[#allocation99_spill] sm:$0xff] %v4976_v35  ;;  %v5005_v63 = vor.u32 %v3814_v7, %v3494_v13  ;;  %v3742_v34 = vld [vmem:[%s6618_s3 + $0x2c] sm:$0xf0]  ;;  %v5018_v44 = vor.u32 %v3746_v20, %v3240_v19  ;;  %v3738_v13 = vld [vmem:[%s6618_s3 + $0x14] sm:$0xf] }
  0xd1   :  { %7011 = vst [vmem:[#allocation100_spill] sm:$0xff] %v4978_v28  ;;  %v3462_v47 = vld [vmem:[%s6618_s3 + $0x210] sm:$0xf]  ;;  %v5020_v38 = vor.u32 %v3810_v9, %v3496_v53  ;;  %v3208_v7 = vld [vmem:[%s6618_s3 + $0x30] sm:$0xf0] }
  0xd2   :  { %7012 = vst [vmem:[#allocation101_spill] sm:$0xff] %v5003_v11  ;;  %v3438_v20 = vld [vmem:[%s6618_s3 + $0x1d8] sm:$0xf]  ;;  %v5053_v30 = vor.u32 %v3806_v46, %v3462_v47 }
  0xd3   :  { %1135 = vmatpush.bf16.msrb.mxu0 %v4964_v18  ;;  %1148 = vmatpush.bf16.msra.mxu1 %v4966_v52  ;;  %7013 = vst [vmem:[#allocation102_spill] sm:$0xff] %v5005_v63  ;;  %v3802_v52 = vld [vmem:[%s6618_s3 + $0x214] sm:$0xf]  ;;  %v3799_v19 = vld [vmem:[%s6618_s3 + $0x1f4] sm:$0xf0]  ;;  %v5051_v18 = vor.u32 %v3742_v34, %v3206_v58  ;;  %v5066_v34 = vor.u32 %v3738_v13, %v3208_v7 }
  0xd4   :  { %1161 = vmatpush.bf16.msrb.mxu2 %v4976_v35  ;;  %1174 = vmatpush.bf16.msrb.mxu3 %v4978_v28  ;;  %7014 = vst [vmem:[#allocation103_spill] sm:$0xff] %v5018_v44  ;;  %v3464_v28 = vld [vmem:[%s6618_s3 + $0x230] sm:$0xf0]  ;;  %v3694_v9 = vld [vmem:[%s6618_s3 + $0x3d8] sm:$0xf]  ;;  %v5070_v47 = vor.u32 %v3799_v19, %v3438_v20 }
  0xd5   :  { %7015 = vst [vmem:[#allocation104_spill] sm:$0xff] %v5020_v38  ;;  %v3863_v53 = vld [vmem:[%s6618_s3 + $0x3f4] sm:$0xf0]  ;;  %v3795_v35 = vld [vmem:[%s6618_s3 + $0x1dc] sm:$0xf]  ;;  %v5068_v46 = vor.u32 %v3802_v52, %v3464_v28 }
  0xd6   :  { %7016 = vst [vmem:[#allocation105_spill] sm:$0xff] %v5051_v18  ;;  %v5072_v58 = vor.u32 %v3863_v53, %v3694_v9  ;;  %v5080_v59 = vor.u32 %v3795_v35, %v3440_v24  ;;  %v3662_v28 = vld [vmem:[%s6618_s3 + $0x398] sm:$0xf]  ;;  %v3787_v13 = vld [vmem:[%s6618_s3 + $0x19c] sm:$0xf] }
  0xd7   :  { %1136 = vmatpush.bf16.msrb.mxu0 %v5003_v11  ;;  %1149 = vmatpush.bf16.msra.mxu1 %v5005_v63  ;;  %7017 = vst [vmem:[#allocation106_spill] sm:$0xff] %v5053_v30  ;;  %v3406_v63 = vld [vmem:[%s6618_s3 + $0x198] sm:$0xf]  ;;  %v3664_v24 = vld [vmem:[%s6618_s3 + $0x3b8] sm:$0xf0] }
  0xd8   :  { %1162 = vmatpush.bf16.msrb.mxu2 %v5018_v44  ;;  %1175 = vmatpush.bf16.msrb.mxu3 %v5020_v38  ;;  %7018 = vst [vmem:[#allocation107_spill] sm:$0xff] %v5066_v34  ;;  %v3791_v11 = vld [vmem:[%s6618_s3 + $0x1b4] sm:$0xf0]  ;;  %v5082_v44 = vor.u32 %v3859_v14, %v3696_v6  ;;  %v3408_v6 = vld [vmem:[%s6618_s3 + $0x1b8] sm:$0xf0] }
  0xd9   :  { %7019 = vst [vmem:[#allocation108_spill] sm:$0xff] %v5068_v46  ;;  %v3855_v52 = vld [vmem:[%s6618_s3 + $0x3b4] sm:$0xf0]  ;;  %v3851_v14 = vld [vmem:[%s6618_s3 + $0x39c] sm:$0xf]  ;;  %v5108_v35 = vor.u32 %v3791_v11, %v3406_v63  ;;  %v5120_v9 = vor.u32 %v3787_v13, %v3408_v6 }
  0xda   :  { %7020 = vst [vmem:[#allocation109_spill] sm:$0xff] %v5070_v47  ;;  %v5110_v7 = vor.u32 %v3855_v52, %v3662_v28  ;;  %v3374_v20 = vld [vmem:[%s6618_s3 + $0x158] sm:$0xf]  ;;  %v5122_v53 = vor.u32 %v3851_v14, %v3664_v24  ;;  %v3779_v28 = vld [vmem:[%s6618_s3 + $0x15c] sm:$0xf] }
  0xdb   :  { %7021 = vst [vmem:[#allocation110_spill] sm:$0xff] %v5072_v58  ;;  %1137 = vmatpush.bf16.msrb.mxu0 %v5051_v18  ;;  %1150 = vmatpush.bf16.msra.mxu1 %v5053_v30  ;;  %v3783_v19 = vld [vmem:[%s6618_s3 + $0x174] sm:$0xf0]  ;;  %v3376_v52 = vld [vmem:[%s6618_s3 + $0x178] sm:$0xf0] }
  0xdc   :  { %7022 = vst [vmem:[#allocation111_spill] sm:$0xff] %v5080_v59  ;;  %1163 = vmatpush.bf16.msrb.mxu2 %v5066_v34  ;;  %1176 = vmatpush.bf16.msrb.mxu3 %v5068_v46  ;;  %v3630_v63 = vld [vmem:[%s6618_s3 + $0x358] sm:$0xf]  ;;  %v3843_v13 = vld [vmem:[%s6618_s3 + $0x35c] sm:$0xf]  ;;  %v5148_v14 = vor.u32 %v3783_v19, %v3374_v20 }
  0xdd   :  { %7023 = vst [vmem:[#allocation112_spill] sm:$0xff] %v5082_v44  ;;  %v3847_v11 = vld [vmem:[%s6618_s3 + $0x374] sm:$0xf0]  ;;  %v3632_v6 = vld [vmem:[%s6618_s3 + $0x378] sm:$0xf0] }
  0xde   :  { %7024 = vst [vmem:[#allocation113_spill] sm:$0xff] %v5108_v35  ;;  %1138 = vmatmul.bf16.vlgmr.msrb.gmra.mxu0 %v4774_v62  ;;  %1151 = vmatmul.bf16.vlgmr.msra.gmra.mxu1 %v4776_v2  ;;  %v5150_v24 = vor.u32 %v3847_v11, %v3630_v63  ;;  %v3598_v20 = vld [vmem:[%s6618_s3 + $0x318] sm:$0xf]  ;;  %v3771_v63 = vld [vmem:[%s6618_s3 + $0x11c] sm:$0xf] }
  0xdf   :  { %1182 = vmatpush.bf16.msra.mxu0 %v5070_v47  ;;  %1195 = vmatpush.bf16.msrb.mxu1 %v5072_v58  ;;  %7025 = vst [vmem:[#allocation114_spill] sm:$0xff] %v5110_v7  ;;  %v5160_v58 = vor.u32 %v3779_v28, %v3376_v52  ;;  %v3839_v19 = vld [vmem:[%s6618_s3 + $0x334] sm:$0xf0]  ;;  %v3344_v11 = vld [vmem:[%s6618_s3 + $0x138] sm:$0xf0] }
  0xe0   :  { %1208 = vmatpush.bf16.msra.mxu2 %v5080_v59  ;;  %1221 = vmatpush.bf16.msra.mxu3 %v5082_v44  ;;  %7026 = vst [vmem:[#allocation115_spill] sm:$0xff] %v5120_v9  ;;  %v3342_v44 = vld [vmem:[%s6618_s3 + $0x118] sm:$0xf]  ;;  %v3835_v28 = vld [vmem:[%s6618_s3 + $0x31c] sm:$0xf] }
  0xe1   :  { %7027 = vst [vmem:[#allocation116_spill] sm:$0xff] %v5122_v53  ;;  %1164 = vmatmul.bf16.vlgmr.msrb.gmra.mxu2 %v4774_v62  ;;  %1177 = vmatmul.bf16.vlgmr.msrb.gmra.mxu3 %v4776_v2  ;;  %v3775_v59 = vld [vmem:[%s6618_s3 + $0x134] sm:$0xf0]  ;;  %v3600_v52 = vld [vmem:[%s6618_s3 + $0x338] sm:$0xf0] }
  0xe2   :  { %7028 = vst [vmem:[#allocation117_spill] sm:$0xff] %v5148_v14 }
  0xe3   :  { %1183 = vmatpush.bf16.msra.mxu0 %v5108_v35  ;;  %1196 = vmatpush.bf16.msrb.mxu1 %v5110_v7  ;;  %7029 = vst [vmem:[#allocation118_spill] sm:$0xff] %v5150_v24  ;;  %v5162_v35 = vor.u32 %v3843_v13, %v3632_v6  ;;  %v5184_v13 = vor.u32 %v3775_v59, %v3342_v44  ;;  %v3566_v59 = vld [vmem:[%s6618_s3 + $0x2d8] sm:$0xf] }
  0xe4   :  { %1209 = vmatpush.bf16.msra.mxu2 %v5120_v9  ;;  %1222 = vmatpush.bf16.msra.mxu3 %v5122_v53  ;;  %7030 = vst [vmem:[#allocation119_spill] sm:$0xff] %v5160_v58  ;;  %v5186_v6 = vor.u32 %v3839_v19, %v3598_v20  ;;  %v3310_v53 = vld [vmem:[%s6618_s3 + $0xd8] sm:$0xf]  ;;  %v5196_v7 = vor.u32 %v3771_v63, %v3344_v11  ;;  %v3763_v20 = vld [vmem:[%s6618_s3 + $0xdc] sm:$0xf] }
  0xe5   :  { %7031 = vst [vmem:[#allocation120_spill] sm:$0xff] %v5162_v35  ;;  %v3767_v9 = vld [vmem:[%s6618_s3 + $0xf4] sm:$0xf0]  ;;  %v3312_v19 = vld [vmem:[%s6618_s3 + $0xf8] sm:$0xf0] }
  0xe6   :  { %7032 = vst [vmem:[#allocation121_spill] sm:$0xff] %v5184_v13  ;;  %v3831_v44 = vld [vmem:[%s6618_s3 + $0x2f4] sm:$0xf0]  ;;  %v3827_v63 = vld [vmem:[%s6618_s3 + $0x2dc] sm:$0xf] }
  0xe7   :  { %1184 = vmatpush.bf16.msra.mxu0 %v5148_v14  ;;  %1197 = vmatpush.bf16.msrb.mxu1 %v5150_v24  ;;  %7033 = vst [vmem:[#allocation122_spill] sm:$0xff] %v5186_v6  ;;  %v5198_v14 = vor.u32 %v3835_v28, %v3600_v52  ;;  %v3568_v11 = vld [vmem:[%s6618_s3 + $0x2f8] sm:$0xf0]  ;;  %v5220_v28 = vor.u32 %v3767_v9, %v3310_v53  ;;  %v3534_v9 = vld [vmem:[%s6618_s3 + $0x298] sm:$0xf] }
  0xe8   :  { %1210 = vmatpush.bf16.msra.mxu2 %v5160_v58  ;;  %1223 = vmatpush.bf16.msra.mxu3 %v5162_v35  ;;  %7034 = vst [vmem:[#allocation123_spill] sm:$0xff] %v5196_v7  ;;  %v5222_v52 = vor.u32 %v3831_v44, %v3566_v59  ;;  %v3278_v35 = vld [vmem:[%s6618_s3 + $0x98] sm:$0xf]  ;;  %v5232_v24 = vor.u32 %v3763_v20, %v3312_v19  ;;  %v3755_v59 = vld [vmem:[%s6618_s3 + $0x9c] sm:$0xf] }
  0xe9   :  { %7035 = vst [vmem:[#allocation124_spill] sm:$0xff] %v5198_v14  ;;  %v3759_v58 = vld [vmem:[%s6618_s3 + $0xb4] sm:$0xf0]  ;;  %v3280_v44 = vld [vmem:[%s6618_s3 + $0xb8] sm:$0xf0] }
  0xea   :  { %7036 = vst [vmem:[#allocation125_spill] sm:$0xff] %v5220_v28  ;;  %v3823_v53 = vld [vmem:[%s6618_s3 + $0x2b4] sm:$0xf0]  ;;  %v3819_v20 = vld [vmem:[%s6618_s3 + $0x29c] sm:$0xf] }
  0xeb   :  { %1185 = vmatpush.bf16.msra.mxu0 %v5184_v13  ;;  %1198 = vmatpush.bf16.msrb.mxu1 %v5186_v6  ;;  %7037 = vst [vmem:[#allocation126_spill] sm:$0xff] %v5222_v52  ;;  %v5234_v13 = vor.u32 %v3827_v63, %v3568_v11  ;;  %v3536_v19 = vld [vmem:[%s6618_s3 + $0x2b8] sm:$0xf0]  ;;  %v5256_v63 = vor.u32 %v3759_v58, %v3278_v35  ;;  %v3502_v58 = vld [vmem:[%s6618_s3 + $0x258] sm:$0xf] }
  0xec   :  { %1211 = vmatpush.bf16.msra.mxu2 %v5196_v7  ;;  %1224 = vmatpush.bf16.msra.mxu3 %v5198_v14  ;;  %7038 = vst [vmem:[#allocation127_spill] sm:$0xff] %v5232_v24  ;;  %v5258_v11 = vor.u32 %v3823_v53, %v3534_v9  ;;  %v3246_v14 = vld [vmem:[%s6618_s3 + $0x58] sm:$0xf]  ;;  %v5268_v6 = vor.u32 %v3755_v59, %v3280_v44  ;;  %v3747_v9 = vld [vmem:[%s6618_s3 + $0x5c] sm:$0xf] }
  0xed   :  { %7039 = vst [vmem:[#allocation128_spill] sm:$0xff] %v5234_v13  ;;  %v3751_v7 = vld [vmem:[%s6618_s3 + $0x74] sm:$0xf0]  ;;  %v3248_v53 = vld [vmem:[%s6618_s3 + $0x78] sm:$0xf0] }
  0xee   :  { %7040 = vst [vmem:[#allocation129_spill] sm:$0xff] %v5256_v63  ;;  %v3815_v35 = vld [vmem:[%s6618_s3 + $0x274] sm:$0xf0]  ;;  %v3811_v59 = vld [vmem:[%s6618_s3 + $0x25c] sm:$0xf] }
  0xef   :  { %1186 = vmatpush.bf16.msra.mxu0 %v5220_v28  ;;  %1199 = vmatpush.bf16.msrb.mxu1 %v5222_v52  ;;  %7041 = vst [vmem:[#allocation130_spill] sm:$0xff] %v5258_v11  ;;  %v5270_v28 = vor.u32 %v3819_v20, %v3536_v19  ;;  %v3504_v44 = vld [vmem:[%s6618_s3 + $0x278] sm:$0xf0]  ;;  %v5292_v20 = vor.u32 %v3751_v7, %v3246_v14  ;;  %v3470_v7 = vld [vmem:[%s6618_s3 + $0x218] sm:$0xf] }
  0xf0   :  { %1212 = vmatpush.bf16.msra.mxu2 %v5232_v24  ;;  %1225 = vmatpush.bf16.msra.mxu3 %v5234_v13  ;;  %7042 = vst [vmem:[#allocation131_spill] sm:$0xff] %v5268_v6  ;;  %v5294_v19 = vor.u32 %v3815_v35, %v3502_v58  ;;  %v3214_v13 = vld [vmem:[%s6618_s3 + $0x18] sm:$0xf]  ;;  %v5304_v52 = vor.u32 %v3747_v9, %v3248_v53  ;;  %v3739_v58 = vld [vmem:[%s6618_s3 + $0x1c] sm:$0xf] }
  0xf1   :  { %7043 = vst [vmem:[#allocation132_spill] sm:$0xff] %v5270_v28  ;;  %v3743_v24 = vld [vmem:[%s6618_s3 + $0x34] sm:$0xf0]  ;;  %v3216_v35 = vld [vmem:[%s6618_s3 + $0x38] sm:$0xf0] }
  0xf2   :  { %7044 = vst [vmem:[#allocation133_spill] sm:$0xff] %v5292_v20  ;;  %v3807_v14 = vld [vmem:[%s6618_s3 + $0x234] sm:$0xf0]  ;;  %v3803_v9 = vld [vmem:[%s6618_s3 + $0x21c] sm:$0xf] }
  0xf3   :  { %1187 = vmatpush.bf16.msra.mxu0 %v5256_v63  ;;  %1200 = vmatpush.bf16.msrb.mxu1 %v5258_v11  ;;  %7045 = vst [vmem:[#allocation134_spill] sm:$0xff] %v5294_v19  ;;  %v5306_v63 = vor.u32 %v3811_v59, %v3504_v44  ;;  %v3472_v53 = vld [vmem:[%s6618_s3 + $0x238] sm:$0xf0]  ;;  %v5328_v59 = vor.u32 %v3743_v24, %v3214_v13  ;;  %v5338_v11 = vpop.f32.mrf.mxu1  ;;  %v5352_v24 = vpop.f32.mrf.mxu2 }
  0xf4   :  { %1213 = vmatpush.bf16.msra.mxu2 %v5268_v6  ;;  %1226 = vmatpush.bf16.msra.mxu3 %v5270_v28  ;;  %7046 = vst [vmem:[#allocation135_spill] sm:$0xff] %v5304_v52  ;;  %v5330_v44 = vor.u32 %v3807_v14, %v3470_v7  ;;  %v5334_v28 = vor.u32 %v3739_v58, %v3216_v35  ;;  %v5354_v13 = vpop.f32.mrf.mxu3  ;;  %v5378_v58 = vpop.f32.mrf.mxu0 }
  0xf5   :  { %7047 = vst [vmem:[#allocation136_spill] sm:$0xff] %v5306_v63  ;;  %v5336_v6 = vor.u32 %v3803_v9, %v3472_v53 }
  0xf6   :  { %7048 = vst [vmem:[#allocation137_spill] sm:$0xff] %v5328_v59 }
  0xf7   :  { %1188 = vmatpush.bf16.msra.mxu0 %v5292_v20  ;;  %1201 = vmatpush.bf16.msrb.mxu1 %v5294_v19  ;;  %7049 = vst [vmem:[#allocation138_spill] sm:$0xff] %v5330_v44 }
  0xf8   :  { %1214 = vmatpush.bf16.msra.mxu2 %v5304_v52  ;;  %1227 = vmatpush.bf16.msra.mxu3 %v5306_v63  ;;  %7050 = vst [vmem:[#allocation139_spill] sm:$0xff] %v5334_v28 }
  0xf9   :  { %7051 = vst [vmem:[#allocation140_spill] sm:$0xff] %v5336_v6 }
  0xfb   :  { %1189 = vmatpush.bf16.msra.mxu0 %v5328_v59  ;;  %1202 = vmatpush.bf16.msrb.mxu1 %v5330_v44  ;;  %v5358_v7 = vpop.f32.mrf.mxu1 }
  0xfc   :  { %1215 = vmatpush.bf16.msra.mxu2 %v5334_v28  ;;  %1228 = vmatpush.bf16.msra.mxu3 %v5336_v6  ;;  %7052 = vst [vmem:[#allocation141_spill] sm:$0xff] %v5358_v7  ;;  %v5392_v53 = vpop.f32.mrf.mxu0  ;;  %v7065_v7 = vld [vmem:[#allocation47_spill] sm:$0xff] }
  0xfd   :  { %7058 = vst [vmem:[#allocation147_spill] sm:$0xff] %v5392_v53  ;;  %v7068_v53 = vld [vmem:[#allocation51_spill] sm:$0xff] }
  0xfe   :  { %1190 = vmatmul.bf16.vlgmr.msra.gmra.mxu0 %v4774_v62  ;;  %1203 = vmatmul.bf16.vlgmr.msrb.gmra.mxu1 %v4776_v2 }
  0xff   :  { %1284 = vmatpush.bf16.msrb.mxu0 %v4123_v21  ;;  %1297 = vmatpush.bf16.msra.mxu1 %v4137_v25 }
 0x100   :  { %1216 = vmatmul.bf16.vlgmr.msra.gmra.mxu2 %v4774_v62  ;;  %1229 = vmatmul.bf16.vlgmr.msra.gmra.mxu3 %v4776_v2  ;;  %v5366_v62 = vpop.f32.mrf.mxu2  ;;  %v5368_v2 = vpop.f32.mrf.mxu3 }
 0x101   :  { %1310 = vmatpush.bf16.msrb.mxu2 %v4139_v26  ;;  %1323 = vmatpush.bf16.msrb.mxu3 %v4148_v29  ;;  %7053 = vst [vmem:[#allocation142_spill] sm:$0xff] %v5366_v62  ;;  %v7064_v62 = vld [vmem:[#allocation46_spill] sm:$0xff] }
 0x102   :  { %7054 = vst [vmem:[#allocation143_spill] sm:$0xff] %v5368_v2 }
 0x103   :  { %1285 = vmatpush.bf16.msrb.mxu0 %v4173_v36  ;;  %1298 = vmatpush.bf16.msra.mxu1 %v4185_v40  ;;  %v5372_v14 = vpop.f32.mrf.mxu1 }
 0x104   :  { %7055 = vst [vmem:[#allocation144_spill] sm:$0xff] %v5372_v14 }
 0x105   :  { %1311 = vmatpush.bf16.msrb.mxu2 %v4187_v41  ;;  %1324 = vmatpush.bf16.msrb.mxu3 %v4200_v45 }
 0x107   :  { %1286 = vmatpush.bf16.msrb.mxu0 %v4213_v49  ;;  %1299 = vmatpush.bf16.msra.mxu1 %v4215_v50 }
 0x108   :  { %v5384_v35 = vpop.f32.mrf.mxu2  ;;  %v5386_v9 = vpop.f32.mrf.mxu3 }
 0x109   :  { %1312 = vmatpush.bf16.msrb.mxu2 %v4227_v54  ;;  %1325 = vmatpush.bf16.msrb.mxu3 %v4232_v56  ;;  %7056 = vst [vmem:[#allocation145_spill] sm:$0xff] %v5384_v35 }
 0x10a   :  { %7057 = vst [vmem:[#allocation146_spill] sm:$0xff] %v5386_v9 }
 0x10b   :  { %1287 = vmatpush.bf16.msrb.mxu0 %v4247_v60  ;;  %1300 = vmatpush.bf16.msra.mxu1 %v4258_v0  ;;  %v5394_v14 = vpop.f32.mrf.mxu1 }
 0x10c   :  { %7059 = vst [vmem:[#allocation148_spill] sm:$0xff] %v5394_v14  ;;  %v5412_v14 = vpop.f32.mrf.mxu0 }
 0x10d   :  { %1313 = vmatpush.bf16.msrb.mxu2 %v4260_v1  ;;  %1326 = vmatpush.bf16.msrb.mxu3 %v4269_v4  ;;  %7062 = vst [vmem:[#allocation151_spill] sm:$0xff] %v5412_v14 }
 0x10f   :  { %1288 = vmatpush.bf16.msrb.mxu0 %v4280_v8  ;;  %1301 = vmatpush.bf16.msra.mxu1 %v4291_v12 }
 0x110   :  { %v5404_v9 = vpop.f32.mrf.mxu2  ;;  %v5406_v35 = vpop.f32.mrf.mxu3 }
 0x111   :  { %1314 = vmatpush.bf16.msrb.mxu2 %v4303_v16  ;;  %1327 = vmatpush.bf16.msrb.mxu3 %v4305_v17  ;;  %7060 = vst [vmem:[#allocation149_spill] sm:$0xff] %v5404_v9  ;;  %v7066_v9 = vld [vmem:[#allocation48_spill] sm:$0xff] }
 0x112   :  { %7061 = vst [vmem:[#allocation150_spill] sm:$0xff] %v5406_v35  ;;  %v7067_v35 = vld [vmem:[#allocation50_spill] sm:$0xff] }
 0x113   :  { %1289 = vmatpush.bf16.msrb.mxu0 %v4325_v27  ;;  %1302 = vmatpush.bf16.msra.mxu1 %v4338_v32  ;;  %v5414_v2 = vpop.f32.mrf.mxu1 }
 0x114   :  { %7063 = vst [vmem:[#allocation152_spill] sm:$0xff] %v5414_v2  ;;  %v7073_v2 = vld [vmem:[#allocation54_spill] sm:$0xff] }
 0x115   :  { %1315 = vmatpush.bf16.msrb.mxu2 %v4340_v33  ;;  %1328 = vmatpush.bf16.msrb.mxu3 %v4350_v37 }
 0x117   :  { %1290 = vmatpush.bf16.msrb.mxu0 %v4365_v43  ;;  %1303 = vmatpush.bf16.msra.mxu1 %v4376_v48 }
 0x118   :  { %v5426_v14 = vpop.f32.mrf.mxu3 }
 0x119   :  { %1316 = vmatpush.bf16.msrb.mxu2 %v4378_v51  ;;  %1329 = vmatpush.bf16.msrb.mxu3 %v4387_v55  ;;  %7072 = vst [vmem:[#allocation154_spill] sm:$0xff] %v5426_v14 }
 0x11b   :  { %1291 = vmatpush.bf16.msrb.mxu0 %v4401_v61  ;;  %1304 = vmatpush.bf16.msra.mxu1 %v4412_v3 }
 0x11d   :  { %1317 = vmatpush.bf16.msrb.mxu2 %v4414_v5  ;;  %1330 = vmatpush.bf16.msrb.mxu3 %v4423_v10  ;;  %v7100_v5 = vld [vmem:[#allocation60_spill] sm:$0xff] }
 0x11f   :  { %1336 = vmatpush.bf16.msra.mxu0 %v4435_v15  ;;  %1349 = vmatpush.bf16.msrb.mxu1 %v4448_v22 }
 0x121   :  { %1362 = vmatpush.bf16.msra.mxu2 %v4450_v23  ;;  %1375 = vmatpush.bf16.msra.mxu3 %v4462_v31  ;;  %v7069_v31 = vld [vmem:[#allocation52_spill] sm:$0xff] }
 0x123   :  { %1337 = vmatpush.bf16.msra.mxu0 %v4475_v39  ;;  %1350 = vmatpush.bf16.msrb.mxu1 %v4477_v42  ;;  %v7070_v39 = vld [vmem:[#allocation53_spill] sm:$0xff]  ;;  %v5424_v42 = vpop.f32.mrf.mxu2 }
 0x124   :  { %7071 = vst [vmem:[#allocation153_spill] sm:$0xff] %v5424_v42  ;;  %v7082_v42 = vld [vmem:[#allocation64_spill] sm:$0xff] }
 0x125   :  { %1363 = vmatpush.bf16.msra.mxu2 %v4496_v57  ;;  %1376 = vmatpush.bf16.msra.mxu3 %v7064_v62  ;;  %v7074_v57 = vld [vmem:[#allocation56_spill] sm:$0xff]  ;;  %v5430_v62 = vpop.f32.mrf.mxu0 }
 0x126   :  { %7075 = vst [vmem:[#allocation155_spill] sm:$0xff] %v5430_v62  ;;  %v7086_v62 = vld [vmem:[#allocation67_spill] sm:$0xff] }
 0x127   :  { %1338 = vmatpush.bf16.msra.mxu0 %v7065_v7  ;;  %1351 = vmatpush.bf16.msrb.mxu1 %v7066_v9  ;;  %v5432_v7 = vpop.f32.mrf.mxu1  ;;  %v7077_v9 = vld [vmem:[#allocation58_spill] sm:$0xff] }
 0x128   :  { %7076 = vst [vmem:[#allocation156_spill] sm:$0xff] %v5432_v7  ;;  %v7087_v7 = vld [vmem:[#allocation68_spill] sm:$0xff] }
 0x129   :  { %1364 = vmatpush.bf16.msra.mxu2 %v7067_v35  ;;  %1377 = vmatpush.bf16.msra.mxu3 %v7068_v53  ;;  %v7078_v35 = vld [vmem:[#allocation59_spill] sm:$0xff]  ;;  %v7079_v53 = vld [vmem:[#allocation61_spill] sm:$0xff] }
 0x12b   :  { %1339 = vmatpush.bf16.msra.mxu0 %v7069_v31  ;;  %1352 = vmatpush.bf16.msrb.mxu1 %v7070_v39  ;;  %v7080_v31 = vld [vmem:[#allocation62_spill] sm:$0xff]  ;;  %v7081_v39 = vld [vmem:[#allocation63_spill] sm:$0xff]  ;;  %v5440_v14 = vpop.f32.mrf.mxu2 }
 0x12c   :  { %7083 = vst [vmem:[#allocation157_spill] sm:$0xff] %v5440_v14  ;;  %v7094_v14 = vld [vmem:[#allocation73_spill] sm:$0xff] }
 0x12d   :  { %1365 = vmatpush.bf16.msra.mxu2 %v7073_v2  ;;  %1378 = vmatpush.bf16.msra.mxu3 %v7074_v57  ;;  %v5442_v2 = vpop.f32.mrf.mxu3  ;;  %v7085_v57 = vld [vmem:[#allocation65_spill] sm:$0xff] }
 0x12e   :  { %7084 = vst [vmem:[#allocation158_spill] sm:$0xff] %v5442_v2  ;;  %v7095_v2 = vld [vmem:[#allocation74_spill] sm:$0xff] }
 0x12f   :  { %1340 = vmatpush.bf16.msra.mxu0 %v7077_v9  ;;  %1353 = vmatpush.bf16.msrb.mxu1 %v7078_v35  ;;  %v7088_v9 = vld [vmem:[#allocation69_spill] sm:$0xff]  ;;  %v5448_v35 = vpop.f32.mrf.mxu0 }
 0x130   :  { %7089 = vst [vmem:[#allocation159_spill] sm:$0xff] %v5448_v35 }
 0x131   :  { %1366 = vmatpush.bf16.msra.mxu2 %v7079_v53  ;;  %1379 = vmatpush.bf16.msra.mxu3 %v7080_v31  ;;  %v5450_v53 = vpop.f32.mrf.mxu1  ;;  %v7091_v31 = vld [vmem:[#allocation70_spill] sm:$0xff] }
 0x132   :  { %7090 = vst [vmem:[#allocation160_spill] sm:$0xff] %v5450_v53  ;;  %v7099_v53 = vld [vmem:[#allocation49_spill] sm:$0xff] }
 0x133   :  { %1341 = vmatpush.bf16.msra.mxu0 %v7081_v39  ;;  %1354 = vmatpush.bf16.msrb.mxu1 %v7082_v42  ;;  %v7092_v39 = vld [vmem:[#allocation71_spill] sm:$0xff]  ;;  %v7093_v42 = vld [vmem:[#allocation72_spill] sm:$0xff] }
 0x135   :  { %1367 = vmatpush.bf16.msra.mxu2 %v7085_v57  ;;  %1380 = vmatpush.bf16.msra.mxu3 %v7086_v62  ;;  %v7096_v57 = vld [vmem:[#allocation75_spill] sm:$0xff]  ;;  %v5458_v62 = vpop.f32.mrf.mxu2 }
 0x136   :  { %7097 = vst [vmem:[#allocation161_spill] sm:$0xff] %v5458_v62 }
 0x137   :  { %1342 = vmatpush.bf16.msra.mxu0 %v7087_v7  ;;  %1355 = vmatpush.bf16.msrb.mxu1 %v7088_v9  ;;  %v5460_v7 = vpop.f32.mrf.mxu3 }
 0x138   :  { %7098 = vst [vmem:[#allocation162_spill] sm:$0xff] %v5460_v7 }
 0x139   :  { %1368 = vmatpush.bf16.msra.mxu2 %v7091_v31  ;;  %1381 = vmatpush.bf16.msra.mxu3 %v7092_v39  ;;  %v109_v31 = vadd.f32 %v5378_v58, %v7099_v53 }
 0x13a   :  { %v1035_v9 = vpop.f32.mrf.mxu0  ;;  %v1048_v35 = vpop.f32.mrf.mxu1 }
 0x13b   :  { %1343 = vmatpush.bf16.msra.mxu0 %v7093_v42  ;;  %1356 = vmatpush.bf16.msrb.mxu1 %v7094_v14  ;;  %v1049_v23 = vadd.f32 %v1048_v35, %v1035_v9  ;;  %v138_v42 = vadd.f32 %v5338_v11, %v7100_v5  ;;  %v7101_v35 = vld [vmem:[#allocation57_spill] sm:$0xff] }
 0x13c   :  { %v167_v9 = vadd.f32 %v5352_v24, %v7101_v35  ;;  %v7103_v24 = vld [vmem:[#allocation76_spill] sm:$0xff] }
 0x13d   :  { %1369 = vmatpush.bf16.msra.mxu2 %v7095_v2  ;;  %1382 = vmatpush.bf16.msra.mxu3 %v7096_v57  ;;  %v1255_v15 = vadd.f32 %v1049_v23, %v109_v31  ;;  %v7102_v23 = vld [vmem:[#allocation66_spill] sm:$0xff] }
 0x13e   :  { %v196_v31 = vadd.f32 %v5354_v13, %v7102_v23 }
 0x141   :  { %v1061_v10 = vpop.f32.mrf.mxu2  ;;  %v1074_v39 = vpop.f32.mrf.mxu3 }
 0x142   :  { %v1075_v14 = vadd.f32 %v1074_v39, %v1061_v10  ;;  %v1037_v22 = vpop.f32.mrf.mxu0  ;;  %v1050_v2 = vpop.f32.mrf.mxu1 }
 0x144   :  { %v1256_v57 = vadd.f32 %v1075_v14, %v138_v42 }
 0x146   :  { %3885 = vtanh.f32 %v1256_v57 }
 0x147   :  { %3887 = vtanh.f32 %v1255_v15 }
 0x149   :  { %v1063_v62 = vpop.f32.mrf.mxu2  ;;  %v1076_v7 = vpop.f32.mrf.mxu3 }
 0x14a   :  { %v1087_v3 = vpop.f32.mrf.mxu0  ;;  %v1100_v61 = vpop.f32.mrf.mxu1 }
 0x14b   :  { %v1101_v58 = vadd.f32 %v1100_v61, %v1087_v3 }
 0x14c   :  { %v3886_v53 = vpop.eup %3885 }
 0x14d   :  { %v3888_v55 = vpop.eup %3887  ;;  %v1257_v51 = vadd.f32 %v1101_v58, %v167_v9  ;;  %v1263_v48 = vmul.f32 0.5, %v3886_v53 }
 0x14e   :  { %v1260_v10 = vmul.f32 0.5, %v3888_v55 }
 0x14f   :  { %3889 = vtanh.f32 %v1257_v51  ;;  %v1264_v15 = vadd.f32 0.5, %v1263_v48 }
 0x150   :  { %v1261_v7 = vadd.f32 0.5, %v1260_v10 }
 0x151   :  { %v1113_v22 = vpop.f32.mrf.mxu2  ;;  %v1126_v39 = vpop.f32.mrf.mxu3  ;;  %v1269_v61 = vmul.f32 %v1264_v15, %v7103_v24 }
 0x152   :  { %v1127_v42 = vadd.f32 %v1126_v39, %v1113_v22  ;;  %v1089_v57 = vpop.f32.mrf.mxu0  ;;  %v1102_v11 = vpop.f32.mrf.mxu1 }
 0x153   :  { %v341_v11 = vld [vmem:[%s6620_s4] sm:$0xf] }
 0x154   :  { %v1258_v62 = vadd.f32 %v1127_v42, %v196_v31 }
 0x155   :  { %v3890_v2 = vpop.eup %3889 }
 0x156   :  { %v1270_v3 = vmul.f32 %v3890_v2, %v1261_v7  ;;  %3891 = vtanh.f32 %v1258_v62  ;;  %v5477_v2 = vperm.slane %v341_v11, 1 }
 0x158   :  { %v5471_v14 = vadd.f32 %v1270_v3, %v1269_v61  ;;  %7104 = vst [vmem:[#allocation60_spill] sm:$0xff] %v5477_v2  ;;  %v5479_v61 = vperm.slane %v341_v11, 0 }
 0x159   :  { %v1115_v51 = vpop.f32.mrf.mxu2  ;;  %v1128_v55 = vpop.f32.mrf.mxu3 }
 0x15a   :  { %3893 = vtanh.f32 %v5471_v14  ;;  %7105 = vst [vmem:[#allocation57_spill] sm:$0xff] %v5479_v61 }
 0x15b   :  { %v1139_v9 = vpop.f32.mrf.mxu0  ;;  %v1152_v13 = vpop.f32.mrf.mxu1 }
 0x15c   :  { %v3892_v53 = vpop.eup %3891  ;;  %v1153_v3 = vadd.f32 %v1152_v13, %v1139_v9 }
 0x15d   :  { %v1267_v48 = vmul.f32 0.5, %v3892_v53  ;;  %v5483_v53 = vperm.slane %v341_v11, 2 }
 0x15e   :  { %v1234_v55 = vadd.f32 %v1153_v3, %v5479_v61 }
 0x15f   :  { %v1268_v58 = vadd.f32 0.5, %v1267_v48 }
 0x160   :  { %v3894_v22 = vpop.eup %3893 }
 0x161   :  { %v1273_v39 = vmul.f32 %v3894_v22, %v1268_v58 }
 0x163   :  { %v1274_v10 = vpack.c.bf16 %v1273_v39, %v1273_v39  ;;  %v1141_v57 = vpop.f32.mrf.mxu0  ;;  %v1154_v15 = vpop.f32.mrf.mxu1 }
 0x164   :  { %v1165_v31 = vpop.f32.mrf.mxu2  ;;  %v1178_v42 = vpop.f32.mrf.mxu3 }
 0x165   :  { %1275 = vst [vmem:[#allocation5] sm:$0xf] %v1274_v10  ;;  %v1179_v24 = vadd.f32 %v1178_v42, %v1165_v31  ;;  %v5486_v42 = vperm.slane %v341_v11, 3 }
 0x167   :  { %v1235_v51 = vadd.f32 %v1179_v24, %v5477_v2 }
 0x169   :  { %3895 = vtanh.f32 %v1235_v51 }
 0x16a   :  { %3897 = vtanh.f32 %v1234_v55 }
 0x16c   :  { %v1167_v7 = vpop.f32.mrf.mxu2  ;;  %v1180_v62 = vpop.f32.mrf.mxu3 }
 0x16f   :  { %v3896_v22 = vpop.eup %3895 }
 0x170   :  { %v3898_v10 = vpop.eup %3897  ;;  %v1242_v15 = vmul.f32 0.5, %v3896_v22 }
 0x171   :  { %v1239_v31 = vmul.f32 0.5, %v3898_v10 }
 0x172   :  { %v1243_v7 = vadd.f32 0.5, %v1242_v15 }
 0x173   :  { %v1240_v51 = vadd.f32 0.5, %v1239_v31 }
 0x174   :  { %v1248_v2 = vmul.f32 0.0, %v1243_v7  ;;  %v7107_v7 = vld [vmem:[#allocation78_spill] sm:$0xff] }
 0x17b   :  { %v1191_v48 = vpop.f32.mrf.mxu0  ;;  %v1204_v58 = vpop.f32.mrf.mxu1 }
 0x17c   :  { %v1205_v39 = vadd.f32 %v1204_v58, %v1191_v48 }
 0x17e   :  { %v1236_v57 = vadd.f32 %v1205_v39, %v5483_v53 }
 0x180   :  { %3899 = vtanh.f32 %v1236_v57 }
 0x183   :  { %v1217_v9 = vpop.f32.mrf.mxu2  ;;  %v1230_v13 = vpop.f32.mrf.mxu3 }
 0x184   :  { %v1231_v62 = vadd.f32 %v1230_v13, %v1217_v9  ;;  %v1193_v24 = vpop.f32.mrf.mxu0  ;;  %v1206_v3 = vpop.f32.mrf.mxu1 }
 0x186   :  { %v1237_v55 = vadd.f32 %v1231_v62, %v5486_v42  ;;  %v3900_v61 = vpop.eup %3899 }
 0x187   :  { %v1249_v48 = vmul.f32 %v3900_v61, %v1240_v51  ;;  %v7108_v51 = vld [vmem:[#allocation79_spill] sm:$0xff] }
 0x188   :  { %3901 = vtanh.f32 %v1237_v55  ;;  %v7109_v55 = vld [vmem:[#allocation80_spill] sm:$0xff] }
 0x189   :  { %v5489_v58 = vadd.f32 %v1249_v48, %v1248_v2  ;;  %v7106_v2 = vld [vmem:[#allocation77_spill] sm:$0xff] }
 0x18a   :  { %v7110_v48 = vld [vmem:[#allocation81_spill] sm:$0xff] }
 0x18b   :  { %v1219_v22 = vpop.f32.mrf.mxu2  ;;  %v1232_v39 = vpop.f32.mrf.mxu3  ;;  %3903 = vtanh.f32 %v5489_v58 }
 0x18c   :  { %v7111_v22 = vld [vmem:[#allocation82_spill] sm:$0xff]  ;;  %v7112_v39 = vld [vmem:[#allocation83_spill] sm:$0xff] }
 0x18e   :  { %v3902_v11 = vpop.eup %3901 }
 0x18f   :  { %v1246_v10 = vmul.f32 0.5, %v3902_v11  ;;  %v7113_v11 = vld [vmem:[#allocation84_spill] sm:$0xff] }
 0x191   :  { %v1247_v57 = vadd.f32 0.5, %v1246_v10  ;;  %v3904_v15 = vpop.eup %3903  ;;  %v7114_v10 = vld [vmem:[#allocation85_spill] sm:$0xff] }
 0x193   :  { %v1252_v9 = vmul.f32 %v3904_v15, %v1247_v57  ;;  %v7115_v57 = vld [vmem:[#allocation86_spill] sm:$0xff]  ;;  %v7116_v15 = vld [vmem:[#allocation87_spill] sm:$0xff] }
 0x195   :  { %v1253_v13 = vpack.c.bf16 %v1252_v9, %v1252_v9  ;;  %v7117_v9 = vld [vmem:[#allocation88_spill] sm:$0xff] }
 0x197   :  { %1254 = vst [vmem:[#allocation5 + $0x4] sm:$0xf] %v1253_v13  ;;  %v7118_v13 = vld [vmem:[#allocation89_spill] sm:$0xff] }
 0x19e   :  { %v1276_v31 = vld [vmem:[#allocation5] sm:$0xff] }
 0x19f   :  { %v1278_v24 = vunpack.c.l.b16 %v1276_v31  ;;  %v1279_v62 = vunpack.c.h.b16 %v1276_v31  ;;  %v7119_v31 = vld [vmem:[#allocation90_spill] sm:$0xff] }
 0x1a1   :  { %v5492_v3 = vpack.c.b16 %v1278_v24, %v1278_v24  ;;  %v5494_v61 = vpack.c.b16 %v1279_v62, %v1279_v62  ;;  %v7120_v24 = vld [vmem:[#allocation91_spill] sm:$0xff]  ;;  %v7121_v62 = vld [vmem:[#allocation92_spill] sm:$0xff] }
 0x1a3   :  { %1292 = vmatmul.bf16.vlgmr.msrb.gmra.mxu0 %v5492_v3  ;;  %1305 = vmatmul.bf16.vlgmr.msra.gmra.mxu1 %v5494_v61 }
 0x1a4   :  { %1318 = vmatmul.bf16.vlgmr.msrb.gmra.mxu2 %v5492_v3  ;;  %1331 = vmatmul.bf16.vlgmr.msrb.gmra.mxu3 %v5494_v61 }
 0x1a5   :  { %1388 = vmatpush.bf16.msrb.mxu0 %v7106_v2  ;;  %1401 = vmatpush.bf16.msra.mxu1 %v7107_v7 }
 0x1a6   :  { %1414 = vmatpush.bf16.msrb.mxu2 %v7108_v51  ;;  %1427 = vmatpush.bf16.msrb.mxu3 %v7109_v55 }
 0x1a9   :  { %1389 = vmatpush.bf16.msrb.mxu0 %v7110_v48  ;;  %1402 = vmatpush.bf16.msra.mxu1 %v7111_v22  ;;  %v7132_v22 = vld [vmem:[#allocation103_spill] sm:$0xff] }
 0x1aa   :  { %1415 = vmatpush.bf16.msrb.mxu2 %v7112_v39  ;;  %1428 = vmatpush.bf16.msrb.mxu3 %v7113_v11  ;;  %v7130_v11 = vld [vmem:[#allocation101_spill] sm:$0xff]  ;;  %v7131_v39 = vld [vmem:[#allocation102_spill] sm:$0xff] }
 0x1ad   :  { %1390 = vmatpush.bf16.msrb.mxu0 %v7114_v10  ;;  %1403 = vmatpush.bf16.msra.mxu1 %v7115_v57  ;;  %v7122_v57 = vld [vmem:[#allocation93_spill] sm:$0xff]  ;;  %v7129_v10 = vld [vmem:[#allocation100_spill] sm:$0xff] }
 0x1ae   :  { %1416 = vmatpush.bf16.msrb.mxu2 %v7116_v15  ;;  %1429 = vmatpush.bf16.msrb.mxu3 %v7117_v9  ;;  %v7123_v15 = vld [vmem:[#allocation94_spill] sm:$0xff]  ;;  %v7124_v9 = vld [vmem:[#allocation95_spill] sm:$0xff] }
 0x1b1   :  { %1391 = vmatpush.bf16.msrb.mxu0 %v7118_v13  ;;  %1404 = vmatpush.bf16.msra.mxu1 %v7119_v31  ;;  %v7125_v13 = vld [vmem:[#allocation96_spill] sm:$0xff]  ;;  %v7126_v31 = vld [vmem:[#allocation97_spill] sm:$0xff] }
 0x1b2   :  { %1417 = vmatpush.bf16.msrb.mxu2 %v7120_v24  ;;  %1430 = vmatpush.bf16.msrb.mxu3 %v7121_v62  ;;  %v7127_v24 = vld [vmem:[#allocation98_spill] sm:$0xff]  ;;  %v7128_v62 = vld [vmem:[#allocation99_spill] sm:$0xff] }
 0x1b3   :  { %1344 = vmatmul.bf16.vlgmr.msra.gmra.mxu0 %v5492_v3  ;;  %1357 = vmatmul.bf16.vlgmr.msrb.gmra.mxu1 %v5494_v61 }
 0x1b4   :  { %1370 = vmatmul.bf16.vlgmr.msra.gmra.mxu2 %v5492_v3  ;;  %1383 = vmatmul.bf16.vlgmr.msra.gmra.mxu3 %v5494_v61 }
 0x1b5   :  { %1392 = vmatpush.bf16.msrb.mxu0 %v7122_v57  ;;  %1405 = vmatpush.bf16.msra.mxu1 %v7123_v15 }
 0x1b6   :  { %1418 = vmatpush.bf16.msrb.mxu2 %v7124_v9  ;;  %1431 = vmatpush.bf16.msrb.mxu3 %v7125_v13 }
 0x1b9   :  { %1393 = vmatpush.bf16.msrb.mxu0 %v7126_v31  ;;  %1406 = vmatpush.bf16.msra.mxu1 %v7127_v24 }
 0x1ba   :  { %1419 = vmatpush.bf16.msrb.mxu2 %v7128_v62  ;;  %1432 = vmatpush.bf16.msrb.mxu3 %v7129_v10  ;;  %v7133_v62 = vld [vmem:[#allocation110_spill] sm:$0xff]  ;;  %v7134_v10 = vld [vmem:[#allocation111_spill] sm:$0xff] }
 0x1bd   :  { %1394 = vmatpush.bf16.msrb.mxu0 %v7130_v11  ;;  %1407 = vmatpush.bf16.msra.mxu1 %v7131_v39  ;;  %v7135_v11 = vld [vmem:[#allocation112_spill] sm:$0xff]  ;;  %v7146_v39 = vld [vmem:[#allocation123_spill] sm:$0xff] }
 0x1be   :  { %1420 = vmatpush.bf16.msrb.mxu2 %v7132_v22  ;;  %1433 = vmatpush.bf16.msrb.mxu3 %v5020_v38  ;;  %v7144_v38 = vld [vmem:[#allocation121_spill] sm:$0xff]  ;;  %v7145_v22 = vld [vmem:[#allocation122_spill] sm:$0xff] }
 0x1c1   :  { %1395 = vmatpush.bf16.msrb.mxu0 %v5051_v18  ;;  %1408 = vmatpush.bf16.msra.mxu1 %v5053_v30  ;;  %v7136_v30 = vld [vmem:[#allocation113_spill] sm:$0xff]  ;;  %v7143_v18 = vld [vmem:[#allocation120_spill] sm:$0xff] }
 0x1c2   :  { %1421 = vmatpush.bf16.msrb.mxu2 %v5066_v34  ;;  %1434 = vmatpush.bf16.msrb.mxu3 %v5068_v46  ;;  %v7137_v34 = vld [vmem:[#allocation114_spill] sm:$0xff]  ;;  %v7138_v46 = vld [vmem:[#allocation115_spill] sm:$0xff] }
 0x1c4   :  { %1396 = vmatmul.bf16.vlgmr.msrb.gmra.mxu0 %v5492_v3  ;;  %1409 = vmatmul.bf16.vlgmr.msra.gmra.mxu1 %v5494_v61 }
 0x1c5   :  { %1440 = vmatpush.bf16.msra.mxu0 %v5070_v47  ;;  %1453 = vmatpush.bf16.msrb.mxu1 %v7133_v62  ;;  %v7139_v47 = vld [vmem:[#allocation116_spill] sm:$0xff]  ;;  %v7140_v62 = vld [vmem:[#allocation117_spill] sm:$0xff] }
 0x1c6   :  { %1466 = vmatpush.bf16.msra.mxu2 %v7134_v10  ;;  %1479 = vmatpush.bf16.msra.mxu3 %v7135_v11  ;;  %v7141_v10 = vld [vmem:[#allocation118_spill] sm:$0xff]  ;;  %v7142_v11 = vld [vmem:[#allocation119_spill] sm:$0xff] }
 0x1c7   :  { %1422 = vmatmul.bf16.vlgmr.msrb.gmra.mxu2 %v5492_v3  ;;  %1435 = vmatmul.bf16.vlgmr.msrb.gmra.mxu3 %v5494_v61 }
 0x1c9   :  { %1441 = vmatpush.bf16.msra.mxu0 %v7136_v30  ;;  %1454 = vmatpush.bf16.msrb.mxu1 %v7137_v34  ;;  %v7147_v30 = vld [vmem:[#allocation124_spill] sm:$0xff]  ;;  %v7148_v34 = vld [vmem:[#allocation125_spill] sm:$0xff] }
 0x1ca   :  { %1467 = vmatpush.bf16.msra.mxu2 %v7138_v46  ;;  %1480 = vmatpush.bf16.msra.mxu3 %v7139_v47  ;;  %v7149_v46 = vld [vmem:[#allocation126_spill] sm:$0xff]  ;;  %v7150_v47 = vld [vmem:[#allocation127_spill] sm:$0xff] }
 0x1cd   :  { %1442 = vmatpush.bf16.msra.mxu0 %v7140_v62  ;;  %1455 = vmatpush.bf16.msrb.mxu1 %v7141_v10  ;;  %v7151_v62 = vld [vmem:[#allocation128_spill] sm:$0xff]  ;;  %v7152_v10 = vld [vmem:[#allocation129_spill] sm:$0xff] }
 0x1ce   :  { %1468 = vmatpush.bf16.msra.mxu2 %v7142_v11  ;;  %1481 = vmatpush.bf16.msra.mxu3 %v7143_v18  ;;  %v7153_v11 = vld [vmem:[#allocation130_spill] sm:$0xff]  ;;  %v7154_v18 = vld [vmem:[#allocation131_spill] sm:$0xff] }
 0x1d1   :  { %1443 = vmatpush.bf16.msra.mxu0 %v7144_v38  ;;  %1456 = vmatpush.bf16.msrb.mxu1 %v7145_v22  ;;  %v7155_v38 = vld [vmem:[#allocation132_spill] sm:$0xff] }
 0x1d2   :  { %1469 = vmatpush.bf16.msra.mxu2 %v7146_v39  ;;  %1482 = vmatpush.bf16.msra.mxu3 %v7147_v30 }
 0x1d5   :  { %1444 = vmatpush.bf16.msra.mxu0 %v7148_v34  ;;  %1457 = vmatpush.bf16.msrb.mxu1 %v7149_v46 }
 0x1d6   :  { %1470 = vmatpush.bf16.msra.mxu2 %v7150_v47  ;;  %1483 = vmatpush.bf16.msra.mxu3 %v7151_v62 }
 0x1d9   :  { %1445 = vmatpush.bf16.msra.mxu0 %v7152_v10  ;;  %1458 = vmatpush.bf16.msrb.mxu1 %v7153_v11 }
 0x1da   :  { %1471 = vmatpush.bf16.msra.mxu2 %v7154_v18  ;;  %1484 = vmatpush.bf16.msra.mxu3 %v7155_v38 }
 0x1dd   :  { %1446 = vmatpush.bf16.msra.mxu0 %v5292_v20  ;;  %1459 = vmatpush.bf16.msrb.mxu1 %v5294_v19 }
 0x1de   :  { %1472 = vmatpush.bf16.msra.mxu2 %v5304_v52  ;;  %1485 = vmatpush.bf16.msra.mxu3 %v5306_v63 }
 0x1e1   :  { %1447 = vmatpush.bf16.msra.mxu0 %v5328_v59  ;;  %1460 = vmatpush.bf16.msrb.mxu1 %v5330_v44 }
 0x1e2   :  { %1473 = vmatpush.bf16.msra.mxu2 %v5334_v28  ;;  %1486 = vmatpush.bf16.msra.mxu3 %v5336_v6 }
 0x1e4   :  { %1448 = vmatmul.bf16.vlgmr.msra.gmra.mxu0 %v5492_v3  ;;  %1461 = vmatmul.bf16.vlgmr.msrb.gmra.mxu1 %v5494_v61 }
 0x1e5   :  { %1542 = vmatpush.bf16.msrb.mxu0 %v4123_v21  ;;  %1555 = vmatpush.bf16.msra.mxu1 %v4137_v25 }
 0x1e6   :  { %1474 = vmatmul.bf16.vlgmr.msra.gmra.mxu2 %v5492_v3  ;;  %1487 = vmatmul.bf16.vlgmr.msra.gmra.mxu3 %v5494_v61  ;;  %v7156_v3 = vld [vmem:[#allocation31_spill] sm:$0xff]  ;;  %v7157_v61 = vld [vmem:[#allocation32_spill] sm:$0xff] }
 0x1e7   :  { %1568 = vmatpush.bf16.msrb.mxu2 %v4139_v26  ;;  %1581 = vmatpush.bf16.msrb.mxu3 %v4148_v29 }
 0x1e9   :  { %1543 = vmatpush.bf16.msrb.mxu0 %v4173_v36  ;;  %1556 = vmatpush.bf16.msra.mxu1 %v4185_v40 }
 0x1eb   :  { %1569 = vmatpush.bf16.msrb.mxu2 %v4187_v41  ;;  %1582 = vmatpush.bf16.msrb.mxu3 %v4200_v45 }
 0x1ed   :  { %1544 = vmatpush.bf16.msrb.mxu0 %v4213_v49  ;;  %1557 = vmatpush.bf16.msra.mxu1 %v4215_v50 }
 0x1ef   :  { %1570 = vmatpush.bf16.msrb.mxu2 %v4227_v54  ;;  %1583 = vmatpush.bf16.msrb.mxu3 %v4232_v56 }
 0x1f1   :  { %1545 = vmatpush.bf16.msrb.mxu0 %v4247_v60  ;;  %1558 = vmatpush.bf16.msra.mxu1 %v4258_v0 }
 0x1f3   :  { %1571 = vmatpush.bf16.msrb.mxu2 %v4260_v1  ;;  %1584 = vmatpush.bf16.msrb.mxu3 %v4269_v4  ;;  %v7196_v1 = vld [vmem:[#allocation147_spill] sm:$0xff] }
 0x1f5   :  { %1546 = vmatpush.bf16.msrb.mxu0 %v4280_v8  ;;  %1559 = vmatpush.bf16.msra.mxu1 %v4291_v12  ;;  %v7158_v8 = vld [vmem:[#allocation33_spill] sm:$0xff]  ;;  %v7159_v12 = vld [vmem:[#allocation34_spill] sm:$0xff] }
 0x1f7   :  { %1572 = vmatpush.bf16.msrb.mxu2 %v4303_v16  ;;  %1585 = vmatpush.bf16.msrb.mxu3 %v4305_v17  ;;  %v7160_v16 = vld [vmem:[#allocation35_spill] sm:$0xff]  ;;  %v7161_v17 = vld [vmem:[#allocation38_spill] sm:$0xff] }
 0x1f9   :  { %1547 = vmatpush.bf16.msrb.mxu0 %v4325_v27  ;;  %1560 = vmatpush.bf16.msra.mxu1 %v4338_v32  ;;  %v7162_v27 = vld [vmem:[#allocation39_spill] sm:$0xff]  ;;  %v7163_v32 = vld [vmem:[#allocation36_spill] sm:$0xff] }
 0x1fb   :  { %1573 = vmatpush.bf16.msrb.mxu2 %v4340_v33  ;;  %1586 = vmatpush.bf16.msrb.mxu3 %v4350_v37  ;;  %v7164_v33 = vld [vmem:[#allocation37_spill] sm:$0xff]  ;;  %v7165_v37 = vld [vmem:[#allocation40_spill] sm:$0xff] }
 0x1fd   :  { %1548 = vmatpush.bf16.msrb.mxu0 %v4365_v43  ;;  %1561 = vmatpush.bf16.msra.mxu1 %v7156_v3  ;;  %v7166_v43 = vld [vmem:[#allocation41_spill] sm:$0xff]  ;;  %v7167_v3 = vld [vmem:[#allocation42_spill] sm:$0xff] }
 0x1ff   :  { %1574 = vmatpush.bf16.msrb.mxu2 %v7157_v61  ;;  %1587 = vmatpush.bf16.msrb.mxu3 %v7158_v8  ;;  %v7168_v61 = vld [vmem:[#allocation43_spill] sm:$0xff]  ;;  %v7169_v8 = vld [vmem:[#allocation45_spill] sm:$0xff] }
 0x201   :  { %1549 = vmatpush.bf16.msrb.mxu0 %v7159_v12  ;;  %1562 = vmatpush.bf16.msra.mxu1 %v7160_v16  ;;  %v7170_v12 = vld [vmem:[#allocation46_spill] sm:$0xff]  ;;  %v7171_v16 = vld [vmem:[#allocation47_spill] sm:$0xff] }
 0x203   :  { %1575 = vmatpush.bf16.msrb.mxu2 %v7163_v32  ;;  %1588 = vmatpush.bf16.msrb.mxu3 %v7164_v33  ;;  %v7174_v32 = vld [vmem:[#allocation51_spill] sm:$0xff]  ;;  %v7175_v33 = vld [vmem:[#allocation52_spill] sm:$0xff] }
 0x205   :  { %1594 = vmatpush.bf16.msra.mxu0 %v7161_v17  ;;  %1607 = vmatpush.bf16.msrb.mxu1 %v7162_v27  ;;  %v7172_v17 = vld [vmem:[#allocation48_spill] sm:$0xff]  ;;  %v7173_v27 = vld [vmem:[#allocation50_spill] sm:$0xff] }
 0x207   :  { %1620 = vmatpush.bf16.msra.mxu2 %v7165_v37  ;;  %1633 = vmatpush.bf16.msra.mxu3 %v7166_v43  ;;  %v7176_v37 = vld [vmem:[#allocation53_spill] sm:$0xff]  ;;  %v7177_v43 = vld [vmem:[#allocation54_spill] sm:$0xff] }
 0x209   :  { %1595 = vmatpush.bf16.msra.mxu0 %v7167_v3  ;;  %1608 = vmatpush.bf16.msrb.mxu1 %v7168_v61  ;;  %v7178_v3 = vld [vmem:[#allocation56_spill] sm:$0xff]  ;;  %v7179_v61 = vld [vmem:[#allocation58_spill] sm:$0xff] }
 0x20b   :  { %1621 = vmatpush.bf16.msra.mxu2 %v7169_v8  ;;  %1634 = vmatpush.bf16.msra.mxu3 %v7170_v12  ;;  %v7180_v8 = vld [vmem:[#allocation59_spill] sm:$0xff]  ;;  %v7181_v12 = vld [vmem:[#allocation61_spill] sm:$0xff] }
 0x20d   :  { %1596 = vmatpush.bf16.msra.mxu0 %v7171_v16  ;;  %1609 = vmatpush.bf16.msrb.mxu1 %v7172_v17  ;;  %v7182_v16 = vld [vmem:[#allocation62_spill] sm:$0xff]  ;;  %v7183_v17 = vld [vmem:[#allocation63_spill] sm:$0xff] }
 0x20f   :  { %1622 = vmatpush.bf16.msra.mxu2 %v7173_v27  ;;  %1635 = vmatpush.bf16.msra.mxu3 %v7174_v32  ;;  %v7184_v27 = vld [vmem:[#allocation64_spill] sm:$0xff]  ;;  %v7185_v32 = vld [vmem:[#allocation65_spill] sm:$0xff] }
 0x211   :  { %1597 = vmatpush.bf16.msra.mxu0 %v7175_v33  ;;  %1610 = vmatpush.bf16.msrb.mxu1 %v7176_v37  ;;  %v7186_v33 = vld [vmem:[#allocation67_spill] sm:$0xff]  ;;  %v7187_v37 = vld [vmem:[#allocation68_spill] sm:$0xff] }
 0x213   :  { %1623 = vmatpush.bf16.msra.mxu2 %v7177_v43  ;;  %1636 = vmatpush.bf16.msra.mxu3 %v7178_v3  ;;  %v7188_v43 = vld [vmem:[#allocation69_spill] sm:$0xff]  ;;  %v7189_v3 = vld [vmem:[#allocation70_spill] sm:$0xff] }
 0x215   :  { %1598 = vmatpush.bf16.msra.mxu0 %v7179_v61  ;;  %1611 = vmatpush.bf16.msrb.mxu1 %v7180_v8  ;;  %v7190_v61 = vld [vmem:[#allocation71_spill] sm:$0xff]  ;;  %v7191_v8 = vld [vmem:[#allocation72_spill] sm:$0xff] }
 0x217   :  { %1624 = vmatpush.bf16.msra.mxu2 %v7181_v12  ;;  %1637 = vmatpush.bf16.msra.mxu3 %v7182_v16  ;;  %v7192_v12 = vld [vmem:[#allocation73_spill] sm:$0xff]  ;;  %v7193_v16 = vld [vmem:[#allocation74_spill] sm:$0xff] }
 0x219   :  { %1599 = vmatpush.bf16.msra.mxu0 %v7183_v17  ;;  %1612 = vmatpush.bf16.msrb.mxu1 %v7184_v27  ;;  %v7194_v17 = vld [vmem:[#allocation75_spill] sm:$0xff] }
 0x21b   :  { %1625 = vmatpush.bf16.msra.mxu2 %v7185_v32  ;;  %1638 = vmatpush.bf16.msra.mxu3 %v7186_v33  ;;  %v7195_v33 = vld [vmem:[#allocation49_spill] sm:$0xff] }
 0x21d   :  { %1600 = vmatpush.bf16.msra.mxu0 %v7187_v37  ;;  %1613 = vmatpush.bf16.msrb.mxu1 %v7188_v43  ;;  %v112_v37 = vadd.f32 %v7196_v1, %v7195_v33 }
 0x21f   :  { %1626 = vmatpush.bf16.msra.mxu2 %v7189_v3  ;;  %1639 = vmatpush.bf16.msra.mxu3 %v7190_v61  ;;  %v7197_v3 = vld [vmem:[#allocation141_spill] sm:$0xff] }
 0x220   :  { %v1293_v27 = vpop.f32.mrf.mxu0  ;;  %v1306_v32 = vpop.f32.mrf.mxu1  ;;  %v141_v60 = vadd.f32 %v7197_v3, %v7100_v5 }
 0x221   :  { %1601 = vmatpush.bf16.msra.mxu0 %v7191_v8  ;;  %1614 = vmatpush.bf16.msrb.mxu1 %v7192_v12  ;;  %v1307_v4 = vadd.f32 %v1306_v32, %v1293_v27  ;;  %v7198_v27 = vld [vmem:[#allocation142_spill] sm:$0xff] }
 0x222   :  { %v170_v32 = vadd.f32 %v7198_v27, %v7101_v35 }
 0x223   :  { %1627 = vmatpush.bf16.msra.mxu2 %v7193_v16  ;;  %1640 = vmatpush.bf16.msra.mxu3 %v7194_v17  ;;  %v1513_v54 = vadd.f32 %v1307_v4, %v112_v37 }
 0x227   :  { %v1319_v0 = vpop.f32.mrf.mxu2  ;;  %v1332_v43 = vpop.f32.mrf.mxu3 }
 0x228   :  { %v1333_v61 = vadd.f32 %v1332_v43, %v1319_v0  ;;  %v1295_v56 = vpop.f32.mrf.mxu0  ;;  %v1308_v8 = vpop.f32.mrf.mxu1 }
 0x22a   :  { %v1514_v12 = vadd.f32 %v1333_v61, %v141_v60  ;;  %v7199_v60 = vld [vmem:[#allocation143_spill] sm:$0xff] }
 0x22b   :  { %v199_v4 = vadd.f32 %v7199_v60, %v7102_v23 }
 0x22c   :  { %3905 = vtanh.f32 %v1514_v12 }
 0x22d   :  { %3907 = vtanh.f32 %v1513_v54 }
 0x22f   :  { %v1321_v16 = vpop.f32.mrf.mxu2  ;;  %v1334_v17 = vpop.f32.mrf.mxu3 }
 0x230   :  { %v1345_v50 = vpop.f32.mrf.mxu0  ;;  %v1358_v49 = vpop.f32.mrf.mxu1 }
 0x231   :  { %v1359_v1 = vadd.f32 %v1358_v49, %v1345_v50 }
 0x232   :  { %v3906_v33 = vpop.eup %3905 }
 0x233   :  { %v3908_v45 = vpop.eup %3907  ;;  %v1515_v41 = vadd.f32 %v1359_v1, %v170_v32  ;;  %v1521_v40 = vmul.f32 0.5, %v3906_v33 }
 0x234   :  { %v1518_v0 = vmul.f32 0.5, %v3908_v45 }
 0x235   :  { %3909 = vtanh.f32 %v1515_v41  ;;  %v1522_v54 = vadd.f32 0.5, %v1521_v40 }
 0x236   :  { %v1519_v37 = vadd.f32 0.5, %v1518_v0 }
 0x237   :  { %v1371_v56 = vpop.f32.mrf.mxu2  ;;  %v1384_v8 = vpop.f32.mrf.mxu3  ;;  %v1527_v49 = vmul.f32 %v1522_v54, %v5471_v14 }
 0x238   :  { %v1385_v12 = vadd.f32 %v1384_v8, %v1371_v56  ;;  %v1347_v16 = vpop.f32.mrf.mxu0  ;;  %v1360_v17 = vpop.f32.mrf.mxu1 }
 0x23a   :  { %v1516_v43 = vadd.f32 %v1385_v12, %v199_v4 }
 0x23b   :  { %v3910_v3 = vpop.eup %3909 }
 0x23c   :  { %v1528_v50 = vmul.f32 %v3910_v3, %v1519_v37  ;;  %3911 = vtanh.f32 %v1516_v43  ;;  %v7200_v43 = vld [vmem:[#allocation60_spill] sm:$0xff] }
 0x23e   :  { %v5649_v61 = vadd.f32 %v1528_v50, %v1527_v49  ;;  %v7201_v49 = vld [vmem:[#allocation57_spill] sm:$0xff] }
 0x23f   :  { %v1373_v41 = vpop.f32.mrf.mxu2  ;;  %v1386_v45 = vpop.f32.mrf.mxu3 }
 0x240   :  { %3913 = vtanh.f32 %v5649_v61 }
 0x241   :  { %v1397_v27 = vpop.f32.mrf.mxu0  ;;  %v1410_v32 = vpop.f32.mrf.mxu1 }
 0x242   :  { %v3912_v33 = vpop.eup %3911  ;;  %v1411_v37 = vadd.f32 %v1410_v32, %v1397_v27 }
 0x243   :  { %v1525_v40 = vmul.f32 0.5, %v3912_v33 }
 0x244   :  { %v1492_v50 = vadd.f32 %v1411_v37, %v7201_v49 }
 0x245   :  { %v1526_v1 = vadd.f32 0.5, %v1525_v40 }
 0x246   :  { %v3914_v56 = vpop.eup %3913 }
 0x247   :  { %v1531_v8 = vmul.f32 %v3914_v56, %v1526_v1 }
 0x249   :  { %v1532_v0 = vpack.c.bf16 %v1531_v8, %v1531_v8  ;;  %v1399_v12 = vpop.f32.mrf.mxu0  ;;  %v1412_v14 = vpop.f32.mrf.mxu1 }
 0x24a   :  { %v1423_v60 = vpop.f32.mrf.mxu2  ;;  %v1436_v4 = vpop.f32.mrf.mxu3 }
 0x24b   :  { %1533 = vst [vmem:[#allocation5] sm:$0xf] %v1532_v0  ;;  %v1437_v17 = vadd.f32 %v1436_v4, %v1423_v60 }
 0x24d   :  { %v1493_v3 = vadd.f32 %v1437_v17, %v7200_v43 }
 0x24f   :  { %3915 = vtanh.f32 %v1493_v3 }
 0x250   :  { %3917 = vtanh.f32 %v1492_v50 }
 0x252   :  { %v1425_v54 = vpop.f32.mrf.mxu2  ;;  %v1438_v16 = vpop.f32.mrf.mxu3 }
 0x255   :  { %v3916_v33 = vpop.eup %3915 }
 0x256   :  { %v3918_v1 = vpop.eup %3917  ;;  %v1500_v8 = vmul.f32 0.5, %v3916_v33 }
 0x257   :  { %v1497_v0 = vmul.f32 0.5, %v3918_v1 }
 0x258   :  { %v1501_v60 = vadd.f32 0.5, %v1500_v8 }
 0x259   :  { %v1498_v54 = vadd.f32 0.5, %v1497_v0 }
 0x25a   :  { %v1506_v37 = vmul.f32 %v1501_v60, %v5489_v58  ;;  %v7202_v60 = vld [vmem:[#allocation82_spill] sm:$0xff] }
 0x261   :  { %v1449_v41 = vpop.f32.mrf.mxu0  ;;  %v1462_v45 = vpop.f32.mrf.mxu1 }
 0x262   :  { %v1463_v40 = vadd.f32 %v1462_v45, %v1449_v41 }
 0x264   :  { %v1494_v56 = vadd.f32 %v1463_v40, %v5483_v53 }
 0x266   :  { %3919 = vtanh.f32 %v1494_v56 }
 0x269   :  { %v1475_v12 = vpop.f32.mrf.mxu2  ;;  %v1488_v14 = vpop.f32.mrf.mxu3 }
 0x26a   :  { %v1489_v27 = vadd.f32 %v1488_v14, %v1475_v12  ;;  %v1451_v32 = vpop.f32.mrf.mxu0  ;;  %v1464_v4 = vpop.f32.mrf.mxu1 }
 0x26b   :  { %v7203_v4 = vld [vmem:[#allocation83_spill] sm:$0xff] }
 0x26c   :  { %v1495_v16 = vadd.f32 %v1489_v27, %v5486_v42  ;;  %v3920_v17 = vpop.eup %3919 }
 0x26d   :  { %v1507_v3 = vmul.f32 %v3920_v17, %v1498_v54  ;;  %v7204_v54 = vld [vmem:[#allocation84_spill] sm:$0xff]  ;;  %v7206_v17 = vld [vmem:[#allocation86_spill] sm:$0xff] }
 0x26e   :  { %3921 = vtanh.f32 %v1495_v16  ;;  %v7205_v16 = vld [vmem:[#allocation85_spill] sm:$0xff] }
 0x26f   :  { %v5657_v50 = vadd.f32 %v1507_v3, %v1506_v37  ;;  %v7207_v37 = vld [vmem:[#allocation87_spill] sm:$0xff]  ;;  %v7208_v3 = vld [vmem:[#allocation88_spill] sm:$0xff] }
 0x271   :  { %v1477_v41 = vpop.f32.mrf.mxu2  ;;  %v1490_v45 = vpop.f32.mrf.mxu3  ;;  %3923 = vtanh.f32 %v5657_v50 }
 0x272   :  { %v7209_v41 = vld [vmem:[#allocation89_spill] sm:$0xff]  ;;  %v7210_v45 = vld [vmem:[#allocation90_spill] sm:$0xff] }
 0x274   :  { %v3922_v33 = vpop.eup %3921 }
 0x275   :  { %v1504_v40 = vmul.f32 0.5, %v3922_v33  ;;  %v7211_v33 = vld [vmem:[#allocation91_spill] sm:$0xff] }
 0x277   :  { %v1505_v1 = vadd.f32 0.5, %v1504_v40  ;;  %v3924_v56 = vpop.eup %3923  ;;  %v7212_v40 = vld [vmem:[#allocation92_spill] sm:$0xff] }
 0x279   :  { %v1510_v8 = vmul.f32 %v3924_v56, %v1505_v1  ;;  %v7213_v1 = vld [vmem:[#allocation99_spill] sm:$0xff]  ;;  %v7214_v56 = vld [vmem:[#allocation100_spill] sm:$0xff] }
 0x27b   :  { %v1511_v12 = vpack.c.bf16 %v1510_v8, %v1510_v8  ;;  %v7215_v8 = vld [vmem:[#allocation101_spill] sm:$0xff] }
 0x27d   :  { %1512 = vst [vmem:[#allocation5 + $0x4] sm:$0xf] %v1511_v12  ;;  %v7216_v12 = vld [vmem:[#allocation102_spill] sm:$0xff] }
 0x284   :  { %v1534_v0 = vld [vmem:[#allocation5] sm:$0xff] }
 0x285   :  { %v1536_v14 = vunpack.c.l.b16 %v1534_v0  ;;  %v1537_v27 = vunpack.c.h.b16 %v1534_v0  ;;  %v7217_v0 = vld [vmem:[#allocation103_spill] sm:$0xff] }
 0x287   :  { %v5660_v32 = vpack.c.b16 %v1536_v14, %v1536_v14  ;;  %v5662_v58 = vpack.c.b16 %v1537_v27, %v1537_v27  ;;  %v7218_v14 = vld [vmem:[#allocation104_spill] sm:$0xff]  ;;  %v7219_v27 = vld [vmem:[#allocation105_spill] sm:$0xff] }
 0x289   :  { %1550 = vmatmul.bf16.vlgmr.msrb.gmra.mxu0 %v5660_v32  ;;  %1563 = vmatmul.bf16.vlgmr.msra.gmra.mxu1 %v5662_v58 }
 0x28a   :  { %1576 = vmatmul.bf16.vlgmr.msrb.gmra.mxu2 %v5660_v32  ;;  %1589 = vmatmul.bf16.vlgmr.msrb.gmra.mxu3 %v5662_v58 }
 0x28b   :  { %1646 = vmatpush.bf16.msrb.mxu0 %v7106_v2  ;;  %1659 = vmatpush.bf16.msra.mxu1 %v7107_v7 }
 0x28c   :  { %1672 = vmatpush.bf16.msrb.mxu2 %v7108_v51  ;;  %1685 = vmatpush.bf16.msrb.mxu3 %v7109_v55 }
 0x28f   :  { %1647 = vmatpush.bf16.msrb.mxu0 %v7110_v48  ;;  %1660 = vmatpush.bf16.msra.mxu1 %v7202_v60 }
 0x290   :  { %1673 = vmatpush.bf16.msrb.mxu2 %v7203_v4  ;;  %1686 = vmatpush.bf16.msrb.mxu3 %v7204_v54 }
 0x293   :  { %1648 = vmatpush.bf16.msrb.mxu0 %v7205_v16  ;;  %1661 = vmatpush.bf16.msra.mxu1 %v7206_v17 }
 0x294   :  { %1674 = vmatpush.bf16.msrb.mxu2 %v7207_v37  ;;  %1687 = vmatpush.bf16.msrb.mxu3 %v7208_v3 }
 0x297   :  { %1649 = vmatpush.bf16.msrb.mxu0 %v7209_v41  ;;  %1662 = vmatpush.bf16.msra.mxu1 %v7210_v45 }
 0x298   :  { %1675 = vmatpush.bf16.msrb.mxu2 %v7211_v33  ;;  %1688 = vmatpush.bf16.msrb.mxu3 %v7212_v40 }
 0x299   :  { %1602 = vmatmul.bf16.vlgmr.msra.gmra.mxu0 %v5660_v32  ;;  %1615 = vmatmul.bf16.vlgmr.msrb.gmra.mxu1 %v5662_v58 }
 0x29a   :  { %1628 = vmatmul.bf16.vlgmr.msra.gmra.mxu2 %v5660_v32  ;;  %1641 = vmatmul.bf16.vlgmr.msra.gmra.mxu3 %v5662_v58 }
 0x29b   :  { %1650 = vmatpush.bf16.msrb.mxu0 %v7122_v57  ;;  %1663 = vmatpush.bf16.msra.mxu1 %v7123_v15 }
 0x29c   :  { %1676 = vmatpush.bf16.msrb.mxu2 %v7124_v9  ;;  %1689 = vmatpush.bf16.msrb.mxu3 %v7125_v13  ;;  %v7220_v9 = vld [vmem:[#allocation106_spill] sm:$0xff]  ;;  %v7221_v13 = vld [vmem:[#allocation107_spill] sm:$0xff] }
 0x29f   :  { %1651 = vmatpush.bf16.msrb.mxu0 %v7126_v31  ;;  %1664 = vmatpush.bf16.msra.mxu1 %v7127_v24  ;;  %v7222_v31 = vld [vmem:[#allocation108_spill] sm:$0xff]  ;;  %v7223_v24 = vld [vmem:[#allocation109_spill] sm:$0xff] }
 0x2a0   :  { %1677 = vmatpush.bf16.msrb.mxu2 %v7213_v1  ;;  %1690 = vmatpush.bf16.msrb.mxu3 %v7214_v56  ;;  %v7224_v1 = vld [vmem:[#allocation110_spill] sm:$0xff]  ;;  %v7225_v56 = vld [vmem:[#allocation111_spill] sm:$0xff] }
 0x2a3   :  { %1652 = vmatpush.bf16.msrb.mxu0 %v7215_v8  ;;  %1665 = vmatpush.bf16.msra.mxu1 %v7216_v12  ;;  %v7226_v8 = vld [vmem:[#allocation112_spill] sm:$0xff] }
 0x2a4   :  { %1678 = vmatpush.bf16.msrb.mxu2 %v7217_v0  ;;  %1691 = vmatpush.bf16.msrb.mxu3 %v7218_v14  ;;  %v7235_v14 = vld [vmem:[#allocation121_spill] sm:$0xff] }
 0x2a7   :  { %1653 = vmatpush.bf16.msrb.mxu0 %v7219_v27  ;;  %1666 = vmatpush.bf16.msra.mxu1 %v7220_v9  ;;  %v7227_v9 = vld [vmem:[#allocation113_spill] sm:$0xff]  ;;  %v7234_v27 = vld [vmem:[#allocation120_spill] sm:$0xff] }
 0x2a8   :  { %1679 = vmatpush.bf16.msrb.mxu2 %v7221_v13  ;;  %1692 = vmatpush.bf16.msrb.mxu3 %v7222_v31  ;;  %v7228_v13 = vld [vmem:[#allocation114_spill] sm:$0xff]  ;;  %v7229_v31 = vld [vmem:[#allocation115_spill] sm:$0xff] }
 0x2aa   :  { %1654 = vmatmul.bf16.vlgmr.msrb.gmra.mxu0 %v5660_v32  ;;  %1667 = vmatmul.bf16.vlgmr.msra.gmra.mxu1 %v5662_v58 }
 0x2ab   :  { %1698 = vmatpush.bf16.msra.mxu0 %v7223_v24  ;;  %1711 = vmatpush.bf16.msrb.mxu1 %v7224_v1  ;;  %v7230_v24 = vld [vmem:[#allocation116_spill] sm:$0xff]  ;;  %v7231_v1 = vld [vmem:[#allocation117_spill] sm:$0xff] }
 0x2ac   :  { %1724 = vmatpush.bf16.msra.mxu2 %v7225_v56  ;;  %1737 = vmatpush.bf16.msra.mxu3 %v7226_v8  ;;  %v7232_v56 = vld [vmem:[#allocation118_spill] sm:$0xff]  ;;  %v7233_v8 = vld [vmem:[#allocation119_spill] sm:$0xff] }
 0x2ad   :  { %1680 = vmatmul.bf16.vlgmr.msrb.gmra.mxu2 %v5660_v32  ;;  %1693 = vmatmul.bf16.vlgmr.msrb.gmra.mxu3 %v5662_v58 }
 0x2af   :  { %1699 = vmatpush.bf16.msra.mxu0 %v7227_v9  ;;  %1712 = vmatpush.bf16.msrb.mxu1 %v7228_v13 }
 0x2b0   :  { %1725 = vmatpush.bf16.msra.mxu2 %v7229_v31  ;;  %1738 = vmatpush.bf16.msra.mxu3 %v7230_v24 }
 0x2b3   :  { %1700 = vmatpush.bf16.msra.mxu0 %v7231_v1  ;;  %1713 = vmatpush.bf16.msrb.mxu1 %v7232_v56 }
 0x2b4   :  { %1726 = vmatpush.bf16.msra.mxu2 %v7233_v8  ;;  %1739 = vmatpush.bf16.msra.mxu3 %v7234_v27 }
 0x2b7   :  { %1701 = vmatpush.bf16.msra.mxu0 %v7235_v14  ;;  %1714 = vmatpush.bf16.msrb.mxu1 %v7145_v22 }
 0x2b8   :  { %1727 = vmatpush.bf16.msra.mxu2 %v7146_v39  ;;  %1740 = vmatpush.bf16.msra.mxu3 %v7147_v30 }
 0x2bb   :  { %1702 = vmatpush.bf16.msra.mxu0 %v7148_v34  ;;  %1715 = vmatpush.bf16.msrb.mxu1 %v7149_v46 }
 0x2bc   :  { %1728 = vmatpush.bf16.msra.mxu2 %v7150_v47  ;;  %1741 = vmatpush.bf16.msra.mxu3 %v7151_v62 }
 0x2bf   :  { %1703 = vmatpush.bf16.msra.mxu0 %v7152_v10  ;;  %1716 = vmatpush.bf16.msrb.mxu1 %v7153_v11 }
 0x2c0   :  { %1729 = vmatpush.bf16.msra.mxu2 %v7154_v18  ;;  %1742 = vmatpush.bf16.msra.mxu3 %v7155_v38 }
 0x2c3   :  { %1704 = vmatpush.bf16.msra.mxu0 %v5292_v20  ;;  %1717 = vmatpush.bf16.msrb.mxu1 %v5294_v19 }
 0x2c4   :  { %1730 = vmatpush.bf16.msra.mxu2 %v5304_v52  ;;  %1743 = vmatpush.bf16.msra.mxu3 %v5306_v63  ;;  %v7296_v52 = vld [vmem:[#allocation151_spill] sm:$0xff] }
 0x2c7   :  { %1705 = vmatpush.bf16.msra.mxu0 %v5328_v59  ;;  %1718 = vmatpush.bf16.msrb.mxu1 %v5330_v44  ;;  %v7240_v44 = vld [vmem:[#allocation15_spill] sm:$0xff]  ;;  %v7241_v59 = vld [vmem:[#allocation16_spill] sm:$0xff] }
 0x2c8   :  { %1731 = vmatpush.bf16.msra.mxu2 %v5334_v28  ;;  %1744 = vmatpush.bf16.msra.mxu3 %v5336_v6  ;;  %v7236_v28 = vld [vmem:[#allocation11_spill] sm:$0xff]  ;;  %v7237_v6 = vld [vmem:[#allocation12_spill] sm:$0xff] }
 0x2ca   :  { %1706 = vmatmul.bf16.vlgmr.msra.gmra.mxu0 %v5660_v32  ;;  %1719 = vmatmul.bf16.vlgmr.msrb.gmra.mxu1 %v5662_v58 }
 0x2cb   :  { %1800 = vmatpush.bf16.msrb.mxu0 %v4123_v21  ;;  %1813 = vmatpush.bf16.msra.mxu1 %v4137_v25  ;;  %v7238_v21 = vld [vmem:[#allocation13_spill] sm:$0xff]  ;;  %v7239_v25 = vld [vmem:[#allocation14_spill] sm:$0xff] }
 0x2cc   :  { %1732 = vmatmul.bf16.vlgmr.msra.gmra.mxu2 %v5660_v32  ;;  %1745 = vmatmul.bf16.vlgmr.msra.gmra.mxu3 %v5662_v58  ;;  %v7242_v32 = vld [vmem:[#allocation17_spill] sm:$0xff]  ;;  %v7243_v58 = vld [vmem:[#allocation18_spill] sm:$0xff] }
 0x2cd   :  { %1826 = vmatpush.bf16.msrb.mxu2 %v4139_v26  ;;  %1839 = vmatpush.bf16.msrb.mxu3 %v4148_v29  ;;  %v7244_v26 = vld [vmem:[#allocation19_spill] sm:$0xff]  ;;  %v7245_v29 = vld [vmem:[#allocation20_spill] sm:$0xff] }
 0x2cf   :  { %1801 = vmatpush.bf16.msrb.mxu0 %v4173_v36  ;;  %1814 = vmatpush.bf16.msra.mxu1 %v7236_v28  ;;  %v7246_v36 = vld [vmem:[#allocation21_spill] sm:$0xff]  ;;  %v7247_v28 = vld [vmem:[#allocation22_spill] sm:$0xff] }
 0x2d1   :  { %1827 = vmatpush.bf16.msrb.mxu2 %v7237_v6  ;;  %1840 = vmatpush.bf16.msrb.mxu3 %v7238_v21  ;;  %v7248_v6 = vld [vmem:[#allocation23_spill] sm:$0xff]  ;;  %v7249_v21 = vld [vmem:[#allocation24_spill] sm:$0xff] }
 0x2d3   :  { %1802 = vmatpush.bf16.msrb.mxu0 %v7239_v25  ;;  %1815 = vmatpush.bf16.msra.mxu1 %v7240_v44  ;;  %v7250_v25 = vld [vmem:[#allocation25_spill] sm:$0xff]  ;;  %v7251_v44 = vld [vmem:[#allocation26_spill] sm:$0xff] }
 0x2d5   :  { %1828 = vmatpush.bf16.msrb.mxu2 %v7241_v59  ;;  %1841 = vmatpush.bf16.msrb.mxu3 %v7242_v32  ;;  %v7252_v59 = vld [vmem:[#allocation27_spill] sm:$0xff]  ;;  %v7253_v32 = vld [vmem:[#allocation28_spill] sm:$0xff] }
 0x2d7   :  { %1803 = vmatpush.bf16.msrb.mxu0 %v7243_v58  ;;  %1816 = vmatpush.bf16.msra.mxu1 %v7244_v26  ;;  %v7254_v58 = vld [vmem:[#allocation29_spill] sm:$0xff]  ;;  %v7255_v26 = vld [vmem:[#allocation30_spill] sm:$0xff] }
 0x2d9   :  { %1829 = vmatpush.bf16.msrb.mxu2 %v7245_v29  ;;  %1842 = vmatpush.bf16.msrb.mxu3 %v7246_v36  ;;  %v7256_v29 = vld [vmem:[#allocation31_spill] sm:$0xff]  ;;  %v7257_v36 = vld [vmem:[#allocation32_spill] sm:$0xff] }
 0x2db   :  { %1804 = vmatpush.bf16.msrb.mxu0 %v7247_v28  ;;  %1817 = vmatpush.bf16.msra.mxu1 %v7248_v6  ;;  %v7258_v28 = vld [vmem:[#allocation33_spill] sm:$0xff]  ;;  %v7259_v6 = vld [vmem:[#allocation34_spill] sm:$0xff] }
 0x2dd   :  { %1830 = vmatpush.bf16.msrb.mxu2 %v7249_v21  ;;  %1843 = vmatpush.bf16.msrb.mxu3 %v7250_v25  ;;  %v7260_v21 = vld [vmem:[#allocation35_spill] sm:$0xff]  ;;  %v7261_v25 = vld [vmem:[#allocation38_spill] sm:$0xff] }
 0x2df   :  { %1805 = vmatpush.bf16.msrb.mxu0 %v7251_v44  ;;  %1818 = vmatpush.bf16.msra.mxu1 %v7252_v59  ;;  %v7262_v44 = vld [vmem:[#allocation39_spill] sm:$0xff]  ;;  %v7263_v59 = vld [vmem:[#allocation36_spill] sm:$0xff] }
 0x2e1   :  { %1831 = vmatpush.bf16.msrb.mxu2 %v7253_v32  ;;  %1844 = vmatpush.bf16.msrb.mxu3 %v7254_v58  ;;  %v7264_v32 = vld [vmem:[#allocation37_spill] sm:$0xff]  ;;  %v7265_v58 = vld [vmem:[#allocation40_spill] sm:$0xff] }
 0x2e3   :  { %1806 = vmatpush.bf16.msrb.mxu0 %v7255_v26  ;;  %1819 = vmatpush.bf16.msra.mxu1 %v7256_v29  ;;  %v7266_v26 = vld [vmem:[#allocation41_spill] sm:$0xff]  ;;  %v7267_v29 = vld [vmem:[#allocation42_spill] sm:$0xff] }
 0x2e5   :  { %1832 = vmatpush.bf16.msrb.mxu2 %v7257_v36  ;;  %1845 = vmatpush.bf16.msrb.mxu3 %v7258_v28  ;;  %v7268_v36 = vld [vmem:[#allocation43_spill] sm:$0xff]  ;;  %v7269_v28 = vld [vmem:[#allocation45_spill] sm:$0xff] }
 0x2e7   :  { %1807 = vmatpush.bf16.msrb.mxu0 %v7259_v6  ;;  %1820 = vmatpush.bf16.msra.mxu1 %v7260_v21  ;;  %v7270_v6 = vld [vmem:[#allocation46_spill] sm:$0xff]  ;;  %v7271_v21 = vld [vmem:[#allocation47_spill] sm:$0xff] }
 0x2e9   :  { %1833 = vmatpush.bf16.msrb.mxu2 %v7263_v59  ;;  %1846 = vmatpush.bf16.msrb.mxu3 %v7264_v32  ;;  %v7274_v59 = vld [vmem:[#allocation51_spill] sm:$0xff]  ;;  %v7275_v32 = vld [vmem:[#allocation52_spill] sm:$0xff] }
 0x2eb   :  { %1852 = vmatpush.bf16.msra.mxu0 %v7261_v25  ;;  %1865 = vmatpush.bf16.msrb.mxu1 %v7262_v44  ;;  %v7272_v25 = vld [vmem:[#allocation48_spill] sm:$0xff]  ;;  %v7273_v44 = vld [vmem:[#allocation50_spill] sm:$0xff] }
 0x2ed   :  { %1878 = vmatpush.bf16.msra.mxu2 %v7265_v58  ;;  %1891 = vmatpush.bf16.msra.mxu3 %v7266_v26  ;;  %v7276_v58 = vld [vmem:[#allocation53_spill] sm:$0xff]  ;;  %v7277_v26 = vld [vmem:[#allocation54_spill] sm:$0xff] }
 0x2ef   :  { %1853 = vmatpush.bf16.msra.mxu0 %v7267_v29  ;;  %1866 = vmatpush.bf16.msrb.mxu1 %v7268_v36  ;;  %v7278_v29 = vld [vmem:[#allocation56_spill] sm:$0xff]  ;;  %v7279_v36 = vld [vmem:[#allocation58_spill] sm:$0xff] }
 0x2f1   :  { %1879 = vmatpush.bf16.msra.mxu2 %v7269_v28  ;;  %1892 = vmatpush.bf16.msra.mxu3 %v7270_v6  ;;  %v7280_v28 = vld [vmem:[#allocation59_spill] sm:$0xff]  ;;  %v7281_v6 = vld [vmem:[#allocation61_spill] sm:$0xff] }
 0x2f3   :  { %1854 = vmatpush.bf16.msra.mxu0 %v7271_v21  ;;  %1867 = vmatpush.bf16.msrb.mxu1 %v7272_v25  ;;  %v7282_v21 = vld [vmem:[#allocation62_spill] sm:$0xff]  ;;  %v7283_v25 = vld [vmem:[#allocation63_spill] sm:$0xff] }
 0x2f5   :  { %1880 = vmatpush.bf16.msra.mxu2 %v7273_v44  ;;  %1893 = vmatpush.bf16.msra.mxu3 %v7274_v59  ;;  %v7284_v44 = vld [vmem:[#allocation64_spill] sm:$0xff]  ;;  %v7285_v59 = vld [vmem:[#allocation65_spill] sm:$0xff] }
 0x2f7   :  { %1855 = vmatpush.bf16.msra.mxu0 %v7275_v32  ;;  %1868 = vmatpush.bf16.msrb.mxu1 %v7276_v58  ;;  %v7286_v32 = vld [vmem:[#allocation67_spill] sm:$0xff]  ;;  %v7287_v58 = vld [vmem:[#allocation68_spill] sm:$0xff] }
 0x2f9   :  { %1881 = vmatpush.bf16.msra.mxu2 %v7277_v26  ;;  %1894 = vmatpush.bf16.msra.mxu3 %v7278_v29  ;;  %v7288_v26 = vld [vmem:[#allocation69_spill] sm:$0xff]  ;;  %v7289_v29 = vld [vmem:[#allocation70_spill] sm:$0xff] }
 0x2fb   :  { %1856 = vmatpush.bf16.msra.mxu0 %v7279_v36  ;;  %1869 = vmatpush.bf16.msrb.mxu1 %v7280_v28  ;;  %v7290_v36 = vld [vmem:[#allocation71_spill] sm:$0xff]  ;;  %v7291_v28 = vld [vmem:[#allocation72_spill] sm:$0xff] }
 0x2fd   :  { %1882 = vmatpush.bf16.msra.mxu2 %v7281_v6  ;;  %1895 = vmatpush.bf16.msra.mxu3 %v7282_v21  ;;  %v7292_v6 = vld [vmem:[#allocation73_spill] sm:$0xff]  ;;  %v7293_v21 = vld [vmem:[#allocation74_spill] sm:$0xff] }
 0x2ff   :  { %1857 = vmatpush.bf16.msra.mxu0 %v7283_v25  ;;  %1870 = vmatpush.bf16.msrb.mxu1 %v7284_v44  ;;  %v7294_v25 = vld [vmem:[#allocation75_spill] sm:$0xff] }
 0x301   :  { %1883 = vmatpush.bf16.msra.mxu2 %v7285_v59  ;;  %1896 = vmatpush.bf16.msra.mxu3 %v7286_v32  ;;  %v7295_v32 = vld [vmem:[#allocation49_spill] sm:$0xff] }
 0x303   :  { %1858 = vmatpush.bf16.msra.mxu0 %v7287_v58  ;;  %1871 = vmatpush.bf16.msrb.mxu1 %v7288_v26  ;;  %v114_v58 = vadd.f32 %v7296_v52, %v7295_v32 }
 0x305   :  { %1884 = vmatpush.bf16.msra.mxu2 %v7289_v29  ;;  %1897 = vmatpush.bf16.msra.mxu3 %v7290_v36  ;;  %v7297_v29 = vld [vmem:[#allocation144_spill] sm:$0xff] }
 0x306   :  { %v1551_v44 = vpop.f32.mrf.mxu0  ;;  %v1564_v59 = vpop.f32.mrf.mxu1  ;;  %v143_v20 = vadd.f32 %v7297_v29, %v7100_v5 }
 0x307   :  { %1859 = vmatpush.bf16.msra.mxu0 %v7291_v28  ;;  %1872 = vmatpush.bf16.msrb.mxu1 %v7292_v6  ;;  %v1565_v63 = vadd.f32 %v1564_v59, %v1551_v44  ;;  %v7298_v59 = vld [vmem:[#allocation145_spill] sm:$0xff] }
 0x308   :  { %v172_v44 = vadd.f32 %v7298_v59, %v7101_v35 }
 0x309   :  { %1885 = vmatpush.bf16.msra.mxu2 %v7293_v21  ;;  %1898 = vmatpush.bf16.msra.mxu3 %v7294_v25  ;;  %v1771_v18 = vadd.f32 %v1565_v63, %v114_v58 }
 0x30d   :  { %v1577_v19 = vpop.f32.mrf.mxu2  ;;  %v1590_v26 = vpop.f32.mrf.mxu3 }
 0x30e   :  { %v1591_v36 = vadd.f32 %v1590_v26, %v1577_v19  ;;  %v1553_v38 = vpop.f32.mrf.mxu0  ;;  %v1566_v28 = vpop.f32.mrf.mxu1 }
 0x310   :  { %v1772_v6 = vadd.f32 %v1591_v36, %v143_v20  ;;  %v7299_v36 = vld [vmem:[#allocation146_spill] sm:$0xff] }
 0x312   :  { %3925 = vtanh.f32 %v1772_v6  ;;  %v201_v6 = vadd.f32 %v7299_v36, %v7102_v23 }
 0x313   :  { %3927 = vtanh.f32 %v1771_v18 }
 0x315   :  { %v1579_v21 = vpop.f32.mrf.mxu2  ;;  %v1592_v25 = vpop.f32.mrf.mxu3 }
 0x316   :  { %v1603_v11 = vpop.f32.mrf.mxu0  ;;  %v1616_v10 = vpop.f32.mrf.mxu1 }
 0x317   :  { %v1617_v52 = vadd.f32 %v1616_v10, %v1603_v11 }
 0x318   :  { %v3926_v32 = vpop.eup %3925 }
 0x319   :  { %v3928_v62 = vpop.eup %3927  ;;  %v1773_v47 = vadd.f32 %v1617_v52, %v172_v44  ;;  %v1779_v46 = vmul.f32 0.5, %v3926_v32 }
 0x31a   :  { %v1776_v26 = vmul.f32 0.5, %v3928_v62 }
 0x31b   :  { %3929 = vtanh.f32 %v1773_v47  ;;  %v1780_v18 = vadd.f32 0.5, %v1779_v46 }
 0x31c   :  { %v1777_v63 = vadd.f32 0.5, %v1776_v26 }
 0x31d   :  { %v1629_v29 = vpop.f32.mrf.mxu2  ;;  %v1642_v38 = vpop.f32.mrf.mxu3  ;;  %v1785_v11 = vmul.f32 %v1780_v18, %v5649_v61 }
 0x31e   :  { %v1643_v21 = vadd.f32 %v1642_v38, %v1629_v29  ;;  %v1605_v25 = vpop.f32.mrf.mxu0  ;;  %v1618_v28 = vpop.f32.mrf.mxu1 }
 0x320   :  { %v1774_v20 = vadd.f32 %v1643_v21, %v201_v6 }
 0x321   :  { %v3930_v19 = vpop.eup %3929 }
 0x322   :  { %v1786_v10 = vmul.f32 %v3930_v19, %v1777_v63  ;;  %3931 = vtanh.f32 %v1774_v20 }
 0x324   :  { %v5817_v58 = vadd.f32 %v1786_v10, %v1785_v11 }
 0x325   :  { %v1631_v47 = vpop.f32.mrf.mxu2  ;;  %v1644_v62 = vpop.f32.mrf.mxu3 }
 0x326   :  { %3933 = vtanh.f32 %v5817_v58 }
 0x327   :  { %v1655_v59 = vpop.f32.mrf.mxu0  ;;  %v1668_v44 = vpop.f32.mrf.mxu1 }
 0x328   :  { %v3932_v32 = vpop.eup %3931  ;;  %v1669_v63 = vadd.f32 %v1668_v44, %v1655_v59 }
 0x329   :  { %v1783_v46 = vmul.f32 0.5, %v3932_v32 }
 0x32a   :  { %v1750_v19 = vadd.f32 %v1669_v63, %v7201_v49 }
 0x32b   :  { %v1784_v52 = vadd.f32 0.5, %v1783_v46 }
 0x32c   :  { %v3934_v29 = vpop.eup %3933 }
 0x32d   :  { %v1789_v38 = vmul.f32 %v3934_v29, %v1784_v52 }
 0x32f   :  { %v1790_v26 = vpack.c.bf16 %v1789_v38, %v1789_v38  ;;  %v1657_v21 = vpop.f32.mrf.mxu0  ;;  %v1670_v61 = vpop.f32.mrf.mxu1 }
 0x330   :  { %v1681_v36 = vpop.f32.mrf.mxu2  ;;  %v1694_v6 = vpop.f32.mrf.mxu3 }
 0x331   :  { %1791 = vst [vmem:[#allocation5] sm:$0xf] %v1790_v26  ;;  %v1695_v28 = vadd.f32 %v1694_v6, %v1681_v36 }
 0x333   :  { %v1751_v20 = vadd.f32 %v1695_v28, %v7200_v43 }
 0x335   :  { %3935 = vtanh.f32 %v1751_v20 }
 0x336   :  { %3937 = vtanh.f32 %v1750_v19 }
 0x338   :  { %v1683_v18 = vpop.f32.mrf.mxu2  ;;  %v1696_v25 = vpop.f32.mrf.mxu3 }
 0x33b   :  { %v3936_v47 = vpop.eup %3935 }
 0x33c   :  { %v3938_v32 = vpop.eup %3937  ;;  %v1758_v52 = vmul.f32 0.5, %v3936_v47 }
 0x33d   :  { %v1755_v29 = vmul.f32 0.5, %v3938_v32 }
 0x33e   :  { %v1759_v36 = vadd.f32 0.5, %v1758_v52 }
 0x33f   :  { %v1756_v21 = vadd.f32 0.5, %v1755_v29 }
 0x340   :  { %v1764_v25 = vmul.f32 %v1759_v36, %v5657_v50  ;;  %v7300_v36 = vld [vmem:[#allocation95_spill] sm:$0xff] }
 0x347   :  { %v1707_v11 = vpop.f32.mrf.mxu0  ;;  %v1720_v10 = vpop.f32.mrf.mxu1 }
 0x348   :  { %v1721_v62 = vadd.f32 %v1720_v10, %v1707_v11 }
 0x34a   :  { %v1752_v46 = vadd.f32 %v1721_v62, %v5483_v53 }
 0x34c   :  { %3939 = vtanh.f32 %v1752_v46 }
 0x34f   :  { %v1733_v38 = vpop.f32.mrf.mxu2  ;;  %v1746_v26 = vpop.f32.mrf.mxu3 }
 0x350   :  { %v1747_v59 = vadd.f32 %v1746_v26, %v1733_v38  ;;  %v1709_v44 = vpop.f32.mrf.mxu0  ;;  %v1722_v6 = vpop.f32.mrf.mxu1 }
 0x351   :  { %v7302_v44 = vld [vmem:[#allocation97_spill] sm:$0xff]  ;;  %v7303_v6 = vld [vmem:[#allocation98_spill] sm:$0xff] }
 0x352   :  { %v1753_v61 = vadd.f32 %v1747_v59, %v5486_v42  ;;  %v3940_v18 = vpop.eup %3939  ;;  %v7301_v59 = vld [vmem:[#allocation96_spill] sm:$0xff] }
 0x353   :  { %v1765_v28 = vmul.f32 %v3940_v18, %v1756_v21  ;;  %v7304_v21 = vld [vmem:[#allocation99_spill] sm:$0xff]  ;;  %v7306_v18 = vld [vmem:[#allocation101_spill] sm:$0xff] }
 0x354   :  { %3941 = vtanh.f32 %v1753_v61  ;;  %v7305_v61 = vld [vmem:[#allocation100_spill] sm:$0xff] }
 0x355   :  { %v5825_v63 = vadd.f32 %v1765_v28, %v1764_v25  ;;  %v7307_v25 = vld [vmem:[#allocation104_spill] sm:$0xff]  ;;  %v7308_v28 = vld [vmem:[#allocation105_spill] sm:$0xff] }
 0x357   :  { %v1735_v20 = vpop.f32.mrf.mxu2  ;;  %v1748_v19 = vpop.f32.mrf.mxu3  ;;  %3943 = vtanh.f32 %v5825_v63 }
 0x358   :  { %v7309_v20 = vld [vmem:[#allocation106_spill] sm:$0xff]  ;;  %v7310_v19 = vld [vmem:[#allocation107_spill] sm:$0xff] }
 0x35a   :  { %v3942_v11 = vpop.eup %3941 }
 0x35b   :  { %v1762_v10 = vmul.f32 0.5, %v3942_v11  ;;  %v7311_v11 = vld [vmem:[#allocation108_spill] sm:$0xff] }
 0x35d   :  { %v1763_v47 = vadd.f32 0.5, %v1762_v10  ;;  %v3944_v62 = vpop.eup %3943  ;;  %v7312_v10 = vld [vmem:[#allocation109_spill] sm:$0xff] }
 0x35f   :  { %v1768_v32 = vmul.f32 %v3944_v62, %v1763_v47  ;;  %v7313_v47 = vld [vmem:[#allocation110_spill] sm:$0xff]  ;;  %v7314_v62 = vld [vmem:[#allocation111_spill] sm:$0xff] }
 0x361   :  { %v1769_v46 = vpack.c.bf16 %v1768_v32, %v1768_v32  ;;  %v7315_v32 = vld [vmem:[#allocation112_spill] sm:$0xff] }
 0x363   :  { %1770 = vst [vmem:[#allocation5 + $0x4] sm:$0xf] %v1769_v46  ;;  %v7316_v46 = vld [vmem:[#allocation126_spill] sm:$0xff] }
 0x36a   :  { %v1792_v52 = vld [vmem:[#allocation5] sm:$0xff] }
 0x36b   :  { %v1794_v29 = vunpack.c.l.b16 %v1792_v52  ;;  %v1795_v38 = vunpack.c.h.b16 %v1792_v52  ;;  %v7317_v52 = vld [vmem:[#allocation127_spill] sm:$0xff] }
 0x36d   :  { %v5828_v26 = vpack.c.b16 %v1794_v29, %v1794_v29  ;;  %v5830_v50 = vpack.c.b16 %v1795_v38, %v1795_v38  ;;  %v7318_v29 = vld [vmem:[#allocation128_spill] sm:$0xff]  ;;  %v7319_v38 = vld [vmem:[#allocation129_spill] sm:$0xff] }
 0x36f   :  { %1808 = vmatmul.bf16.vlgmr.msrb.gmra.mxu0 %v5828_v26  ;;  %1821 = vmatmul.bf16.vlgmr.msra.gmra.mxu1 %v5830_v50 }
 0x370   :  { %1834 = vmatmul.bf16.vlgmr.msrb.gmra.mxu2 %v5828_v26  ;;  %1847 = vmatmul.bf16.vlgmr.msrb.gmra.mxu3 %v5830_v50 }
 0x371   :  { %1904 = vmatpush.bf16.msrb.mxu0 %v7106_v2  ;;  %1917 = vmatpush.bf16.msra.mxu1 %v7107_v7 }
 0x372   :  { %1930 = vmatpush.bf16.msrb.mxu2 %v7108_v51  ;;  %1943 = vmatpush.bf16.msrb.mxu3 %v7109_v55 }
 0x375   :  { %1905 = vmatpush.bf16.msrb.mxu0 %v7110_v48  ;;  %1918 = vmatpush.bf16.msra.mxu1 %v7202_v60 }
 0x376   :  { %1931 = vmatpush.bf16.msrb.mxu2 %v7203_v4  ;;  %1944 = vmatpush.bf16.msrb.mxu3 %v7204_v54 }
 0x379   :  { %1906 = vmatpush.bf16.msrb.mxu0 %v7205_v16  ;;  %1919 = vmatpush.bf16.msra.mxu1 %v7206_v17 }
 0x37a   :  { %1932 = vmatpush.bf16.msrb.mxu2 %v7207_v37  ;;  %1945 = vmatpush.bf16.msrb.mxu3 %v7208_v3 }
 0x37d   :  { %1907 = vmatpush.bf16.msrb.mxu0 %v7209_v41  ;;  %1920 = vmatpush.bf16.msra.mxu1 %v7210_v45 }
 0x37e   :  { %1933 = vmatpush.bf16.msrb.mxu2 %v7211_v33  ;;  %1946 = vmatpush.bf16.msrb.mxu3 %v7212_v40 }
 0x37f   :  { %1860 = vmatmul.bf16.vlgmr.msra.gmra.mxu0 %v5828_v26  ;;  %1873 = vmatmul.bf16.vlgmr.msrb.gmra.mxu1 %v5830_v50 }
 0x380   :  { %1886 = vmatmul.bf16.vlgmr.msra.gmra.mxu2 %v5828_v26  ;;  %1899 = vmatmul.bf16.vlgmr.msra.gmra.mxu3 %v5830_v50 }
 0x381   :  { %1908 = vmatpush.bf16.msrb.mxu0 %v7122_v57  ;;  %1921 = vmatpush.bf16.msra.mxu1 %v7123_v15 }
 0x382   :  { %1934 = vmatpush.bf16.msrb.mxu2 %v7300_v36  ;;  %1947 = vmatpush.bf16.msrb.mxu3 %v7301_v59 }
 0x385   :  { %1909 = vmatpush.bf16.msrb.mxu0 %v7302_v44  ;;  %1922 = vmatpush.bf16.msra.mxu1 %v7303_v6 }
 0x386   :  { %1935 = vmatpush.bf16.msrb.mxu2 %v7304_v21  ;;  %1948 = vmatpush.bf16.msrb.mxu3 %v7305_v61 }
 0x389   :  { %1910 = vmatpush.bf16.msrb.mxu0 %v7306_v18  ;;  %1923 = vmatpush.bf16.msra.mxu1 %v7216_v12 }
 0x38a   :  { %1936 = vmatpush.bf16.msrb.mxu2 %v7217_v0  ;;  %1949 = vmatpush.bf16.msrb.mxu3 %v7307_v25 }
 0x38d   :  { %1911 = vmatpush.bf16.msrb.mxu0 %v7308_v28  ;;  %1924 = vmatpush.bf16.msra.mxu1 %v7309_v20 }
 0x38e   :  { %1937 = vmatpush.bf16.msrb.mxu2 %v7310_v19  ;;  %1950 = vmatpush.bf16.msrb.mxu3 %v7311_v11 }
 0x390   :  { %1912 = vmatmul.bf16.vlgmr.msrb.gmra.mxu0 %v5828_v26  ;;  %1925 = vmatmul.bf16.vlgmr.msra.gmra.mxu1 %v5830_v50 }
 0x391   :  { %1956 = vmatpush.bf16.msra.mxu0 %v7312_v10  ;;  %1969 = vmatpush.bf16.msrb.mxu1 %v7313_v47 }
 0x392   :  { %1982 = vmatpush.bf16.msra.mxu2 %v7314_v62  ;;  %1995 = vmatpush.bf16.msra.mxu3 %v7315_v32 }
 0x393   :  { %1938 = vmatmul.bf16.vlgmr.msrb.gmra.mxu2 %v5828_v26  ;;  %1951 = vmatmul.bf16.vlgmr.msrb.gmra.mxu3 %v5830_v50 }
 0x395   :  { %1957 = vmatpush.bf16.msra.mxu0 %v7227_v9  ;;  %1970 = vmatpush.bf16.msrb.mxu1 %v7228_v13 }
 0x396   :  { %1983 = vmatpush.bf16.msra.mxu2 %v7229_v31  ;;  %1996 = vmatpush.bf16.msra.mxu3 %v7230_v24 }
 0x399   :  { %1958 = vmatpush.bf16.msra.mxu0 %v7231_v1  ;;  %1971 = vmatpush.bf16.msrb.mxu1 %v7232_v56 }
 0x39a   :  { %1984 = vmatpush.bf16.msra.mxu2 %v7233_v8  ;;  %1997 = vmatpush.bf16.msra.mxu3 %v7234_v27  ;;  %v7320_v8 = vld [vmem:[#allocation130_spill] sm:$0xff]  ;;  %v7321_v27 = vld [vmem:[#allocation131_spill] sm:$0xff] }
 0x39d   :  { %1959 = vmatpush.bf16.msra.mxu0 %v7235_v14  ;;  %1972 = vmatpush.bf16.msrb.mxu1 %v7145_v22  ;;  %v7322_v14 = vld [vmem:[#allocation132_spill] sm:$0xff]  ;;  %v7323_v22 = vld [vmem:[#allocation133_spill] sm:$0xff] }
 0x39e   :  { %1985 = vmatpush.bf16.msra.mxu2 %v7146_v39  ;;  %1998 = vmatpush.bf16.msra.mxu3 %v7147_v30  ;;  %v7324_v39 = vld [vmem:[#allocation134_spill] sm:$0xff]  ;;  %v7325_v30 = vld [vmem:[#allocation135_spill] sm:$0xff] }
 0x3a1   :  { %1960 = vmatpush.bf16.msra.mxu0 %v7148_v34  ;;  %1973 = vmatpush.bf16.msrb.mxu1 %v7316_v46  ;;  %v7326_v34 = vld [vmem:[#allocation136_spill] sm:$0xff]  ;;  %v7327_v46 = vld [vmem:[#allocation137_spill] sm:$0xff] }
 0x3a2   :  { %1986 = vmatpush.bf16.msra.mxu2 %v7317_v52  ;;  %1999 = vmatpush.bf16.msra.mxu3 %v7318_v29  ;;  %v7328_v52 = vld [vmem:[#allocation138_spill] sm:$0xff]  ;;  %v7329_v29 = vld [vmem:[#allocation139_spill] sm:$0xff] }
 0x3a5   :  { %1961 = vmatpush.bf16.msra.mxu0 %v7319_v38  ;;  %1974 = vmatpush.bf16.msrb.mxu1 %v7320_v8  ;;  %v7330_v38 = vld [vmem:[#allocation140_spill] sm:$0xff]  ;;  %v7331_v8 = vld [vmem:[#allocation6_spill] sm:$0xff] }
 0x3a6   :  { %1987 = vmatpush.bf16.msra.mxu2 %v7321_v27  ;;  %2000 = vmatpush.bf16.msra.mxu3 %v7322_v14  ;;  %v7332_v27 = vld [vmem:[#allocation7_spill] sm:$0xff] }
 0x3a7   :  { %v7396_v14 = vld [vmem:[#allocation155_spill] sm:$0xff] }
 0x3a9   :  { %1962 = vmatpush.bf16.msra.mxu0 %v7323_v22  ;;  %1975 = vmatpush.bf16.msrb.mxu1 %v7324_v39  ;;  %v7341_v39 = vld [vmem:[#allocation16_spill] sm:$0xff] }
 0x3aa   :  { %1988 = vmatpush.bf16.msra.mxu2 %v7325_v30  ;;  %2001 = vmatpush.bf16.msra.mxu3 %v7326_v34  ;;  %v7333_v34 = vld [vmem:[#allocation8_spill] sm:$0xff]  ;;  %v7340_v30 = vld [vmem:[#allocation15_spill] sm:$0xff] }
 0x3ad   :  { %1963 = vmatpush.bf16.msra.mxu0 %v7327_v46  ;;  %1976 = vmatpush.bf16.msrb.mxu1 %v7328_v52  ;;  %v7334_v46 = vld [vmem:[#allocation9_spill] sm:$0xff]  ;;  %v7335_v52 = vld [vmem:[#allocation10_spill] sm:$0xff] }
 0x3ae   :  { %1989 = vmatpush.bf16.msra.mxu2 %v7329_v29  ;;  %2002 = vmatpush.bf16.msra.mxu3 %v7330_v38  ;;  %v7336_v29 = vld [vmem:[#allocation11_spill] sm:$0xff]  ;;  %v7337_v38 = vld [vmem:[#allocation12_spill] sm:$0xff] }
 0x3b0   :  { %1964 = vmatmul.bf16.vlgmr.msra.gmra.mxu0 %v5828_v26  ;;  %1977 = vmatmul.bf16.vlgmr.msrb.gmra.mxu1 %v5830_v50 }
 0x3b1   :  { %2058 = vmatpush.bf16.msrb.mxu0 %v7331_v8  ;;  %2071 = vmatpush.bf16.msra.mxu1 %v7332_v27  ;;  %v7338_v8 = vld [vmem:[#allocation13_spill] sm:$0xff]  ;;  %v7339_v27 = vld [vmem:[#allocation14_spill] sm:$0xff] }
 0x3b2   :  { %1990 = vmatmul.bf16.vlgmr.msra.gmra.mxu2 %v5828_v26  ;;  %2003 = vmatmul.bf16.vlgmr.msra.gmra.mxu3 %v5830_v50  ;;  %v7342_v26 = vld [vmem:[#allocation17_spill] sm:$0xff]  ;;  %v7343_v50 = vld [vmem:[#allocation18_spill] sm:$0xff] }
 0x3b3   :  { %2084 = vmatpush.bf16.msrb.mxu2 %v7333_v34  ;;  %2097 = vmatpush.bf16.msrb.mxu3 %v7334_v46  ;;  %v7344_v34 = vld [vmem:[#allocation19_spill] sm:$0xff]  ;;  %v7345_v46 = vld [vmem:[#allocation20_spill] sm:$0xff] }
 0x3b5   :  { %2059 = vmatpush.bf16.msrb.mxu0 %v7335_v52  ;;  %2072 = vmatpush.bf16.msra.mxu1 %v7336_v29  ;;  %v7346_v52 = vld [vmem:[#allocation21_spill] sm:$0xff]  ;;  %v7347_v29 = vld [vmem:[#allocation22_spill] sm:$0xff] }
 0x3b7   :  { %2085 = vmatpush.bf16.msrb.mxu2 %v7337_v38  ;;  %2098 = vmatpush.bf16.msrb.mxu3 %v7338_v8  ;;  %v7348_v38 = vld [vmem:[#allocation23_spill] sm:$0xff]  ;;  %v7349_v8 = vld [vmem:[#allocation24_spill] sm:$0xff] }
 0x3b9   :  { %2060 = vmatpush.bf16.msrb.mxu0 %v7339_v27  ;;  %2073 = vmatpush.bf16.msra.mxu1 %v7340_v30  ;;  %v7350_v27 = vld [vmem:[#allocation25_spill] sm:$0xff]  ;;  %v7351_v30 = vld [vmem:[#allocation26_spill] sm:$0xff] }
 0x3bb   :  { %2086 = vmatpush.bf16.msrb.mxu2 %v7341_v39  ;;  %2099 = vmatpush.bf16.msrb.mxu3 %v7342_v26  ;;  %v7352_v39 = vld [vmem:[#allocation27_spill] sm:$0xff]  ;;  %v7353_v26 = vld [vmem:[#allocation28_spill] sm:$0xff] }
 0x3bd   :  { %2061 = vmatpush.bf16.msrb.mxu0 %v7343_v50  ;;  %2074 = vmatpush.bf16.msra.mxu1 %v7344_v34  ;;  %v7354_v50 = vld [vmem:[#allocation29_spill] sm:$0xff]  ;;  %v7355_v34 = vld [vmem:[#allocation30_spill] sm:$0xff] }
 0x3bf   :  { %2087 = vmatpush.bf16.msrb.mxu2 %v7345_v46  ;;  %2100 = vmatpush.bf16.msrb.mxu3 %v7346_v52  ;;  %v7356_v46 = vld [vmem:[#allocation31_spill] sm:$0xff]  ;;  %v7357_v52 = vld [vmem:[#allocation32_spill] sm:$0xff] }
 0x3c1   :  { %2062 = vmatpush.bf16.msrb.mxu0 %v7347_v29  ;;  %2075 = vmatpush.bf16.msra.mxu1 %v7348_v38  ;;  %v7358_v29 = vld [vmem:[#allocation33_spill] sm:$0xff]  ;;  %v7359_v38 = vld [vmem:[#allocation34_spill] sm:$0xff] }
 0x3c3   :  { %2088 = vmatpush.bf16.msrb.mxu2 %v7349_v8  ;;  %2101 = vmatpush.bf16.msrb.mxu3 %v7350_v27  ;;  %v7360_v8 = vld [vmem:[#allocation35_spill] sm:$0xff]  ;;  %v7361_v27 = vld [vmem:[#allocation38_spill] sm:$0xff] }
 0x3c5   :  { %2063 = vmatpush.bf16.msrb.mxu0 %v7351_v30  ;;  %2076 = vmatpush.bf16.msra.mxu1 %v7352_v39  ;;  %v7362_v30 = vld [vmem:[#allocation39_spill] sm:$0xff]  ;;  %v7363_v39 = vld [vmem:[#allocation36_spill] sm:$0xff] }
 0x3c7   :  { %2089 = vmatpush.bf16.msrb.mxu2 %v7353_v26  ;;  %2102 = vmatpush.bf16.msrb.mxu3 %v7354_v50  ;;  %v7364_v26 = vld [vmem:[#allocation37_spill] sm:$0xff]  ;;  %v7365_v50 = vld [vmem:[#allocation40_spill] sm:$0xff] }
 0x3c9   :  { %2064 = vmatpush.bf16.msrb.mxu0 %v7355_v34  ;;  %2077 = vmatpush.bf16.msra.mxu1 %v7356_v46  ;;  %v7366_v34 = vld [vmem:[#allocation41_spill] sm:$0xff]  ;;  %v7367_v46 = vld [vmem:[#allocation42_spill] sm:$0xff] }
 0x3cb   :  { %2090 = vmatpush.bf16.msrb.mxu2 %v7357_v52  ;;  %2103 = vmatpush.bf16.msrb.mxu3 %v7358_v29  ;;  %v7368_v52 = vld [vmem:[#allocation43_spill] sm:$0xff]  ;;  %v7369_v29 = vld [vmem:[#allocation45_spill] sm:$0xff] }
 0x3cd   :  { %2065 = vmatpush.bf16.msrb.mxu0 %v7359_v38  ;;  %2078 = vmatpush.bf16.msra.mxu1 %v7360_v8  ;;  %v7370_v38 = vld [vmem:[#allocation46_spill] sm:$0xff]  ;;  %v7371_v8 = vld [vmem:[#allocation47_spill] sm:$0xff] }
 0x3cf   :  { %2091 = vmatpush.bf16.msrb.mxu2 %v7363_v39  ;;  %2104 = vmatpush.bf16.msrb.mxu3 %v7364_v26  ;;  %v7374_v39 = vld [vmem:[#allocation51_spill] sm:$0xff]  ;;  %v7375_v26 = vld [vmem:[#allocation52_spill] sm:$0xff] }
 0x3d1   :  { %2110 = vmatpush.bf16.msra.mxu0 %v7361_v27  ;;  %2123 = vmatpush.bf16.msrb.mxu1 %v7362_v30  ;;  %v7372_v27 = vld [vmem:[#allocation48_spill] sm:$0xff]  ;;  %v7373_v30 = vld [vmem:[#allocation50_spill] sm:$0xff] }
 0x3d3   :  { %2136 = vmatpush.bf16.msra.mxu2 %v7365_v50  ;;  %2149 = vmatpush.bf16.msra.mxu3 %v7366_v34  ;;  %v7376_v50 = vld [vmem:[#allocation53_spill] sm:$0xff]  ;;  %v7377_v34 = vld [vmem:[#allocation54_spill] sm:$0xff] }
 0x3d5   :  { %2111 = vmatpush.bf16.msra.mxu0 %v7367_v46  ;;  %2124 = vmatpush.bf16.msrb.mxu1 %v7368_v52  ;;  %v7378_v46 = vld [vmem:[#allocation56_spill] sm:$0xff]  ;;  %v7379_v52 = vld [vmem:[#allocation58_spill] sm:$0xff] }
 0x3d7   :  { %2137 = vmatpush.bf16.msra.mxu2 %v7369_v29  ;;  %2150 = vmatpush.bf16.msra.mxu3 %v7370_v38  ;;  %v7380_v29 = vld [vmem:[#allocation59_spill] sm:$0xff]  ;;  %v7381_v38 = vld [vmem:[#allocation61_spill] sm:$0xff] }
 0x3d9   :  { %2112 = vmatpush.bf16.msra.mxu0 %v7371_v8  ;;  %2125 = vmatpush.bf16.msrb.mxu1 %v7372_v27  ;;  %v7382_v8 = vld [vmem:[#allocation62_spill] sm:$0xff]  ;;  %v7383_v27 = vld [vmem:[#allocation63_spill] sm:$0xff] }
 0x3db   :  { %2138 = vmatpush.bf16.msra.mxu2 %v7373_v30  ;;  %2151 = vmatpush.bf16.msra.mxu3 %v7374_v39  ;;  %v7384_v30 = vld [vmem:[#allocation64_spill] sm:$0xff]  ;;  %v7385_v39 = vld [vmem:[#allocation65_spill] sm:$0xff] }
 0x3dd   :  { %2113 = vmatpush.bf16.msra.mxu0 %v7375_v26  ;;  %2126 = vmatpush.bf16.msrb.mxu1 %v7376_v50  ;;  %v7386_v26 = vld [vmem:[#allocation67_spill] sm:$0xff]  ;;  %v7387_v50 = vld [vmem:[#allocation68_spill] sm:$0xff] }
 0x3df   :  { %2139 = vmatpush.bf16.msra.mxu2 %v7377_v34  ;;  %2152 = vmatpush.bf16.msra.mxu3 %v7378_v46  ;;  %v7388_v34 = vld [vmem:[#allocation69_spill] sm:$0xff]  ;;  %v7389_v46 = vld [vmem:[#allocation70_spill] sm:$0xff] }
 0x3e1   :  { %2114 = vmatpush.bf16.msra.mxu0 %v7379_v52  ;;  %2127 = vmatpush.bf16.msrb.mxu1 %v7380_v29  ;;  %v7390_v52 = vld [vmem:[#allocation71_spill] sm:$0xff]  ;;  %v7391_v29 = vld [vmem:[#allocation72_spill] sm:$0xff] }
 0x3e3   :  { %2140 = vmatpush.bf16.msra.mxu2 %v7381_v38  ;;  %2153 = vmatpush.bf16.msra.mxu3 %v7382_v8  ;;  %v7392_v38 = vld [vmem:[#allocation73_spill] sm:$0xff]  ;;  %v7393_v8 = vld [vmem:[#allocation74_spill] sm:$0xff] }
 0x3e5   :  { %2115 = vmatpush.bf16.msra.mxu0 %v7383_v27  ;;  %2128 = vmatpush.bf16.msrb.mxu1 %v7384_v30  ;;  %v7394_v27 = vld [vmem:[#allocation75_spill] sm:$0xff] }
 0x3e7   :  { %2141 = vmatpush.bf16.msra.mxu2 %v7385_v39  ;;  %2154 = vmatpush.bf16.msra.mxu3 %v7386_v26  ;;  %v7395_v26 = vld [vmem:[#allocation49_spill] sm:$0xff] }
 0x3e9   :  { %2116 = vmatpush.bf16.msra.mxu0 %v7387_v50  ;;  %2129 = vmatpush.bf16.msrb.mxu1 %v7388_v34  ;;  %v117_v50 = vadd.f32 %v7396_v14, %v7395_v26 }
 0x3eb   :  { %2142 = vmatpush.bf16.msra.mxu2 %v7389_v46  ;;  %2155 = vmatpush.bf16.msra.mxu3 %v7390_v52  ;;  %v7397_v46 = vld [vmem:[#allocation148_spill] sm:$0xff] }
 0x3ec   :  { %v1809_v30 = vpop.f32.mrf.mxu0  ;;  %v1822_v39 = vpop.f32.mrf.mxu1  ;;  %v146_v1 = vadd.f32 %v7397_v46, %v7100_v5 }
 0x3ed   :  { %2117 = vmatpush.bf16.msra.mxu0 %v7391_v29  ;;  %2130 = vmatpush.bf16.msrb.mxu1 %v7392_v38  ;;  %v1823_v22 = vadd.f32 %v1822_v39, %v1809_v30  ;;  %v7398_v30 = vld [vmem:[#allocation149_spill] sm:$0xff] }
 0x3ee   :  { %v175_v39 = vadd.f32 %v7398_v30, %v7101_v35 }
 0x3ef   :  { %2143 = vmatpush.bf16.msra.mxu2 %v7393_v8  ;;  %2156 = vmatpush.bf16.msra.mxu3 %v7394_v27  ;;  %v2029_v31 = vadd.f32 %v1823_v22, %v117_v50  ;;  %v7399_v22 = vld [vmem:[#allocation150_spill] sm:$0xff] }
 0x3f3   :  { %v1835_v56 = vpop.f32.mrf.mxu2  ;;  %v1848_v34 = vpop.f32.mrf.mxu3 }
 0x3f4   :  { %v1849_v52 = vadd.f32 %v1848_v34, %v1835_v56  ;;  %v1811_v24 = vpop.f32.mrf.mxu0  ;;  %v1824_v29 = vpop.f32.mrf.mxu1 }
 0x3f6   :  { %v2030_v38 = vadd.f32 %v1849_v52, %v146_v1  ;;  %v204_v1 = vadd.f32 %v7399_v22, %v7102_v23 }
 0x3f8   :  { %3945 = vtanh.f32 %v2030_v38 }
 0x3f9   :  { %3947 = vtanh.f32 %v2029_v31 }
 0x3fb   :  { %v1837_v8 = vpop.f32.mrf.mxu2  ;;  %v1850_v27 = vpop.f32.mrf.mxu3 }
 0x3fc   :  { %v1861_v13 = vpop.f32.mrf.mxu0  ;;  %v1874_v9 = vpop.f32.mrf.mxu1 }
 0x3fd   :  { %v1875_v14 = vadd.f32 %v1874_v9, %v1861_v13 }
 0x3fe   :  { %v3946_v26 = vpop.eup %3945 }
 0x3ff   :  { %v3948_v32 = vpop.eup %3947  ;;  %v2031_v62 = vadd.f32 %v1875_v14, %v175_v39  ;;  %v2037_v47 = vmul.f32 0.5, %v3946_v26 }
 0x400   :  { %v2034_v34 = vmul.f32 0.5, %v3948_v32 }
 0x401   :  { %3949 = vtanh.f32 %v2031_v62  ;;  %v2038_v31 = vadd.f32 0.5, %v2037_v47 }
 0x402   :  { %v2035_v52 = vadd.f32 0.5, %v2034_v34 }
 0x403   :  { %v1887_v24 = vpop.f32.mrf.mxu2  ;;  %v1900_v56 = vpop.f32.mrf.mxu3  ;;  %v2043_v9 = vmul.f32 %v2038_v31, %v5817_v58 }
 0x404   :  { %v1901_v8 = vadd.f32 %v1900_v56, %v1887_v24  ;;  %v1863_v27 = vpop.f32.mrf.mxu0  ;;  %v1876_v46 = vpop.f32.mrf.mxu1 }
 0x406   :  { %v2032_v29 = vadd.f32 %v1901_v8, %v204_v1 }
 0x407   :  { %v3950_v38 = vpop.eup %3949 }
 0x408   :  { %v2044_v13 = vmul.f32 %v3950_v38, %v2035_v52  ;;  %3951 = vtanh.f32 %v2032_v29 }
 0x40a   :  { %v5985_v50 = vadd.f32 %v2044_v13, %v2043_v9 }
 0x40b   :  { %v1889_v62 = vpop.f32.mrf.mxu2  ;;  %v1902_v32 = vpop.f32.mrf.mxu3 }
 0x40c   :  { %3953 = vtanh.f32 %v5985_v50 }
 0x40d   :  { %v1913_v30 = vpop.f32.mrf.mxu0  ;;  %v1926_v39 = vpop.f32.mrf.mxu1 }
 0x40e   :  { %v3952_v26 = vpop.eup %3951  ;;  %v1927_v52 = vadd.f32 %v1926_v39, %v1913_v30 }
 0x40f   :  { %v2041_v47 = vmul.f32 0.5, %v3952_v26 }
 0x410   :  { %v2008_v38 = vadd.f32 %v1927_v52, %v7201_v49 }
 0x411   :  { %v2042_v14 = vadd.f32 0.5, %v2041_v47 }
 0x412   :  { %v3954_v24 = vpop.eup %3953 }
 0x413   :  { %v2047_v56 = vmul.f32 %v3954_v24, %v2042_v14 }
 0x415   :  { %v2048_v34 = vpack.c.bf16 %v2047_v56, %v2047_v56  ;;  %v1915_v8 = vpop.f32.mrf.mxu0  ;;  %v1928_v58 = vpop.f32.mrf.mxu1 }
 0x416   :  { %v1939_v22 = vpop.f32.mrf.mxu2  ;;  %v1952_v1 = vpop.f32.mrf.mxu3 }
 0x417   :  { %2049 = vst [vmem:[#allocation5] sm:$0xf] %v2048_v34  ;;  %v1953_v46 = vadd.f32 %v1952_v1, %v1939_v22 }
 0x419   :  { %v2009_v29 = vadd.f32 %v1953_v46, %v7200_v43 }
 0x41b   :  { %3955 = vtanh.f32 %v2009_v29 }
 0x41c   :  { %3957 = vtanh.f32 %v2008_v38 }
 0x41e   :  { %v1941_v31 = vpop.f32.mrf.mxu2  ;;  %v1954_v27 = vpop.f32.mrf.mxu3 }
 0x421   :  { %v3956_v62 = vpop.eup %3955 }
 0x422   :  { %v3958_v26 = vpop.eup %3957  ;;  %v2016_v14 = vmul.f32 0.5, %v3956_v62 }
 0x423   :  { %v2013_v24 = vmul.f32 0.5, %v3958_v26 }
 0x424   :  { %v2017_v22 = vadd.f32 0.5, %v2016_v14 }
 0x425   :  { %v2014_v8 = vadd.f32 0.5, %v2013_v24 }
 0x426   :  { %v2022_v27 = vmul.f32 %v2017_v22, %v5825_v63  ;;  %v7400_v22 = vld [vmem:[#allocation110_spill] sm:$0xff] }
 0x42d   :  { %v1965_v9 = vpop.f32.mrf.mxu0  ;;  %v1978_v13 = vpop.f32.mrf.mxu1 }
 0x42e   :  { %v1979_v32 = vadd.f32 %v1978_v13, %v1965_v9 }
 0x430   :  { %v2010_v47 = vadd.f32 %v1979_v32, %v5483_v53 }
 0x432   :  { %3959 = vtanh.f32 %v2010_v47 }
 0x435   :  { %v1991_v56 = vpop.f32.mrf.mxu2  ;;  %v2004_v34 = vpop.f32.mrf.mxu3 }
 0x436   :  { %v2005_v30 = vadd.f32 %v2004_v34, %v1991_v56  ;;  %v1967_v39 = vpop.f32.mrf.mxu0  ;;  %v1980_v1 = vpop.f32.mrf.mxu1 }
 0x437   :  { %v7402_v39 = vld [vmem:[#allocation112_spill] sm:$0xff]  ;;  %v7403_v1 = vld [vmem:[#allocation113_spill] sm:$0xff] }
 0x438   :  { %v2011_v58 = vadd.f32 %v2005_v30, %v5486_v42  ;;  %v3960_v31 = vpop.eup %3959  ;;  %v7401_v30 = vld [vmem:[#allocation111_spill] sm:$0xff] }
 0x439   :  { %v2023_v46 = vmul.f32 %v3960_v31, %v2014_v8  ;;  %v7404_v8 = vld [vmem:[#allocation114_spill] sm:$0xff]  ;;  %v7406_v31 = vld [vmem:[#allocation116_spill] sm:$0xff] }
 0x43a   :  { %3961 = vtanh.f32 %v2011_v58  ;;  %v7405_v58 = vld [vmem:[#allocation115_spill] sm:$0xff] }
 0x43b   :  { %v5993_v52 = vadd.f32 %v2023_v46, %v2022_v27  ;;  %v7407_v27 = vld [vmem:[#allocation117_spill] sm:$0xff]  ;;  %v7408_v46 = vld [vmem:[#allocation118_spill] sm:$0xff] }
 0x43d   :  { %v1993_v29 = vpop.f32.mrf.mxu2  ;;  %v2006_v38 = vpop.f32.mrf.mxu3  ;;  %3963 = vtanh.f32 %v5993_v52 }
 0x43e   :  { %v7409_v29 = vld [vmem:[#allocation119_spill] sm:$0xff]  ;;  %v7410_v38 = vld [vmem:[#allocation120_spill] sm:$0xff] }
 0x440   :  { %v3962_v9 = vpop.eup %3961 }
 0x441   :  { %v2020_v13 = vmul.f32 0.5, %v3962_v9  ;;  %v7411_v9 = vld [vmem:[#allocation121_spill] sm:$0xff] }
 0x443   :  { %v2021_v62 = vadd.f32 0.5, %v2020_v13  ;;  %v3964_v32 = vpop.eup %3963  ;;  %v7412_v13 = vld [vmem:[#allocation122_spill] sm:$0xff] }
 0x445   :  { %v2026_v26 = vmul.f32 %v3964_v32, %v2021_v62  ;;  %v7413_v62 = vld [vmem:[#allocation123_spill] sm:$0xff]  ;;  %v7414_v32 = vld [vmem:[#allocation124_spill] sm:$0xff] }
 0x447   :  { %v2027_v47 = vpack.c.bf16 %v2026_v26, %v2026_v26  ;;  %v7415_v26 = vld [vmem:[#allocation125_spill] sm:$0xff] }
 0x449   :  { %2028 = vst [vmem:[#allocation5 + $0x4] sm:$0xf] %v2027_v47  ;;  %v7416_v47 = vld [vmem:[#allocation126_spill] sm:$0xff] }
 0x450   :  { %v2050_v14 = vld [vmem:[#allocation5] sm:$0xff] }
 0x451   :  { %v2052_v24 = vunpack.c.l.b16 %v2050_v14  ;;  %v2053_v56 = vunpack.c.h.b16 %v2050_v14  ;;  %v7417_v14 = vld [vmem:[#allocation127_spill] sm:$0xff] }
 0x453   :  { %v5996_v34 = vpack.c.b16 %v2052_v24, %v2052_v24  ;;  %v5998_v63 = vpack.c.b16 %v2053_v56, %v2053_v56  ;;  %v7418_v24 = vld [vmem:[#allocation128_spill] sm:$0xff]  ;;  %v7419_v56 = vld [vmem:[#allocation129_spill] sm:$0xff] }
 0x455   :  { %2066 = vmatmul.bf16.vlgmr.msrb.gmra.mxu0 %v5996_v34  ;;  %2079 = vmatmul.bf16.vlgmr.msra.gmra.mxu1 %v5998_v63 }
 0x456   :  { %2092 = vmatmul.bf16.vlgmr.msrb.gmra.mxu2 %v5996_v34  ;;  %2105 = vmatmul.bf16.vlgmr.msrb.gmra.mxu3 %v5998_v63 }
 0x457   :  { %2162 = vmatpush.bf16.msrb.mxu0 %v7106_v2  ;;  %2175 = vmatpush.bf16.msra.mxu1 %v7107_v7 }
 0x458   :  { %2188 = vmatpush.bf16.msrb.mxu2 %v7108_v51  ;;  %2201 = vmatpush.bf16.msrb.mxu3 %v7109_v55 }
 0x45b   :  { %2163 = vmatpush.bf16.msrb.mxu0 %v7110_v48  ;;  %2176 = vmatpush.bf16.msra.mxu1 %v7202_v60 }
 0x45c   :  { %2189 = vmatpush.bf16.msrb.mxu2 %v7203_v4  ;;  %2202 = vmatpush.bf16.msrb.mxu3 %v7204_v54 }
 0x45f   :  { %2164 = vmatpush.bf16.msrb.mxu0 %v7205_v16  ;;  %2177 = vmatpush.bf16.msra.mxu1 %v7206_v17 }
 0x460   :  { %2190 = vmatpush.bf16.msrb.mxu2 %v7207_v37  ;;  %2203 = vmatpush.bf16.msrb.mxu3 %v7208_v3 }
 0x463   :  { %2165 = vmatpush.bf16.msrb.mxu0 %v7209_v41  ;;  %2178 = vmatpush.bf16.msra.mxu1 %v7210_v45 }
 0x464   :  { %2191 = vmatpush.bf16.msrb.mxu2 %v7211_v33  ;;  %2204 = vmatpush.bf16.msrb.mxu3 %v7212_v40 }
 0x465   :  { %2118 = vmatmul.bf16.vlgmr.msra.gmra.mxu0 %v5996_v34  ;;  %2131 = vmatmul.bf16.vlgmr.msrb.gmra.mxu1 %v5998_v63 }
 0x466   :  { %2144 = vmatmul.bf16.vlgmr.msra.gmra.mxu2 %v5996_v34  ;;  %2157 = vmatmul.bf16.vlgmr.msra.gmra.mxu3 %v5998_v63 }
 0x467   :  { %2166 = vmatpush.bf16.msrb.mxu0 %v7122_v57  ;;  %2179 = vmatpush.bf16.msra.mxu1 %v7123_v15 }
 0x468   :  { %2192 = vmatpush.bf16.msrb.mxu2 %v7300_v36  ;;  %2205 = vmatpush.bf16.msrb.mxu3 %v7301_v59 }
 0x46b   :  { %2167 = vmatpush.bf16.msrb.mxu0 %v7302_v44  ;;  %2180 = vmatpush.bf16.msra.mxu1 %v7303_v6 }
 0x46c   :  { %2193 = vmatpush.bf16.msrb.mxu2 %v7304_v21  ;;  %2206 = vmatpush.bf16.msrb.mxu3 %v7305_v61 }
 0x46f   :  { %2168 = vmatpush.bf16.msrb.mxu0 %v7306_v18  ;;  %2181 = vmatpush.bf16.msra.mxu1 %v7216_v12 }
 0x470   :  { %2194 = vmatpush.bf16.msrb.mxu2 %v7217_v0  ;;  %2207 = vmatpush.bf16.msrb.mxu3 %v7307_v25 }
 0x473   :  { %2169 = vmatpush.bf16.msrb.mxu0 %v7308_v28  ;;  %2182 = vmatpush.bf16.msra.mxu1 %v7309_v20 }
 0x474   :  { %2195 = vmatpush.bf16.msrb.mxu2 %v7310_v19  ;;  %2208 = vmatpush.bf16.msrb.mxu3 %v7311_v11 }
 0x476   :  { %2170 = vmatmul.bf16.vlgmr.msrb.gmra.mxu0 %v5996_v34  ;;  %2183 = vmatmul.bf16.vlgmr.msra.gmra.mxu1 %v5998_v63 }
 0x477   :  { %2214 = vmatpush.bf16.msra.mxu0 %v7312_v10  ;;  %2227 = vmatpush.bf16.msrb.mxu1 %v7400_v22 }
 0x478   :  { %2240 = vmatpush.bf16.msra.mxu2 %v7401_v30  ;;  %2253 = vmatpush.bf16.msra.mxu3 %v7402_v39 }
 0x479   :  { %2196 = vmatmul.bf16.vlgmr.msrb.gmra.mxu2 %v5996_v34  ;;  %2209 = vmatmul.bf16.vlgmr.msrb.gmra.mxu3 %v5998_v63 }
 0x47b   :  { %2215 = vmatpush.bf16.msra.mxu0 %v7403_v1  ;;  %2228 = vmatpush.bf16.msrb.mxu1 %v7404_v8 }
 0x47c   :  { %2241 = vmatpush.bf16.msra.mxu2 %v7405_v58  ;;  %2254 = vmatpush.bf16.msra.mxu3 %v7406_v31 }
 0x47f   :  { %2216 = vmatpush.bf16.msra.mxu0 %v7407_v27  ;;  %2229 = vmatpush.bf16.msrb.mxu1 %v7408_v46 }
 0x480   :  { %2242 = vmatpush.bf16.msra.mxu2 %v7409_v29  ;;  %2255 = vmatpush.bf16.msra.mxu3 %v7410_v38  ;;  %v7420_v29 = vld [vmem:[#allocation130_spill] sm:$0xff]  ;;  %v7421_v38 = vld [vmem:[#allocation131_spill] sm:$0xff] }
 0x483   :  { %2217 = vmatpush.bf16.msra.mxu0 %v7411_v9  ;;  %2230 = vmatpush.bf16.msrb.mxu1 %v7412_v13  ;;  %v7422_v9 = vld [vmem:[#allocation132_spill] sm:$0xff]  ;;  %v7423_v13 = vld [vmem:[#allocation133_spill] sm:$0xff] }
 0x484   :  { %2243 = vmatpush.bf16.msra.mxu2 %v7413_v62  ;;  %2256 = vmatpush.bf16.msra.mxu3 %v7414_v32  ;;  %v7424_v62 = vld [vmem:[#allocation134_spill] sm:$0xff]  ;;  %v7425_v32 = vld [vmem:[#allocation135_spill] sm:$0xff] }
 0x487   :  { %2218 = vmatpush.bf16.msra.mxu0 %v7415_v26  ;;  %2231 = vmatpush.bf16.msrb.mxu1 %v7416_v47  ;;  %v7426_v26 = vld [vmem:[#allocation136_spill] sm:$0xff]  ;;  %v7427_v47 = vld [vmem:[#allocation137_spill] sm:$0xff] }
 0x488   :  { %2244 = vmatpush.bf16.msra.mxu2 %v7417_v14  ;;  %2257 = vmatpush.bf16.msra.mxu3 %v7418_v24  ;;  %v7428_v14 = vld [vmem:[#allocation138_spill] sm:$0xff]  ;;  %v7429_v24 = vld [vmem:[#allocation139_spill] sm:$0xff] }
 0x48b   :  { %2219 = vmatpush.bf16.msra.mxu0 %v7419_v56  ;;  %2232 = vmatpush.bf16.msrb.mxu1 %v7420_v29  ;;  %v7430_v56 = vld [vmem:[#allocation140_spill] sm:$0xff]  ;;  %v7431_v29 = vld [vmem:[#allocation6_spill] sm:$0xff] }
 0x48c   :  { %2245 = vmatpush.bf16.msra.mxu2 %v7421_v38  ;;  %2258 = vmatpush.bf16.msra.mxu3 %v7422_v9  ;;  %v7432_v38 = vld [vmem:[#allocation7_spill] sm:$0xff] }
 0x48d   :  { %v7496_v9 = vld [vmem:[#allocation159_spill] sm:$0xff] }
 0x48f   :  { %2220 = vmatpush.bf16.msra.mxu0 %v7423_v13  ;;  %2233 = vmatpush.bf16.msrb.mxu1 %v7424_v62  ;;  %v7441_v62 = vld [vmem:[#allocation16_spill] sm:$0xff] }
 0x490   :  { %2246 = vmatpush.bf16.msra.mxu2 %v7425_v32  ;;  %2259 = vmatpush.bf16.msra.mxu3 %v7426_v26  ;;  %v7433_v26 = vld [vmem:[#allocation8_spill] sm:$0xff]  ;;  %v7440_v32 = vld [vmem:[#allocation15_spill] sm:$0xff] }
 0x493   :  { %2221 = vmatpush.bf16.msra.mxu0 %v7427_v47  ;;  %2234 = vmatpush.bf16.msrb.mxu1 %v7428_v14  ;;  %v7434_v47 = vld [vmem:[#allocation9_spill] sm:$0xff]  ;;  %v7435_v14 = vld [vmem:[#allocation10_spill] sm:$0xff] }
 0x494   :  { %2247 = vmatpush.bf16.msra.mxu2 %v7429_v24  ;;  %2260 = vmatpush.bf16.msra.mxu3 %v7430_v56  ;;  %v7436_v24 = vld [vmem:[#allocation11_spill] sm:$0xff]  ;;  %v7437_v56 = vld [vmem:[#allocation12_spill] sm:$0xff] }
 0x496   :  { %2222 = vmatmul.bf16.vlgmr.msra.gmra.mxu0 %v5996_v34  ;;  %2235 = vmatmul.bf16.vlgmr.msrb.gmra.mxu1 %v5998_v63 }
 0x497   :  { %2316 = vmatpush.bf16.msrb.mxu0 %v7431_v29  ;;  %2329 = vmatpush.bf16.msra.mxu1 %v7432_v38  ;;  %v7438_v29 = vld [vmem:[#allocation13_spill] sm:$0xff]  ;;  %v7439_v38 = vld [vmem:[#allocation14_spill] sm:$0xff] }
 0x498   :  { %2248 = vmatmul.bf16.vlgmr.msra.gmra.mxu2 %v5996_v34  ;;  %2261 = vmatmul.bf16.vlgmr.msra.gmra.mxu3 %v5998_v63  ;;  %v7442_v34 = vld [vmem:[#allocation17_spill] sm:$0xff]  ;;  %v7443_v63 = vld [vmem:[#allocation18_spill] sm:$0xff] }
 0x499   :  { %2342 = vmatpush.bf16.msrb.mxu2 %v7433_v26  ;;  %2355 = vmatpush.bf16.msrb.mxu3 %v7434_v47  ;;  %v7444_v26 = vld [vmem:[#allocation19_spill] sm:$0xff]  ;;  %v7445_v47 = vld [vmem:[#allocation20_spill] sm:$0xff] }
 0x49b   :  { %2317 = vmatpush.bf16.msrb.mxu0 %v7435_v14  ;;  %2330 = vmatpush.bf16.msra.mxu1 %v7436_v24  ;;  %v7446_v14 = vld [vmem:[#allocation21_spill] sm:$0xff]  ;;  %v7447_v24 = vld [vmem:[#allocation22_spill] sm:$0xff] }
 0x49d   :  { %2343 = vmatpush.bf16.msrb.mxu2 %v7437_v56  ;;  %2356 = vmatpush.bf16.msrb.mxu3 %v7438_v29  ;;  %v7448_v56 = vld [vmem:[#allocation23_spill] sm:$0xff]  ;;  %v7449_v29 = vld [vmem:[#allocation24_spill] sm:$0xff] }
 0x49f   :  { %2318 = vmatpush.bf16.msrb.mxu0 %v7439_v38  ;;  %2331 = vmatpush.bf16.msra.mxu1 %v7440_v32  ;;  %v7450_v38 = vld [vmem:[#allocation25_spill] sm:$0xff]  ;;  %v7451_v32 = vld [vmem:[#allocation26_spill] sm:$0xff] }
 0x4a1   :  { %2344 = vmatpush.bf16.msrb.mxu2 %v7441_v62  ;;  %2357 = vmatpush.bf16.msrb.mxu3 %v7442_v34  ;;  %v7452_v62 = vld [vmem:[#allocation27_spill] sm:$0xff]  ;;  %v7453_v34 = vld [vmem:[#allocation28_spill] sm:$0xff] }
 0x4a3   :  { %2319 = vmatpush.bf16.msrb.mxu0 %v7443_v63  ;;  %2332 = vmatpush.bf16.msra.mxu1 %v7444_v26  ;;  %v7454_v63 = vld [vmem:[#allocation29_spill] sm:$0xff]  ;;  %v7455_v26 = vld [vmem:[#allocation30_spill] sm:$0xff] }
 0x4a5   :  { %2345 = vmatpush.bf16.msrb.mxu2 %v7445_v47  ;;  %2358 = vmatpush.bf16.msrb.mxu3 %v7446_v14  ;;  %v7456_v47 = vld [vmem:[#allocation31_spill] sm:$0xff]  ;;  %v7457_v14 = vld [vmem:[#allocation32_spill] sm:$0xff] }
 0x4a7   :  { %2320 = vmatpush.bf16.msrb.mxu0 %v7447_v24  ;;  %2333 = vmatpush.bf16.msra.mxu1 %v7448_v56  ;;  %v7458_v24 = vld [vmem:[#allocation33_spill] sm:$0xff]  ;;  %v7459_v56 = vld [vmem:[#allocation34_spill] sm:$0xff] }
 0x4a9   :  { %2346 = vmatpush.bf16.msrb.mxu2 %v7449_v29  ;;  %2359 = vmatpush.bf16.msrb.mxu3 %v7450_v38  ;;  %v7460_v29 = vld [vmem:[#allocation35_spill] sm:$0xff]  ;;  %v7461_v38 = vld [vmem:[#allocation38_spill] sm:$0xff] }
 0x4ab   :  { %2321 = vmatpush.bf16.msrb.mxu0 %v7451_v32  ;;  %2334 = vmatpush.bf16.msra.mxu1 %v7452_v62  ;;  %v7462_v32 = vld [vmem:[#allocation39_spill] sm:$0xff]  ;;  %v7463_v62 = vld [vmem:[#allocation36_spill] sm:$0xff] }
 0x4ad   :  { %2347 = vmatpush.bf16.msrb.mxu2 %v7453_v34  ;;  %2360 = vmatpush.bf16.msrb.mxu3 %v7454_v63  ;;  %v7464_v34 = vld [vmem:[#allocation37_spill] sm:$0xff]  ;;  %v7465_v63 = vld [vmem:[#allocation40_spill] sm:$0xff] }
 0x4af   :  { %2322 = vmatpush.bf16.msrb.mxu0 %v7455_v26  ;;  %2335 = vmatpush.bf16.msra.mxu1 %v7456_v47  ;;  %v7466_v26 = vld [vmem:[#allocation41_spill] sm:$0xff]  ;;  %v7467_v47 = vld [vmem:[#allocation42_spill] sm:$0xff] }
 0x4b1   :  { %2348 = vmatpush.bf16.msrb.mxu2 %v7457_v14  ;;  %2361 = vmatpush.bf16.msrb.mxu3 %v7458_v24  ;;  %v7468_v14 = vld [vmem:[#allocation43_spill] sm:$0xff]  ;;  %v7469_v24 = vld [vmem:[#allocation45_spill] sm:$0xff] }
 0x4b3   :  { %2323 = vmatpush.bf16.msrb.mxu0 %v7459_v56  ;;  %2336 = vmatpush.bf16.msra.mxu1 %v7460_v29  ;;  %v7470_v56 = vld [vmem:[#allocation46_spill] sm:$0xff]  ;;  %v7471_v29 = vld [vmem:[#allocation47_spill] sm:$0xff] }
 0x4b5   :  { %2349 = vmatpush.bf16.msrb.mxu2 %v7463_v62  ;;  %2362 = vmatpush.bf16.msrb.mxu3 %v7464_v34  ;;  %v7474_v62 = vld [vmem:[#allocation51_spill] sm:$0xff]  ;;  %v7475_v34 = vld [vmem:[#allocation52_spill] sm:$0xff] }
 0x4b7   :  { %2368 = vmatpush.bf16.msra.mxu0 %v7461_v38  ;;  %2381 = vmatpush.bf16.msrb.mxu1 %v7462_v32  ;;  %v7472_v38 = vld [vmem:[#allocation48_spill] sm:$0xff]  ;;  %v7473_v32 = vld [vmem:[#allocation50_spill] sm:$0xff] }
 0x4b9   :  { %2394 = vmatpush.bf16.msra.mxu2 %v7465_v63  ;;  %2407 = vmatpush.bf16.msra.mxu3 %v7466_v26  ;;  %v7476_v63 = vld [vmem:[#allocation53_spill] sm:$0xff]  ;;  %v7477_v26 = vld [vmem:[#allocation54_spill] sm:$0xff] }
 0x4bb   :  { %2369 = vmatpush.bf16.msra.mxu0 %v7467_v47  ;;  %2382 = vmatpush.bf16.msrb.mxu1 %v7468_v14  ;;  %v7478_v47 = vld [vmem:[#allocation56_spill] sm:$0xff]  ;;  %v7479_v14 = vld [vmem:[#allocation58_spill] sm:$0xff] }
 0x4bd   :  { %2395 = vmatpush.bf16.msra.mxu2 %v7469_v24  ;;  %2408 = vmatpush.bf16.msra.mxu3 %v7470_v56  ;;  %v7480_v24 = vld [vmem:[#allocation59_spill] sm:$0xff]  ;;  %v7481_v56 = vld [vmem:[#allocation61_spill] sm:$0xff] }
 0x4bf   :  { %2370 = vmatpush.bf16.msra.mxu0 %v7471_v29  ;;  %2383 = vmatpush.bf16.msrb.mxu1 %v7472_v38  ;;  %v7482_v29 = vld [vmem:[#allocation62_spill] sm:$0xff]  ;;  %v7483_v38 = vld [vmem:[#allocation63_spill] sm:$0xff] }
 0x4c1   :  { %2396 = vmatpush.bf16.msra.mxu2 %v7473_v32  ;;  %2409 = vmatpush.bf16.msra.mxu3 %v7474_v62  ;;  %v7484_v32 = vld [vmem:[#allocation64_spill] sm:$0xff]  ;;  %v7485_v62 = vld [vmem:[#allocation65_spill] sm:$0xff] }
 0x4c3   :  { %2371 = vmatpush.bf16.msra.mxu0 %v7475_v34  ;;  %2384 = vmatpush.bf16.msrb.mxu1 %v7476_v63  ;;  %v7486_v34 = vld [vmem:[#allocation67_spill] sm:$0xff]  ;;  %v7487_v63 = vld [vmem:[#allocation68_spill] sm:$0xff] }
 0x4c5   :  { %2397 = vmatpush.bf16.msra.mxu2 %v7477_v26  ;;  %2410 = vmatpush.bf16.msra.mxu3 %v7478_v47  ;;  %v7488_v26 = vld [vmem:[#allocation69_spill] sm:$0xff]  ;;  %v7489_v47 = vld [vmem:[#allocation70_spill] sm:$0xff] }
 0x4c7   :  { %2372 = vmatpush.bf16.msra.mxu0 %v7479_v14  ;;  %2385 = vmatpush.bf16.msrb.mxu1 %v7480_v24  ;;  %v7490_v14 = vld [vmem:[#allocation71_spill] sm:$0xff]  ;;  %v7491_v24 = vld [vmem:[#allocation72_spill] sm:$0xff] }
 0x4c9   :  { %2398 = vmatpush.bf16.msra.mxu2 %v7481_v56  ;;  %2411 = vmatpush.bf16.msra.mxu3 %v7482_v29  ;;  %v7492_v56 = vld [vmem:[#allocation73_spill] sm:$0xff]  ;;  %v7493_v29 = vld [vmem:[#allocation74_spill] sm:$0xff] }
 0x4cb   :  { %2373 = vmatpush.bf16.msra.mxu0 %v7483_v38  ;;  %2386 = vmatpush.bf16.msrb.mxu1 %v7484_v32  ;;  %v7494_v38 = vld [vmem:[#allocation75_spill] sm:$0xff] }
 0x4cd   :  { %2399 = vmatpush.bf16.msra.mxu2 %v7485_v62  ;;  %2412 = vmatpush.bf16.msra.mxu3 %v7486_v34  ;;  %v7495_v34 = vld [vmem:[#allocation49_spill] sm:$0xff] }
 0x4cf   :  { %2374 = vmatpush.bf16.msra.mxu0 %v7487_v63  ;;  %2387 = vmatpush.bf16.msrb.mxu1 %v7488_v26  ;;  %v119_v63 = vadd.f32 %v7496_v9, %v7495_v34 }
 0x4d1   :  { %2400 = vmatpush.bf16.msra.mxu2 %v7489_v47  ;;  %2413 = vmatpush.bf16.msra.mxu3 %v7490_v14  ;;  %v7497_v47 = vld [vmem:[#allocation152_spill] sm:$0xff] }
 0x4d2   :  { %v2067_v32 = vpop.f32.mrf.mxu0  ;;  %v2080_v62 = vpop.f32.mrf.mxu1  ;;  %v148_v27 = vadd.f32 %v7497_v47, %v7100_v5 }
 0x4d3   :  { %2375 = vmatpush.bf16.msra.mxu0 %v7491_v24  ;;  %2388 = vmatpush.bf16.msrb.mxu1 %v7492_v56  ;;  %v2081_v13 = vadd.f32 %v2080_v62, %v2067_v32  ;;  %v7498_v62 = vld [vmem:[#allocation153_spill] sm:$0xff] }
 0x4d4   :  { %v177_v32 = vadd.f32 %v7498_v62, %v7101_v35 }
 0x4d5   :  { %2401 = vmatpush.bf16.msra.mxu2 %v7493_v29  ;;  %2414 = vmatpush.bf16.msra.mxu3 %v7494_v38  ;;  %v2287_v58 = vadd.f32 %v2081_v13, %v119_v63 }
 0x4d9   :  { %v2093_v46 = vpop.f32.mrf.mxu2  ;;  %v2106_v26 = vpop.f32.mrf.mxu3 }
 0x4da   :  { %v2107_v14 = vadd.f32 %v2106_v26, %v2093_v46  ;;  %v2069_v31 = vpop.f32.mrf.mxu0  ;;  %v2082_v24 = vpop.f32.mrf.mxu1 }
 0x4dc   :  { %v2288_v56 = vadd.f32 %v2107_v14, %v148_v27  ;;  %v7499_v27 = vld [vmem:[#allocation154_spill] sm:$0xff] }
 0x4dd   :  { %v206_v13 = vadd.f32 %v7499_v27, %v7102_v23 }
 0x4de   :  { %3965 = vtanh.f32 %v2288_v56 }
 0x4df   :  { %3967 = vtanh.f32 %v2287_v58 }
 0x4e1   :  { %v2095_v29 = vpop.f32.mrf.mxu2  ;;  %v2108_v38 = vpop.f32.mrf.mxu3 }
 0x4e2   :  { %v2119_v8 = vpop.f32.mrf.mxu0  ;;  %v2132_v1 = vpop.f32.mrf.mxu1 }
 0x4e3   :  { %v2133_v9 = vadd.f32 %v2132_v1, %v2119_v8 }
 0x4e4   :  { %v3966_v34 = vpop.eup %3965 }
 0x4e5   :  { %v3968_v39 = vpop.eup %3967  ;;  %v2289_v30 = vadd.f32 %v2133_v9, %v177_v32  ;;  %v2295_v22 = vmul.f32 0.5, %v3966_v34 }
 0x4e6   :  { %v2292_v46 = vmul.f32 0.5, %v3968_v39 }
 0x4e7   :  { %3969 = vtanh.f32 %v2289_v30  ;;  %v2296_v58 = vadd.f32 0.5, %v2295_v22 }
 0x4e8   :  { %v2293_v14 = vadd.f32 0.5, %v2292_v46 }
 0x4e9   :  { %v2145_v31 = vpop.f32.mrf.mxu2  ;;  %v2158_v26 = vpop.f32.mrf.mxu3  ;;  %v2301_v1 = vmul.f32 %v2296_v58, %v5985_v50 }
 0x4ea   :  { %v2159_v29 = vadd.f32 %v2158_v26, %v2145_v31  ;;  %v2121_v38 = vpop.f32.mrf.mxu0  ;;  %v2134_v47 = vpop.f32.mrf.mxu1 }
 0x4ec   :  { %v2290_v24 = vadd.f32 %v2159_v29, %v206_v13 }
 0x4ed   :  { %v3970_v56 = vpop.eup %3969 }
 0x4ee   :  { %v2302_v8 = vmul.f32 %v3970_v56, %v2293_v14  ;;  %3971 = vtanh.f32 %v2290_v24 }
 0x4f0   :  { %v6153_v63 = vadd.f32 %v2302_v8, %v2301_v1 }
 0x4f1   :  { %v2147_v30 = vpop.f32.mrf.mxu2  ;;  %v2160_v39 = vpop.f32.mrf.mxu3 }
 0x4f2   :  { %3973 = vtanh.f32 %v6153_v63 }
 0x4f3   :  { %v2171_v62 = vpop.f32.mrf.mxu0  ;;  %v2184_v32 = vpop.f32.mrf.mxu1 }
 0x4f4   :  { %v3972_v34 = vpop.eup %3971  ;;  %v2185_v14 = vadd.f32 %v2184_v32, %v2171_v62 }
 0x4f5   :  { %v2299_v22 = vmul.f32 0.5, %v3972_v34 }
 0x4f6   :  { %v2266_v56 = vadd.f32 %v2185_v14, %v7201_v49 }
 0x4f7   :  { %v2300_v9 = vadd.f32 0.5, %v2299_v22 }
 0x4f8   :  { %v3974_v31 = vpop.eup %3973 }
 0x4f9   :  { %v2305_v26 = vmul.f32 %v3974_v31, %v2300_v9 }
 0x4fb   :  { %v2306_v46 = vpack.c.bf16 %v2305_v26, %v2305_v26  ;;  %v2173_v29 = vpop.f32.mrf.mxu0  ;;  %v2186_v50 = vpop.f32.mrf.mxu1 }
 0x4fc   :  { %v2197_v27 = vpop.f32.mrf.mxu2  ;;  %v2210_v13 = vpop.f32.mrf.mxu3 }
 0x4fd   :  { %2307 = vst [vmem:[#allocation5] sm:$0xf] %v2306_v46  ;;  %v2211_v47 = vadd.f32 %v2210_v13, %v2197_v27 }
 0x4ff   :  { %v2267_v24 = vadd.f32 %v2211_v47, %v7200_v43 }
 0x501   :  { %3975 = vtanh.f32 %v2267_v24 }
 0x502   :  { %3977 = vtanh.f32 %v2266_v56 }
 0x504   :  { %v2199_v58 = vpop.f32.mrf.mxu2  ;;  %v2212_v38 = vpop.f32.mrf.mxu3 }
 0x507   :  { %v3976_v30 = vpop.eup %3975 }
 0x508   :  { %v3978_v34 = vpop.eup %3977  ;;  %v2274_v9 = vmul.f32 0.5, %v3976_v30 }
 0x509   :  { %v2271_v31 = vmul.f32 0.5, %v3978_v34 }
 0x50a   :  { %v2275_v27 = vadd.f32 0.5, %v2274_v9 }
 0x50b   :  { %v2272_v29 = vadd.f32 0.5, %v2271_v31 }
 0x50c   :  { %v2280_v38 = vmul.f32 %v2275_v27, %v5993_v52  ;;  %v7500_v27 = vld [vmem:[#allocation110_spill] sm:$0xff] }
 0x513   :  { %v2223_v1 = vpop.f32.mrf.mxu0  ;;  %v2236_v8 = vpop.f32.mrf.mxu1 }
 0x514   :  { %v2237_v39 = vadd.f32 %v2236_v8, %v2223_v1 }
 0x516   :  { %v2268_v22 = vadd.f32 %v2237_v39, %v5483_v53 }
 0x518   :  { %3979 = vtanh.f32 %v2268_v22 }
 0x51b   :  { %v2249_v26 = vpop.f32.mrf.mxu2  ;;  %v2262_v46 = vpop.f32.mrf.mxu3 }
 0x51c   :  { %v2263_v62 = vadd.f32 %v2262_v46, %v2249_v26  ;;  %v2225_v32 = vpop.f32.mrf.mxu0  ;;  %v2238_v13 = vpop.f32.mrf.mxu1 }
 0x51d   :  { %v7502_v32 = vld [vmem:[#allocation112_spill] sm:$0xff]  ;;  %v7503_v13 = vld [vmem:[#allocation113_spill] sm:$0xff] }
 0x51e   :  { %v2269_v50 = vadd.f32 %v2263_v62, %v5486_v42  ;;  %v3980_v58 = vpop.eup %3979  ;;  %v7501_v62 = vld [vmem:[#allocation111_spill] sm:$0xff] }
 0x51f   :  { %v2281_v47 = vmul.f32 %v3980_v58, %v2272_v29  ;;  %v7504_v29 = vld [vmem:[#allocation114_spill] sm:$0xff]  ;;  %v7506_v58 = vld [vmem:[#allocation116_spill] sm:$0xff] }
 0x520   :  { %3981 = vtanh.f32 %v2269_v50  ;;  %v7505_v50 = vld [vmem:[#allocation115_spill] sm:$0xff] }
 0x521   :  { %v6161_v14 = vadd.f32 %v2281_v47, %v2280_v38  ;;  %v7507_v38 = vld [vmem:[#allocation117_spill] sm:$0xff]  ;;  %v7508_v47 = vld [vmem:[#allocation118_spill] sm:$0xff] }
 0x523   :  { %v2251_v24 = vpop.f32.mrf.mxu2  ;;  %v2264_v56 = vpop.f32.mrf.mxu3  ;;  %3983 = vtanh.f32 %v6161_v14 }
 0x524   :  { %v7509_v24 = vld [vmem:[#allocation119_spill] sm:$0xff]  ;;  %v7510_v56 = vld [vmem:[#allocation120_spill] sm:$0xff] }
 0x526   :  { %v3982_v1 = vpop.eup %3981 }
 0x527   :  { %v2278_v8 = vmul.f32 0.5, %v3982_v1  ;;  %v7511_v1 = vld [vmem:[#allocation121_spill] sm:$0xff] }
 0x529   :  { %v2279_v30 = vadd.f32 0.5, %v2278_v8  ;;  %v3984_v39 = vpop.eup %3983  ;;  %v7512_v8 = vld [vmem:[#allocation122_spill] sm:$0xff] }
 0x52b   :  { %v2284_v34 = vmul.f32 %v3984_v39, %v2279_v30  ;;  %v7513_v30 = vld [vmem:[#allocation123_spill] sm:$0xff]  ;;  %v7514_v39 = vld [vmem:[#allocation124_spill] sm:$0xff] }
 0x52d   :  { %v2285_v22 = vpack.c.bf16 %v2284_v34, %v2284_v34  ;;  %v7515_v34 = vld [vmem:[#allocation125_spill] sm:$0xff] }
 0x52f   :  { %2286 = vst [vmem:[#allocation5 + $0x4] sm:$0xf] %v2285_v22  ;;  %v7516_v22 = vld [vmem:[#allocation126_spill] sm:$0xff] }
 0x536   :  { %v2308_v9 = vld [vmem:[#allocation5] sm:$0xff] }
 0x537   :  { %v2310_v31 = vunpack.c.l.b16 %v2308_v9  ;;  %v2311_v26 = vunpack.c.h.b16 %v2308_v9  ;;  %v7517_v9 = vld [vmem:[#allocation127_spill] sm:$0xff] }
 0x539   :  { %v6164_v46 = vpack.c.b16 %v2310_v31, %v2310_v31  ;;  %v6166_v52 = vpack.c.b16 %v2311_v26, %v2311_v26  ;;  %v7518_v31 = vld [vmem:[#allocation128_spill] sm:$0xff]  ;;  %v7519_v26 = vld [vmem:[#allocation129_spill] sm:$0xff] }
 0x53b   :  { %2324 = vmatmul.bf16.vlgmr.msrb.gmra.mxu0 %v6164_v46  ;;  %2337 = vmatmul.bf16.vlgmr.msra.gmra.mxu1 %v6166_v52 }
 0x53c   :  { %2350 = vmatmul.bf16.vlgmr.msrb.gmra.mxu2 %v6164_v46  ;;  %2363 = vmatmul.bf16.vlgmr.msrb.gmra.mxu3 %v6166_v52 }
 0x53d   :  { %2420 = vmatpush.bf16.msrb.mxu0 %v7106_v2  ;;  %2433 = vmatpush.bf16.msra.mxu1 %v7107_v7 }
 0x53e   :  { %2446 = vmatpush.bf16.msrb.mxu2 %v7108_v51  ;;  %2459 = vmatpush.bf16.msrb.mxu3 %v7109_v55 }
 0x541   :  { %2421 = vmatpush.bf16.msrb.mxu0 %v7110_v48  ;;  %2434 = vmatpush.bf16.msra.mxu1 %v7202_v60 }
 0x542   :  { %2447 = vmatpush.bf16.msrb.mxu2 %v7203_v4  ;;  %2460 = vmatpush.bf16.msrb.mxu3 %v7204_v54 }
 0x545   :  { %2422 = vmatpush.bf16.msrb.mxu0 %v7205_v16  ;;  %2435 = vmatpush.bf16.msra.mxu1 %v7206_v17 }
 0x546   :  { %2448 = vmatpush.bf16.msrb.mxu2 %v7207_v37  ;;  %2461 = vmatpush.bf16.msrb.mxu3 %v7208_v3 }
 0x549   :  { %2423 = vmatpush.bf16.msrb.mxu0 %v7209_v41  ;;  %2436 = vmatpush.bf16.msra.mxu1 %v7210_v45 }
 0x54a   :  { %2449 = vmatpush.bf16.msrb.mxu2 %v7211_v33  ;;  %2462 = vmatpush.bf16.msrb.mxu3 %v7212_v40 }
 0x54b   :  { %2376 = vmatmul.bf16.vlgmr.msra.gmra.mxu0 %v6164_v46  ;;  %2389 = vmatmul.bf16.vlgmr.msrb.gmra.mxu1 %v6166_v52 }
 0x54c   :  { %2402 = vmatmul.bf16.vlgmr.msra.gmra.mxu2 %v6164_v46  ;;  %2415 = vmatmul.bf16.vlgmr.msra.gmra.mxu3 %v6166_v52 }
 0x54d   :  { %2424 = vmatpush.bf16.msrb.mxu0 %v7122_v57  ;;  %2437 = vmatpush.bf16.msra.mxu1 %v7123_v15 }
 0x54e   :  { %2450 = vmatpush.bf16.msrb.mxu2 %v7300_v36  ;;  %2463 = vmatpush.bf16.msrb.mxu3 %v7301_v59 }
 0x551   :  { %2425 = vmatpush.bf16.msrb.mxu0 %v7302_v44  ;;  %2438 = vmatpush.bf16.msra.mxu1 %v7303_v6 }
 0x552   :  { %2451 = vmatpush.bf16.msrb.mxu2 %v7304_v21  ;;  %2464 = vmatpush.bf16.msrb.mxu3 %v7305_v61 }
 0x555   :  { %2426 = vmatpush.bf16.msrb.mxu0 %v7306_v18  ;;  %2439 = vmatpush.bf16.msra.mxu1 %v7216_v12 }
 0x556   :  { %2452 = vmatpush.bf16.msrb.mxu2 %v7217_v0  ;;  %2465 = vmatpush.bf16.msrb.mxu3 %v7307_v25 }
 0x559   :  { %2427 = vmatpush.bf16.msrb.mxu0 %v7308_v28  ;;  %2440 = vmatpush.bf16.msra.mxu1 %v7309_v20 }
 0x55a   :  { %2453 = vmatpush.bf16.msrb.mxu2 %v7310_v19  ;;  %2466 = vmatpush.bf16.msrb.mxu3 %v7311_v11 }
 0x55c   :  { %2428 = vmatmul.bf16.vlgmr.msrb.gmra.mxu0 %v6164_v46  ;;  %2441 = vmatmul.bf16.vlgmr.msra.gmra.mxu1 %v6166_v52 }
 0x55d   :  { %2472 = vmatpush.bf16.msra.mxu0 %v7312_v10  ;;  %2485 = vmatpush.bf16.msrb.mxu1 %v7500_v27 }
 0x55e   :  { %2498 = vmatpush.bf16.msra.mxu2 %v7501_v62  ;;  %2511 = vmatpush.bf16.msra.mxu3 %v7502_v32 }
 0x55f   :  { %2454 = vmatmul.bf16.vlgmr.msrb.gmra.mxu2 %v6164_v46  ;;  %2467 = vmatmul.bf16.vlgmr.msrb.gmra.mxu3 %v6166_v52 }
 0x561   :  { %2473 = vmatpush.bf16.msra.mxu0 %v7503_v13  ;;  %2486 = vmatpush.bf16.msrb.mxu1 %v7504_v29 }
 0x562   :  { %2499 = vmatpush.bf16.msra.mxu2 %v7505_v50  ;;  %2512 = vmatpush.bf16.msra.mxu3 %v7506_v58 }
 0x565   :  { %2474 = vmatpush.bf16.msra.mxu0 %v7507_v38  ;;  %2487 = vmatpush.bf16.msrb.mxu1 %v7508_v47 }
 0x566   :  { %2500 = vmatpush.bf16.msra.mxu2 %v7509_v24  ;;  %2513 = vmatpush.bf16.msra.mxu3 %v7510_v56  ;;  %v7520_v24 = vld [vmem:[#allocation130_spill] sm:$0xff]  ;;  %v7521_v56 = vld [vmem:[#allocation131_spill] sm:$0xff] }
 0x569   :  { %2475 = vmatpush.bf16.msra.mxu0 %v7511_v1  ;;  %2488 = vmatpush.bf16.msrb.mxu1 %v7512_v8  ;;  %v7522_v1 = vld [vmem:[#allocation132_spill] sm:$0xff]  ;;  %v7523_v8 = vld [vmem:[#allocation133_spill] sm:$0xff] }
 0x56a   :  { %2501 = vmatpush.bf16.msra.mxu2 %v7513_v30  ;;  %2514 = vmatpush.bf16.msra.mxu3 %v7514_v39  ;;  %v7524_v30 = vld [vmem:[#allocation134_spill] sm:$0xff]  ;;  %v7525_v39 = vld [vmem:[#allocation135_spill] sm:$0xff] }
 0x56d   :  { %2476 = vmatpush.bf16.msra.mxu0 %v7515_v34  ;;  %2489 = vmatpush.bf16.msrb.mxu1 %v7516_v22  ;;  %v7526_v34 = vld [vmem:[#allocation136_spill] sm:$0xff]  ;;  %v7527_v22 = vld [vmem:[#allocation137_spill] sm:$0xff] }
 0x56e   :  { %2502 = vmatpush.bf16.msra.mxu2 %v7517_v9  ;;  %2515 = vmatpush.bf16.msra.mxu3 %v7518_v31  ;;  %v7528_v9 = vld [vmem:[#allocation138_spill] sm:$0xff]  ;;  %v7529_v31 = vld [vmem:[#allocation139_spill] sm:$0xff] }
 0x571   :  { %2477 = vmatpush.bf16.msra.mxu0 %v7519_v26  ;;  %2490 = vmatpush.bf16.msrb.mxu1 %v7520_v24  ;;  %v7530_v26 = vld [vmem:[#allocation140_spill] sm:$0xff]  ;;  %v7531_v24 = vld [vmem:[#allocation6_spill] sm:$0xff] }
 0x572   :  { %2503 = vmatpush.bf16.msra.mxu2 %v7521_v56  ;;  %2516 = vmatpush.bf16.msra.mxu3 %v7522_v1  ;;  %v7532_v56 = vld [vmem:[#allocation7_spill] sm:$0xff]  ;;  %v7596_v1 = vld [vmem:[#allocation44_spill] sm:$0xff] }
 0x575   :  { %2478 = vmatpush.bf16.msra.mxu0 %v7523_v8  ;;  %2491 = vmatpush.bf16.msrb.mxu1 %v7524_v30  ;;  %v7541_v30 = vld [vmem:[#allocation16_spill] sm:$0xff] }
 0x576   :  { %2504 = vmatpush.bf16.msra.mxu2 %v7525_v39  ;;  %2517 = vmatpush.bf16.msra.mxu3 %v7526_v34  ;;  %v7533_v34 = vld [vmem:[#allocation8_spill] sm:$0xff]  ;;  %v7540_v39 = vld [vmem:[#allocation15_spill] sm:$0xff] }
 0x579   :  { %2479 = vmatpush.bf16.msra.mxu0 %v7527_v22  ;;  %2492 = vmatpush.bf16.msrb.mxu1 %v7528_v9  ;;  %v7534_v22 = vld [vmem:[#allocation9_spill] sm:$0xff]  ;;  %v7535_v9 = vld [vmem:[#allocation10_spill] sm:$0xff] }
 0x57a   :  { %2505 = vmatpush.bf16.msra.mxu2 %v7529_v31  ;;  %2518 = vmatpush.bf16.msra.mxu3 %v7530_v26  ;;  %v7536_v31 = vld [vmem:[#allocation11_spill] sm:$0xff]  ;;  %v7537_v26 = vld [vmem:[#allocation12_spill] sm:$0xff] }
 0x57c   :  { %2480 = vmatmul.bf16.vlgmr.msra.gmra.mxu0 %v6164_v46  ;;  %2493 = vmatmul.bf16.vlgmr.msrb.gmra.mxu1 %v6166_v52 }
 0x57d   :  { %2574 = vmatpush.bf16.msrb.mxu0 %v7531_v24  ;;  %2587 = vmatpush.bf16.msra.mxu1 %v7532_v56  ;;  %v7538_v24 = vld [vmem:[#allocation13_spill] sm:$0xff]  ;;  %v7539_v56 = vld [vmem:[#allocation14_spill] sm:$0xff] }
 0x57e   :  { %2506 = vmatmul.bf16.vlgmr.msra.gmra.mxu2 %v6164_v46  ;;  %2519 = vmatmul.bf16.vlgmr.msra.gmra.mxu3 %v6166_v52  ;;  %v7542_v46 = vld [vmem:[#allocation17_spill] sm:$0xff]  ;;  %v7543_v52 = vld [vmem:[#allocation18_spill] sm:$0xff] }
 0x57f   :  { %2600 = vmatpush.bf16.msrb.mxu2 %v7533_v34  ;;  %2613 = vmatpush.bf16.msrb.mxu3 %v7534_v22  ;;  %v7544_v34 = vld [vmem:[#allocation19_spill] sm:$0xff]  ;;  %v7545_v22 = vld [vmem:[#allocation20_spill] sm:$0xff] }
 0x581   :  { %2575 = vmatpush.bf16.msrb.mxu0 %v7535_v9  ;;  %2588 = vmatpush.bf16.msra.mxu1 %v7536_v31  ;;  %v7546_v9 = vld [vmem:[#allocation21_spill] sm:$0xff]  ;;  %v7547_v31 = vld [vmem:[#allocation22_spill] sm:$0xff] }
 0x583   :  { %2601 = vmatpush.bf16.msrb.mxu2 %v7537_v26  ;;  %2614 = vmatpush.bf16.msrb.mxu3 %v7538_v24  ;;  %v7548_v26 = vld [vmem:[#allocation23_spill] sm:$0xff]  ;;  %v7549_v24 = vld [vmem:[#allocation24_spill] sm:$0xff] }
 0x585   :  { %2576 = vmatpush.bf16.msrb.mxu0 %v7539_v56  ;;  %2589 = vmatpush.bf16.msra.mxu1 %v7540_v39  ;;  %v7550_v56 = vld [vmem:[#allocation25_spill] sm:$0xff]  ;;  %v7551_v39 = vld [vmem:[#allocation26_spill] sm:$0xff] }
 0x587   :  { %2602 = vmatpush.bf16.msrb.mxu2 %v7541_v30  ;;  %2615 = vmatpush.bf16.msrb.mxu3 %v7542_v46  ;;  %v7552_v30 = vld [vmem:[#allocation27_spill] sm:$0xff]  ;;  %v7553_v46 = vld [vmem:[#allocation28_spill] sm:$0xff] }
 0x589   :  { %2577 = vmatpush.bf16.msrb.mxu0 %v7543_v52  ;;  %2590 = vmatpush.bf16.msra.mxu1 %v7544_v34  ;;  %v7554_v52 = vld [vmem:[#allocation29_spill] sm:$0xff]  ;;  %v7555_v34 = vld [vmem:[#allocation30_spill] sm:$0xff] }
 0x58b   :  { %2603 = vmatpush.bf16.msrb.mxu2 %v7545_v22  ;;  %2616 = vmatpush.bf16.msrb.mxu3 %v7546_v9  ;;  %v7556_v22 = vld [vmem:[#allocation31_spill] sm:$0xff]  ;;  %v7557_v9 = vld [vmem:[#allocation32_spill] sm:$0xff] }
 0x58d   :  { %2578 = vmatpush.bf16.msrb.mxu0 %v7547_v31  ;;  %2591 = vmatpush.bf16.msra.mxu1 %v7548_v26  ;;  %v7558_v31 = vld [vmem:[#allocation33_spill] sm:$0xff]  ;;  %v7559_v26 = vld [vmem:[#allocation34_spill] sm:$0xff] }
 0x58f   :  { %2604 = vmatpush.bf16.msrb.mxu2 %v7549_v24  ;;  %2617 = vmatpush.bf16.msrb.mxu3 %v7550_v56  ;;  %v7560_v24 = vld [vmem:[#allocation35_spill] sm:$0xff]  ;;  %v7561_v56 = vld [vmem:[#allocation38_spill] sm:$0xff] }
 0x591   :  { %2579 = vmatpush.bf16.msrb.mxu0 %v7551_v39  ;;  %2592 = vmatpush.bf16.msra.mxu1 %v7552_v30  ;;  %v7562_v39 = vld [vmem:[#allocation39_spill] sm:$0xff]  ;;  %v7563_v30 = vld [vmem:[#allocation36_spill] sm:$0xff] }
 0x593   :  { %2605 = vmatpush.bf16.msrb.mxu2 %v7553_v46  ;;  %2618 = vmatpush.bf16.msrb.mxu3 %v7554_v52  ;;  %v7564_v46 = vld [vmem:[#allocation37_spill] sm:$0xff]  ;;  %v7565_v52 = vld [vmem:[#allocation40_spill] sm:$0xff] }
 0x595   :  { %2580 = vmatpush.bf16.msrb.mxu0 %v7555_v34  ;;  %2593 = vmatpush.bf16.msra.mxu1 %v7556_v22  ;;  %v7566_v34 = vld [vmem:[#allocation41_spill] sm:$0xff]  ;;  %v7567_v22 = vld [vmem:[#allocation42_spill] sm:$0xff] }
 0x597   :  { %2606 = vmatpush.bf16.msrb.mxu2 %v7557_v9  ;;  %2619 = vmatpush.bf16.msrb.mxu3 %v7558_v31  ;;  %v7568_v9 = vld [vmem:[#allocation43_spill] sm:$0xff]  ;;  %v7569_v31 = vld [vmem:[#allocation45_spill] sm:$0xff] }
 0x599   :  { %2581 = vmatpush.bf16.msrb.mxu0 %v7559_v26  ;;  %2594 = vmatpush.bf16.msra.mxu1 %v7560_v24  ;;  %v7570_v26 = vld [vmem:[#allocation46_spill] sm:$0xff]  ;;  %v7571_v24 = vld [vmem:[#allocation47_spill] sm:$0xff] }
 0x59b   :  { %2607 = vmatpush.bf16.msrb.mxu2 %v7563_v30  ;;  %2620 = vmatpush.bf16.msrb.mxu3 %v7564_v46  ;;  %v7574_v30 = vld [vmem:[#allocation51_spill] sm:$0xff]  ;;  %v7575_v46 = vld [vmem:[#allocation52_spill] sm:$0xff] }
 0x59d   :  { %2626 = vmatpush.bf16.msra.mxu0 %v7561_v56  ;;  %2639 = vmatpush.bf16.msrb.mxu1 %v7562_v39  ;;  %v7572_v56 = vld [vmem:[#allocation48_spill] sm:$0xff]  ;;  %v7573_v39 = vld [vmem:[#allocation50_spill] sm:$0xff] }
 0x59f   :  { %2652 = vmatpush.bf16.msra.mxu2 %v7565_v52  ;;  %2665 = vmatpush.bf16.msra.mxu3 %v7566_v34  ;;  %v7576_v52 = vld [vmem:[#allocation53_spill] sm:$0xff]  ;;  %v7577_v34 = vld [vmem:[#allocation54_spill] sm:$0xff] }
 0x5a1   :  { %2627 = vmatpush.bf16.msra.mxu0 %v7567_v22  ;;  %2640 = vmatpush.bf16.msrb.mxu1 %v7568_v9  ;;  %v7578_v22 = vld [vmem:[#allocation56_spill] sm:$0xff]  ;;  %v7579_v9 = vld [vmem:[#allocation58_spill] sm:$0xff] }
 0x5a3   :  { %2653 = vmatpush.bf16.msra.mxu2 %v7569_v31  ;;  %2666 = vmatpush.bf16.msra.mxu3 %v7570_v26  ;;  %v7580_v31 = vld [vmem:[#allocation59_spill] sm:$0xff]  ;;  %v7581_v26 = vld [vmem:[#allocation61_spill] sm:$0xff] }
 0x5a5   :  { %2628 = vmatpush.bf16.msra.mxu0 %v7571_v24  ;;  %2641 = vmatpush.bf16.msrb.mxu1 %v7572_v56  ;;  %v7582_v24 = vld [vmem:[#allocation62_spill] sm:$0xff]  ;;  %v7583_v56 = vld [vmem:[#allocation63_spill] sm:$0xff] }
 0x5a7   :  { %2654 = vmatpush.bf16.msra.mxu2 %v7573_v39  ;;  %2667 = vmatpush.bf16.msra.mxu3 %v7574_v30  ;;  %v7584_v39 = vld [vmem:[#allocation64_spill] sm:$0xff]  ;;  %v7585_v30 = vld [vmem:[#allocation65_spill] sm:$0xff] }
 0x5a9   :  { %2629 = vmatpush.bf16.msra.mxu0 %v7575_v46  ;;  %2642 = vmatpush.bf16.msrb.mxu1 %v7576_v52  ;;  %v7586_v46 = vld [vmem:[#allocation67_spill] sm:$0xff]  ;;  %v7587_v52 = vld [vmem:[#allocation68_spill] sm:$0xff] }
 0x5ab   :  { %2655 = vmatpush.bf16.msra.mxu2 %v7577_v34  ;;  %2668 = vmatpush.bf16.msra.mxu3 %v7578_v22  ;;  %v7588_v34 = vld [vmem:[#allocation69_spill] sm:$0xff]  ;;  %v7589_v22 = vld [vmem:[#allocation70_spill] sm:$0xff] }
 0x5ad   :  { %2630 = vmatpush.bf16.msra.mxu0 %v7579_v9  ;;  %2643 = vmatpush.bf16.msrb.mxu1 %v7580_v31  ;;  %v7590_v9 = vld [vmem:[#allocation71_spill] sm:$0xff]  ;;  %v7591_v31 = vld [vmem:[#allocation72_spill] sm:$0xff] }
 0x5af   :  { %2656 = vmatpush.bf16.msra.mxu2 %v7581_v26  ;;  %2669 = vmatpush.bf16.msra.mxu3 %v7582_v24  ;;  %v7592_v26 = vld [vmem:[#allocation73_spill] sm:$0xff]  ;;  %v7593_v24 = vld [vmem:[#allocation74_spill] sm:$0xff] }
 0x5b1   :  { %2631 = vmatpush.bf16.msra.mxu0 %v7583_v56  ;;  %2644 = vmatpush.bf16.msrb.mxu1 %v7584_v39  ;;  %v7594_v56 = vld [vmem:[#allocation75_spill] sm:$0xff] }
 0x5b3   :  { %2657 = vmatpush.bf16.msra.mxu2 %v7585_v30  ;;  %2670 = vmatpush.bf16.msra.mxu3 %v7586_v46  ;;  %v7595_v46 = vld [vmem:[#allocation49_spill] sm:$0xff] }
 0x5b5   :  { %2632 = vmatpush.bf16.msra.mxu0 %v7587_v52  ;;  %2645 = vmatpush.bf16.msrb.mxu1 %v7588_v34  ;;  %v122_v52 = vadd.f32 %v7596_v1, %v7595_v46 }
 0x5b7   :  { %2658 = vmatpush.bf16.msra.mxu2 %v7589_v22  ;;  %2671 = vmatpush.bf16.msra.mxu3 %v7590_v9  ;;  %v7597_v22 = vld [vmem:[#allocation156_spill] sm:$0xff] }
 0x5b8   :  { %v2325_v39 = vpop.f32.mrf.mxu0  ;;  %v2338_v30 = vpop.f32.mrf.mxu1  ;;  %v151_v38 = vadd.f32 %v7597_v22, %v7100_v5 }
 0x5b9   :  { %2633 = vmatpush.bf16.msra.mxu0 %v7591_v31  ;;  %2646 = vmatpush.bf16.msrb.mxu1 %v7592_v26  ;;  %v2339_v8 = vadd.f32 %v2338_v30, %v2325_v39  ;;  %v7598_v30 = vld [vmem:[#allocation157_spill] sm:$0xff] }
 0x5ba   :  { %v180_v39 = vadd.f32 %v7598_v30, %v7101_v35 }
 0x5bb   :  { %2659 = vmatpush.bf16.msra.mxu2 %v7593_v24  ;;  %2672 = vmatpush.bf16.msra.mxu3 %v7594_v56  ;;  %v2545_v50 = vadd.f32 %v2339_v8, %v122_v52 }
 0x5bf   :  { %v2351_v47 = vpop.f32.mrf.mxu2  ;;  %v2364_v34 = vpop.f32.mrf.mxu3 }
 0x5c0   :  { %v2365_v9 = vadd.f32 %v2364_v34, %v2351_v47  ;;  %v2327_v58 = vpop.f32.mrf.mxu0  ;;  %v2340_v31 = vpop.f32.mrf.mxu1 }
 0x5c2   :  { %v2546_v26 = vadd.f32 %v2365_v9, %v151_v38  ;;  %v7599_v38 = vld [vmem:[#allocation158_spill] sm:$0xff] }
 0x5c3   :  { %v209_v8 = vadd.f32 %v7599_v38, %v7102_v23 }
 0x5c4   :  { %3985 = vtanh.f32 %v2546_v26 }
 0x5c5   :  { %3987 = vtanh.f32 %v2545_v50 }
 0x5c7   :  { %v2353_v24 = vpop.f32.mrf.mxu2  ;;  %v2366_v56 = vpop.f32.mrf.mxu3 }
 0x5c8   :  { %v2377_v29 = vpop.f32.mrf.mxu0  ;;  %v2390_v13 = vpop.f32.mrf.mxu1 }
 0x5c9   :  { %v2391_v1 = vadd.f32 %v2390_v13, %v2377_v29 }
 0x5ca   :  { %v3986_v46 = vpop.eup %3985 }
 0x5cb   :  { %v3988_v32 = vpop.eup %3987  ;;  %v2547_v62 = vadd.f32 %v2391_v1, %v180_v39  ;;  %v2553_v27 = vmul.f32 0.5, %v3986_v46 }
 0x5cc   :  { %v2550_v47 = vmul.f32 0.5, %v3988_v32 }
 0x5cd   :  { %3989 = vtanh.f32 %v2547_v62  ;;  %v2554_v50 = vadd.f32 0.5, %v2553_v27 }
 0x5ce   :  { %v2551_v9 = vadd.f32 0.5, %v2550_v47 }
 0x5cf   :  { %v2403_v58 = vpop.f32.mrf.mxu2  ;;  %v2416_v34 = vpop.f32.mrf.mxu3  ;;  %v2559_v13 = vmul.f32 %v2554_v50, %v6153_v63 }
 0x5d0   :  { %v2417_v24 = vadd.f32 %v2416_v34, %v2403_v58  ;;  %v2379_v56 = vpop.f32.mrf.mxu0  ;;  %v2392_v22 = vpop.f32.mrf.mxu1 }
 0x5d2   :  { %v2548_v31 = vadd.f32 %v2417_v24, %v209_v8 }
 0x5d3   :  { %v3990_v26 = vpop.eup %3989 }
 0x5d4   :  { %v2560_v29 = vmul.f32 %v3990_v26, %v2551_v9  ;;  %3991 = vtanh.f32 %v2548_v31 }
 0x5d6   :  { %v6321_v52 = vadd.f32 %v2560_v29, %v2559_v13 }
 0x5d7   :  { %v2405_v62 = vpop.f32.mrf.mxu2  ;;  %v2418_v32 = vpop.f32.mrf.mxu3 }
 0x5d8   :  { %3993 = vtanh.f32 %v6321_v52 }
 0x5d9   :  { %v2429_v30 = vpop.f32.mrf.mxu0  ;;  %v2442_v39 = vpop.f32.mrf.mxu1 }
 0x5da   :  { %v3992_v46 = vpop.eup %3991  ;;  %v2443_v9 = vadd.f32 %v2442_v39, %v2429_v30 }
 0x5db   :  { %v2557_v27 = vmul.f32 0.5, %v3992_v46 }
 0x5dc   :  { %v2524_v26 = vadd.f32 %v2443_v9, %v7201_v49 }
 0x5dd   :  { %v2558_v1 = vadd.f32 0.5, %v2557_v27 }
 0x5de   :  { %v3994_v58 = vpop.eup %3993 }
 0x5df   :  { %v2563_v34 = vmul.f32 %v3994_v58, %v2558_v1 }
 0x5e1   :  { %v2564_v47 = vpack.c.bf16 %v2563_v34, %v2563_v34  ;;  %v2431_v24 = vpop.f32.mrf.mxu0  ;;  %v2444_v63 = vpop.f32.mrf.mxu1 }
 0x5e2   :  { %v2455_v38 = vpop.f32.mrf.mxu2  ;;  %v2468_v8 = vpop.f32.mrf.mxu3 }
 0x5e3   :  { %2565 = vst [vmem:[#allocation5] sm:$0xf] %v2564_v47  ;;  %v2469_v22 = vadd.f32 %v2468_v8, %v2455_v38 }
 0x5e5   :  { %v2525_v31 = vadd.f32 %v2469_v22, %v7200_v43 }
 0x5e7   :  { %3995 = vtanh.f32 %v2525_v31 }
 0x5e8   :  { %3997 = vtanh.f32 %v2524_v26 }
 0x5ea   :  { %v2457_v50 = vpop.f32.mrf.mxu2  ;;  %v2470_v56 = vpop.f32.mrf.mxu3 }
 0x5ed   :  { %v3996_v62 = vpop.eup %3995 }
 0x5ee   :  { %v3998_v46 = vpop.eup %3997  ;;  %v2532_v1 = vmul.f32 0.5, %v3996_v62 }
 0x5ef   :  { %v2529_v58 = vmul.f32 0.5, %v3998_v46 }
 0x5f0   :  { %v2533_v38 = vadd.f32 0.5, %v2532_v1 }
 0x5f1   :  { %v2530_v24 = vadd.f32 0.5, %v2529_v58 }
 0x5f2   :  { %v2538_v56 = vmul.f32 %v2533_v38, %v6161_v14  ;;  %v7600_v38 = vld [vmem:[#allocation110_spill] sm:$0xff] }
 0x5f9   :  { %v2481_v13 = vpop.f32.mrf.mxu0  ;;  %v2494_v29 = vpop.f32.mrf.mxu1 }
 0x5fa   :  { %v2495_v32 = vadd.f32 %v2494_v29, %v2481_v13 }
 0x5fc   :  { %v2526_v27 = vadd.f32 %v2495_v32, %v5483_v53 }
 0x5fe   :  { %3999 = vtanh.f32 %v2526_v27 }
 0x601   :  { %v2507_v34 = vpop.f32.mrf.mxu2  ;;  %v2520_v47 = vpop.f32.mrf.mxu3 }
 0x602   :  { %v2521_v30 = vadd.f32 %v2520_v47, %v2507_v34  ;;  %v2483_v39 = vpop.f32.mrf.mxu0  ;;  %v2496_v8 = vpop.f32.mrf.mxu1 }
 0x603   :  { %v7602_v39 = vld [vmem:[#allocation112_spill] sm:$0xff]  ;;  %v7603_v8 = vld [vmem:[#allocation113_spill] sm:$0xff] }
 0x604   :  { %v2527_v63 = vadd.f32 %v2521_v30, %v5486_v42  ;;  %v4000_v50 = vpop.eup %3999  ;;  %v7601_v30 = vld [vmem:[#allocation111_spill] sm:$0xff] }
 0x605   :  { %v2539_v22 = vmul.f32 %v4000_v50, %v2530_v24  ;;  %v7604_v24 = vld [vmem:[#allocation114_spill] sm:$0xff]  ;;  %v7606_v50 = vld [vmem:[#allocation116_spill] sm:$0xff] }
 0x606   :  { %4001 = vtanh.f32 %v2527_v63  ;;  %v7605_v63 = vld [vmem:[#allocation115_spill] sm:$0xff] }
 0x607   :  { %v6329_v9 = vadd.f32 %v2539_v22, %v2538_v56  ;;  %v7607_v56 = vld [vmem:[#allocation117_spill] sm:$0xff]  ;;  %v7608_v22 = vld [vmem:[#allocation118_spill] sm:$0xff] }
 0x609   :  { %v2509_v31 = vpop.f32.mrf.mxu2  ;;  %v2522_v26 = vpop.f32.mrf.mxu3  ;;  %4003 = vtanh.f32 %v6329_v9 }
 0x60a   :  { %v7609_v31 = vld [vmem:[#allocation119_spill] sm:$0xff]  ;;  %v7610_v26 = vld [vmem:[#allocation120_spill] sm:$0xff] }
 0x60c   :  { %v4002_v13 = vpop.eup %4001 }
 0x60d   :  { %v2536_v29 = vmul.f32 0.5, %v4002_v13  ;;  %v7611_v13 = vld [vmem:[#allocation121_spill] sm:$0xff] }
 0x60f   :  { %v2537_v62 = vadd.f32 0.5, %v2536_v29  ;;  %v4004_v32 = vpop.eup %4003  ;;  %v7612_v29 = vld [vmem:[#allocation122_spill] sm:$0xff] }
 0x611   :  { %v2542_v46 = vmul.f32 %v4004_v32, %v2537_v62  ;;  %v7613_v62 = vld [vmem:[#allocation123_spill] sm:$0xff]  ;;  %v7614_v32 = vld [vmem:[#allocation124_spill] sm:$0xff] }
 0x613   :  { %v2543_v27 = vpack.c.bf16 %v2542_v46, %v2542_v46  ;;  %v7615_v46 = vld [vmem:[#allocation125_spill] sm:$0xff] }
 0x615   :  { %2544 = vst [vmem:[#allocation5 + $0x4] sm:$0xf] %v2543_v27  ;;  %v7616_v27 = vld [vmem:[#allocation126_spill] sm:$0xff] }
 0x61c   :  { %v2566_v1 = vld [vmem:[#allocation5] sm:$0xff] }
 0x61d   :  { %v2568_v58 = vunpack.c.l.b16 %v2566_v1  ;;  %v2569_v34 = vunpack.c.h.b16 %v2566_v1  ;;  %v7617_v1 = vld [vmem:[#allocation127_spill] sm:$0xff] }
 0x61f   :  { %v6332_v47 = vpack.c.b16 %v2568_v58, %v2568_v58  ;;  %v6334_v14 = vpack.c.b16 %v2569_v34, %v2569_v34  ;;  %v7618_v58 = vld [vmem:[#allocation128_spill] sm:$0xff]  ;;  %v7619_v34 = vld [vmem:[#allocation129_spill] sm:$0xff] }
 0x621   :  { %2582 = vmatmul.bf16.vlgmr.msrb.gmra.mxu0 %v6332_v47  ;;  %2595 = vmatmul.bf16.vlgmr.msra.gmra.mxu1 %v6334_v14 }
 0x622   :  { %2608 = vmatmul.bf16.vlgmr.msrb.gmra.mxu2 %v6332_v47  ;;  %2621 = vmatmul.bf16.vlgmr.msrb.gmra.mxu3 %v6334_v14 }
 0x623   :  { %2678 = vmatpush.bf16.msrb.mxu0 %v7106_v2  ;;  %2691 = vmatpush.bf16.msra.mxu1 %v7107_v7 }
 0x624   :  { %2704 = vmatpush.bf16.msrb.mxu2 %v7108_v51  ;;  %2717 = vmatpush.bf16.msrb.mxu3 %v7109_v55 }
 0x627   :  { %2679 = vmatpush.bf16.msrb.mxu0 %v7110_v48  ;;  %2692 = vmatpush.bf16.msra.mxu1 %v7202_v60 }
 0x628   :  { %2705 = vmatpush.bf16.msrb.mxu2 %v7203_v4  ;;  %2718 = vmatpush.bf16.msrb.mxu3 %v7204_v54 }
 0x62b   :  { %2680 = vmatpush.bf16.msrb.mxu0 %v7205_v16  ;;  %2693 = vmatpush.bf16.msra.mxu1 %v7206_v17 }
 0x62c   :  { %2706 = vmatpush.bf16.msrb.mxu2 %v7207_v37  ;;  %2719 = vmatpush.bf16.msrb.mxu3 %v7208_v3 }
 0x62f   :  { %2681 = vmatpush.bf16.msrb.mxu0 %v7209_v41  ;;  %2694 = vmatpush.bf16.msra.mxu1 %v7210_v45 }
 0x630   :  { %2707 = vmatpush.bf16.msrb.mxu2 %v7211_v33  ;;  %2720 = vmatpush.bf16.msrb.mxu3 %v7212_v40 }
 0x631   :  { %2634 = vmatmul.bf16.vlgmr.msra.gmra.mxu0 %v6332_v47  ;;  %2647 = vmatmul.bf16.vlgmr.msrb.gmra.mxu1 %v6334_v14 }
 0x632   :  { %2660 = vmatmul.bf16.vlgmr.msra.gmra.mxu2 %v6332_v47  ;;  %2673 = vmatmul.bf16.vlgmr.msra.gmra.mxu3 %v6334_v14 }
 0x633   :  { %2682 = vmatpush.bf16.msrb.mxu0 %v7122_v57  ;;  %2695 = vmatpush.bf16.msra.mxu1 %v7123_v15 }
 0x634   :  { %2708 = vmatpush.bf16.msrb.mxu2 %v7300_v36  ;;  %2721 = vmatpush.bf16.msrb.mxu3 %v7301_v59 }
 0x637   :  { %2683 = vmatpush.bf16.msrb.mxu0 %v7302_v44  ;;  %2696 = vmatpush.bf16.msra.mxu1 %v7303_v6 }
 0x638   :  { %2709 = vmatpush.bf16.msrb.mxu2 %v7304_v21  ;;  %2722 = vmatpush.bf16.msrb.mxu3 %v7305_v61 }
 0x63b   :  { %2684 = vmatpush.bf16.msrb.mxu0 %v7306_v18  ;;  %2697 = vmatpush.bf16.msra.mxu1 %v7216_v12 }
 0x63c   :  { %2710 = vmatpush.bf16.msrb.mxu2 %v7217_v0  ;;  %2723 = vmatpush.bf16.msrb.mxu3 %v7307_v25 }
 0x63f   :  { %2685 = vmatpush.bf16.msrb.mxu0 %v7308_v28  ;;  %2698 = vmatpush.bf16.msra.mxu1 %v7309_v20 }
 0x640   :  { %2711 = vmatpush.bf16.msrb.mxu2 %v7310_v19  ;;  %2724 = vmatpush.bf16.msrb.mxu3 %v7311_v11 }
 0x642   :  { %2686 = vmatmul.bf16.vlgmr.msrb.gmra.mxu0 %v6332_v47  ;;  %2699 = vmatmul.bf16.vlgmr.msra.gmra.mxu1 %v6334_v14 }
 0x643   :  { %2730 = vmatpush.bf16.msra.mxu0 %v7312_v10  ;;  %2743 = vmatpush.bf16.msrb.mxu1 %v7600_v38 }
 0x644   :  { %2756 = vmatpush.bf16.msra.mxu2 %v7601_v30  ;;  %2769 = vmatpush.bf16.msra.mxu3 %v7602_v39 }
 0x645   :  { %2712 = vmatmul.bf16.vlgmr.msrb.gmra.mxu2 %v6332_v47  ;;  %2725 = vmatmul.bf16.vlgmr.msrb.gmra.mxu3 %v6334_v14 }
 0x647   :  { %2731 = vmatpush.bf16.msra.mxu0 %v7603_v8  ;;  %2744 = vmatpush.bf16.msrb.mxu1 %v7604_v24 }
 0x648   :  { %2757 = vmatpush.bf16.msra.mxu2 %v7605_v63  ;;  %2770 = vmatpush.bf16.msra.mxu3 %v7606_v50 }
 0x64b   :  { %2732 = vmatpush.bf16.msra.mxu0 %v7607_v56  ;;  %2745 = vmatpush.bf16.msrb.mxu1 %v7608_v22 }
 0x64c   :  { %2758 = vmatpush.bf16.msra.mxu2 %v7609_v31  ;;  %2771 = vmatpush.bf16.msra.mxu3 %v7610_v26  ;;  %v7620_v31 = vld [vmem:[#allocation130_spill] sm:$0xff]  ;;  %v7621_v26 = vld [vmem:[#allocation131_spill] sm:$0xff] }
 0x64f   :  { %2733 = vmatpush.bf16.msra.mxu0 %v7611_v13  ;;  %2746 = vmatpush.bf16.msrb.mxu1 %v7612_v29  ;;  %v7622_v13 = vld [vmem:[#allocation132_spill] sm:$0xff]  ;;  %v7623_v29 = vld [vmem:[#allocation133_spill] sm:$0xff] }
 0x650   :  { %2759 = vmatpush.bf16.msra.mxu2 %v7613_v62  ;;  %2772 = vmatpush.bf16.msra.mxu3 %v7614_v32  ;;  %v7624_v62 = vld [vmem:[#allocation134_spill] sm:$0xff]  ;;  %v7625_v32 = vld [vmem:[#allocation135_spill] sm:$0xff] }
 0x653   :  { %2734 = vmatpush.bf16.msra.mxu0 %v7615_v46  ;;  %2747 = vmatpush.bf16.msrb.mxu1 %v7616_v27  ;;  %v7626_v46 = vld [vmem:[#allocation136_spill] sm:$0xff]  ;;  %v7627_v27 = vld [vmem:[#allocation137_spill] sm:$0xff] }
 0x654   :  { %2760 = vmatpush.bf16.msra.mxu2 %v7617_v1  ;;  %2773 = vmatpush.bf16.msra.mxu3 %v7618_v58  ;;  %v7628_v1 = vld [vmem:[#allocation138_spill] sm:$0xff]  ;;  %v7629_v58 = vld [vmem:[#allocation139_spill] sm:$0xff] }
 0x657   :  { %2735 = vmatpush.bf16.msra.mxu0 %v7619_v34  ;;  %2748 = vmatpush.bf16.msrb.mxu1 %v7620_v31  ;;  %v7630_v34 = vld [vmem:[#allocation140_spill] sm:$0xff]  ;;  %v7631_v31 = vld [vmem:[#allocation6_spill] sm:$0xff] }
 0x658   :  { %2761 = vmatpush.bf16.msra.mxu2 %v7621_v26  ;;  %2774 = vmatpush.bf16.msra.mxu3 %v7622_v13  ;;  %v7632_v26 = vld [vmem:[#allocation7_spill] sm:$0xff] }
 0x659   :  { %v7696_v13 = vld [vmem:[#allocation55_spill] sm:$0xff] }
 0x65b   :  { %2736 = vmatpush.bf16.msra.mxu0 %v7623_v29  ;;  %2749 = vmatpush.bf16.msrb.mxu1 %v7624_v62  ;;  %v7641_v62 = vld [vmem:[#allocation16_spill] sm:$0xff] }
 0x65c   :  { %2762 = vmatpush.bf16.msra.mxu2 %v7625_v32  ;;  %2775 = vmatpush.bf16.msra.mxu3 %v7626_v46  ;;  %v7633_v46 = vld [vmem:[#allocation8_spill] sm:$0xff]  ;;  %v7640_v32 = vld [vmem:[#allocation15_spill] sm:$0xff] }
 0x65f   :  { %2737 = vmatpush.bf16.msra.mxu0 %v7627_v27  ;;  %2750 = vmatpush.bf16.msrb.mxu1 %v7628_v1  ;;  %v7634_v27 = vld [vmem:[#allocation9_spill] sm:$0xff]  ;;  %v7635_v1 = vld [vmem:[#allocation10_spill] sm:$0xff] }
 0x660   :  { %2763 = vmatpush.bf16.msra.mxu2 %v7629_v58  ;;  %2776 = vmatpush.bf16.msra.mxu3 %v7630_v34  ;;  %v7636_v58 = vld [vmem:[#allocation11_spill] sm:$0xff]  ;;  %v7637_v34 = vld [vmem:[#allocation12_spill] sm:$0xff] }
 0x662   :  { %2738 = vmatmul.bf16.vlgmr.msra.gmra.mxu0 %v6332_v47  ;;  %2751 = vmatmul.bf16.vlgmr.msrb.gmra.mxu1 %v6334_v14 }
 0x663   :  { %2832 = vmatpush.bf16.msrb.mxu0 %v7631_v31  ;;  %2845 = vmatpush.bf16.msra.mxu1 %v7632_v26  ;;  %v7638_v31 = vld [vmem:[#allocation13_spill] sm:$0xff]  ;;  %v7639_v26 = vld [vmem:[#allocation14_spill] sm:$0xff] }
 0x664   :  { %2764 = vmatmul.bf16.vlgmr.msra.gmra.mxu2 %v6332_v47  ;;  %2777 = vmatmul.bf16.vlgmr.msra.gmra.mxu3 %v6334_v14  ;;  %v7642_v47 = vld [vmem:[#allocation17_spill] sm:$0xff]  ;;  %v7643_v14 = vld [vmem:[#allocation18_spill] sm:$0xff] }
 0x665   :  { %2858 = vmatpush.bf16.msrb.mxu2 %v7633_v46  ;;  %2871 = vmatpush.bf16.msrb.mxu3 %v7634_v27  ;;  %v7644_v46 = vld [vmem:[#allocation19_spill] sm:$0xff]  ;;  %v7645_v27 = vld [vmem:[#allocation20_spill] sm:$0xff] }
 0x667   :  { %2833 = vmatpush.bf16.msrb.mxu0 %v7635_v1  ;;  %2846 = vmatpush.bf16.msra.mxu1 %v7636_v58  ;;  %v7646_v1 = vld [vmem:[#allocation21_spill] sm:$0xff]  ;;  %v7647_v58 = vld [vmem:[#allocation22_spill] sm:$0xff] }
 0x669   :  { %2859 = vmatpush.bf16.msrb.mxu2 %v7637_v34  ;;  %2872 = vmatpush.bf16.msrb.mxu3 %v7638_v31  ;;  %v7648_v34 = vld [vmem:[#allocation23_spill] sm:$0xff]  ;;  %v7649_v31 = vld [vmem:[#allocation24_spill] sm:$0xff] }
 0x66b   :  { %2834 = vmatpush.bf16.msrb.mxu0 %v7639_v26  ;;  %2847 = vmatpush.bf16.msra.mxu1 %v7640_v32  ;;  %v7650_v26 = vld [vmem:[#allocation25_spill] sm:$0xff]  ;;  %v7651_v32 = vld [vmem:[#allocation26_spill] sm:$0xff] }
 0x66d   :  { %2860 = vmatpush.bf16.msrb.mxu2 %v7641_v62  ;;  %2873 = vmatpush.bf16.msrb.mxu3 %v7642_v47  ;;  %v7652_v62 = vld [vmem:[#allocation27_spill] sm:$0xff]  ;;  %v7653_v47 = vld [vmem:[#allocation28_spill] sm:$0xff] }
 0x66f   :  { %2835 = vmatpush.bf16.msrb.mxu0 %v7643_v14  ;;  %2848 = vmatpush.bf16.msra.mxu1 %v7644_v46  ;;  %v7654_v14 = vld [vmem:[#allocation29_spill] sm:$0xff]  ;;  %v7655_v46 = vld [vmem:[#allocation30_spill] sm:$0xff] }
 0x671   :  { %2861 = vmatpush.bf16.msrb.mxu2 %v7645_v27  ;;  %2874 = vmatpush.bf16.msrb.mxu3 %v7646_v1  ;;  %v7656_v27 = vld [vmem:[#allocation31_spill] sm:$0xff]  ;;  %v7657_v1 = vld [vmem:[#allocation32_spill] sm:$0xff] }
 0x673   :  { %2836 = vmatpush.bf16.msrb.mxu0 %v7647_v58  ;;  %2849 = vmatpush.bf16.msra.mxu1 %v7648_v34  ;;  %v7658_v58 = vld [vmem:[#allocation33_spill] sm:$0xff]  ;;  %v7659_v34 = vld [vmem:[#allocation34_spill] sm:$0xff] }
 0x675   :  { %2862 = vmatpush.bf16.msrb.mxu2 %v7649_v31  ;;  %2875 = vmatpush.bf16.msrb.mxu3 %v7650_v26  ;;  %v7660_v31 = vld [vmem:[#allocation35_spill] sm:$0xff]  ;;  %v7661_v26 = vld [vmem:[#allocation38_spill] sm:$0xff] }
 0x677   :  { %2837 = vmatpush.bf16.msrb.mxu0 %v7651_v32  ;;  %2850 = vmatpush.bf16.msra.mxu1 %v7652_v62  ;;  %v7662_v32 = vld [vmem:[#allocation39_spill] sm:$0xff]  ;;  %v7663_v62 = vld [vmem:[#allocation36_spill] sm:$0xff] }
 0x679   :  { %2863 = vmatpush.bf16.msrb.mxu2 %v7653_v47  ;;  %2876 = vmatpush.bf16.msrb.mxu3 %v7654_v14  ;;  %v7664_v47 = vld [vmem:[#allocation37_spill] sm:$0xff]  ;;  %v7665_v14 = vld [vmem:[#allocation40_spill] sm:$0xff] }
 0x67b   :  { %2838 = vmatpush.bf16.msrb.mxu0 %v7655_v46  ;;  %2851 = vmatpush.bf16.msra.mxu1 %v7656_v27  ;;  %v7666_v46 = vld [vmem:[#allocation41_spill] sm:$0xff]  ;;  %v7667_v27 = vld [vmem:[#allocation42_spill] sm:$0xff] }
 0x67d   :  { %2864 = vmatpush.bf16.msrb.mxu2 %v7657_v1  ;;  %2877 = vmatpush.bf16.msrb.mxu3 %v7658_v58  ;;  %v7668_v1 = vld [vmem:[#allocation43_spill] sm:$0xff]  ;;  %v7669_v58 = vld [vmem:[#allocation45_spill] sm:$0xff] }
 0x67f   :  { %2839 = vmatpush.bf16.msrb.mxu0 %v7659_v34  ;;  %2852 = vmatpush.bf16.msra.mxu1 %v7660_v31  ;;  %v7670_v34 = vld [vmem:[#allocation46_spill] sm:$0xff]  ;;  %v7671_v31 = vld [vmem:[#allocation47_spill] sm:$0xff] }
 0x681   :  { %2865 = vmatpush.bf16.msrb.mxu2 %v7663_v62  ;;  %2878 = vmatpush.bf16.msrb.mxu3 %v7664_v47  ;;  %v7674_v62 = vld [vmem:[#allocation51_spill] sm:$0xff]  ;;  %v7675_v47 = vld [vmem:[#allocation52_spill] sm:$0xff] }
 0x683   :  { %2884 = vmatpush.bf16.msra.mxu0 %v7661_v26  ;;  %2897 = vmatpush.bf16.msrb.mxu1 %v7662_v32  ;;  %v7672_v26 = vld [vmem:[#allocation48_spill] sm:$0xff]  ;;  %v7673_v32 = vld [vmem:[#allocation50_spill] sm:$0xff] }
 0x685   :  { %2910 = vmatpush.bf16.msra.mxu2 %v7665_v14  ;;  %2923 = vmatpush.bf16.msra.mxu3 %v7666_v46  ;;  %v7676_v14 = vld [vmem:[#allocation53_spill] sm:$0xff]  ;;  %v7677_v46 = vld [vmem:[#allocation54_spill] sm:$0xff] }
 0x687   :  { %2885 = vmatpush.bf16.msra.mxu0 %v7667_v27  ;;  %2898 = vmatpush.bf16.msrb.mxu1 %v7668_v1  ;;  %v7678_v27 = vld [vmem:[#allocation56_spill] sm:$0xff]  ;;  %v7679_v1 = vld [vmem:[#allocation58_spill] sm:$0xff] }
 0x689   :  { %2911 = vmatpush.bf16.msra.mxu2 %v7669_v58  ;;  %2924 = vmatpush.bf16.msra.mxu3 %v7670_v34  ;;  %v7680_v58 = vld [vmem:[#allocation59_spill] sm:$0xff]  ;;  %v7681_v34 = vld [vmem:[#allocation61_spill] sm:$0xff] }
 0x68b   :  { %2886 = vmatpush.bf16.msra.mxu0 %v7671_v31  ;;  %2899 = vmatpush.bf16.msrb.mxu1 %v7672_v26  ;;  %v7682_v31 = vld [vmem:[#allocation62_spill] sm:$0xff]  ;;  %v7683_v26 = vld [vmem:[#allocation63_spill] sm:$0xff] }
 0x68d   :  { %2912 = vmatpush.bf16.msra.mxu2 %v7673_v32  ;;  %2925 = vmatpush.bf16.msra.mxu3 %v7674_v62  ;;  %v7684_v32 = vld [vmem:[#allocation64_spill] sm:$0xff]  ;;  %v7685_v62 = vld [vmem:[#allocation65_spill] sm:$0xff] }
 0x68f   :  { %2887 = vmatpush.bf16.msra.mxu0 %v7675_v47  ;;  %2900 = vmatpush.bf16.msrb.mxu1 %v7676_v14  ;;  %v7686_v47 = vld [vmem:[#allocation67_spill] sm:$0xff]  ;;  %v7687_v14 = vld [vmem:[#allocation68_spill] sm:$0xff] }
 0x691   :  { %2913 = vmatpush.bf16.msra.mxu2 %v7677_v46  ;;  %2926 = vmatpush.bf16.msra.mxu3 %v7678_v27  ;;  %v7688_v46 = vld [vmem:[#allocation69_spill] sm:$0xff]  ;;  %v7689_v27 = vld [vmem:[#allocation70_spill] sm:$0xff] }
 0x693   :  { %2888 = vmatpush.bf16.msra.mxu0 %v7679_v1  ;;  %2901 = vmatpush.bf16.msrb.mxu1 %v7680_v58  ;;  %v7690_v1 = vld [vmem:[#allocation71_spill] sm:$0xff]  ;;  %v7691_v58 = vld [vmem:[#allocation72_spill] sm:$0xff] }
 0x695   :  { %2914 = vmatpush.bf16.msra.mxu2 %v7681_v34  ;;  %2927 = vmatpush.bf16.msra.mxu3 %v7682_v31  ;;  %v7692_v34 = vld [vmem:[#allocation73_spill] sm:$0xff]  ;;  %v7693_v31 = vld [vmem:[#allocation74_spill] sm:$0xff] }
 0x697   :  { %2889 = vmatpush.bf16.msra.mxu0 %v7683_v26  ;;  %2902 = vmatpush.bf16.msrb.mxu1 %v7684_v32  ;;  %v7694_v26 = vld [vmem:[#allocation75_spill] sm:$0xff] }
 0x699   :  { %2915 = vmatpush.bf16.msra.mxu2 %v7685_v62  ;;  %2928 = vmatpush.bf16.msra.mxu3 %v7686_v47  ;;  %v7695_v47 = vld [vmem:[#allocation49_spill] sm:$0xff] }
 0x69b   :  { %2890 = vmatpush.bf16.msra.mxu0 %v7687_v14  ;;  %2903 = vmatpush.bf16.msrb.mxu1 %v7688_v46  ;;  %v124_v14 = vadd.f32 %v7696_v13, %v7695_v47 }
 0x69d   :  { %2916 = vmatpush.bf16.msra.mxu2 %v7689_v27  ;;  %2929 = vmatpush.bf16.msra.mxu3 %v7690_v1  ;;  %v7697_v27 = vld [vmem:[#allocation160_spill] sm:$0xff] }
 0x69e   :  { %v2583_v32 = vpop.f32.mrf.mxu0  ;;  %v2596_v62 = vpop.f32.mrf.mxu1  ;;  %v153_v56 = vadd.f32 %v7697_v27, %v7100_v5 }
 0x69f   :  { %2891 = vmatpush.bf16.msra.mxu0 %v7691_v58  ;;  %2904 = vmatpush.bf16.msrb.mxu1 %v7692_v34  ;;  %v2597_v29 = vadd.f32 %v2596_v62, %v2583_v32  ;;  %v7698_v32 = vld [vmem:[#allocation161_spill] sm:$0xff] }
 0x6a0   :  { %v182_v62 = vadd.f32 %v7698_v32, %v7101_v35 }
 0x6a1   :  { %2917 = vmatpush.bf16.msra.mxu2 %v7693_v31  ;;  %2930 = vmatpush.bf16.msra.mxu3 %v7694_v26  ;;  %v2803_v63 = vadd.f32 %v2597_v29, %v124_v14 }
 0x6a5   :  { %v2609_v22 = vpop.f32.mrf.mxu2  ;;  %v2622_v46 = vpop.f32.mrf.mxu3 }
 0x6a6   :  { %v2623_v1 = vadd.f32 %v2622_v46, %v2609_v22  ;;  %v2585_v50 = vpop.f32.mrf.mxu0  ;;  %v2598_v58 = vpop.f32.mrf.mxu1 }
 0x6a8   :  { %v2804_v34 = vadd.f32 %v2623_v1, %v153_v56  ;;  %v7699_v56 = vld [vmem:[#allocation162_spill] sm:$0xff] }
 0x6a9   :  { %v211_v29 = vadd.f32 %v7699_v56, %v7102_v23 }
 0x6aa   :  { %4005 = vtanh.f32 %v2804_v34 }
 0x6ab   :  { %4007 = vtanh.f32 %v2803_v63 }
 0x6ad   :  { %v2611_v31 = vpop.f32.mrf.mxu2  ;;  %v2624_v26 = vpop.f32.mrf.mxu3 }
 0x6ae   :  { %v2635_v24 = vpop.f32.mrf.mxu0  ;;  %v2648_v8 = vpop.f32.mrf.mxu1 }
 0x6af   :  { %v2649_v13 = vadd.f32 %v2648_v8, %v2635_v24 }
 0x6b0   :  { %v4006_v47 = vpop.eup %4005 }
 0x6b1   :  { %v4008_v39 = vpop.eup %4007  ;;  %v2805_v30 = vadd.f32 %v2649_v13, %v182_v62  ;;  %v2811_v38 = vmul.f32 0.5, %v4006_v47 }
 0x6b2   :  { %v2808_v5 = vmul.f32 0.5, %v4008_v39 }
 0x6b3   :  { %4009 = vtanh.f32 %v2805_v30  ;;  %v2812_v63 = vadd.f32 0.5, %v2811_v38 }
 0x6b4   :  { %v2809_v1 = vadd.f32 0.5, %v2808_v5 }
 0x6b5   :  { %v2661_v50 = vpop.f32.mrf.mxu2  ;;  %v2674_v22 = vpop.f32.mrf.mxu3  ;;  %v2817_v35 = vmul.f32 %v2812_v63, %v6321_v52 }
 0x6b6   :  { %v2675_v14 = vadd.f32 %v2674_v22, %v2661_v50  ;;  %v2637_v46 = vpop.f32.mrf.mxu0  ;;  %v2650_v27 = vpop.f32.mrf.mxu1 }
 0x6b8   :  { %v2806_v58 = vadd.f32 %v2675_v14, %v211_v29 }
 0x6b9   :  { %v4010_v34 = vpop.eup %4009 }
 0x6ba   :  { %v2818_v8 = vmul.f32 %v4010_v34, %v2809_v1  ;;  %4011 = vtanh.f32 %v2806_v58 }
 0x6bc   :  { %v2819_v24 = vadd.f32 %v2818_v8, %v2817_v35 }
 0x6bd   :  { %v2663_v31 = vpop.f32.mrf.mxu2  ;;  %v2676_v30 = vpop.f32.mrf.mxu3 }
 0x6be   :  { %4013 = vtanh.f32 %v2819_v24 }
 0x6bf   :  { %v2687_v26 = vpop.f32.mrf.mxu0  ;;  %v2700_v32 = vpop.f32.mrf.mxu1 }
 0x6c0   :  { %v4012_v39 = vpop.eup %4011  ;;  %v2701_v14 = vadd.f32 %v2700_v32, %v2687_v26 }
 0x6c1   :  { %v2815_v62 = vmul.f32 0.5, %v4012_v39 }
 0x6c2   :  { %v2782_v27 = vadd.f32 %v2701_v14, %v7201_v49 }
 0x6c3   :  { %v2816_v23 = vadd.f32 0.5, %v2815_v62 }
 0x6c4   :  { %v4014_v38 = vpop.eup %4013 }
 0x6c5   :  { %v2821_v13 = vmul.f32 %v4014_v38, %v2816_v23 }
 0x6c7   :  { %v2822_v47 = vpack.c.bf16 %v2821_v13, %v2821_v13  ;;  %v2689_v22 = vpop.f32.mrf.mxu0  ;;  %v2702_v56 = vpop.f32.mrf.mxu1 }
 0x6c8   :  { %v2713_v50 = vpop.f32.mrf.mxu2  ;;  %v2726_v5 = vpop.f32.mrf.mxu3 }
 0x6c9   :  { %2823 = vst [vmem:[#allocation5] sm:$0xf] %v2822_v47  ;;  %v2727_v63 = vadd.f32 %v2726_v5, %v2713_v50 }
 0x6cb   :  { %v2783_v46 = vadd.f32 %v2727_v63, %v7200_v43 }
 0x6cd   :  { %4015 = vtanh.f32 %v2783_v46 }
 0x6ce   :  { %4017 = vtanh.f32 %v2782_v27 }
 0x6d0   :  { %v2715_v52 = vpop.f32.mrf.mxu2  ;;  %v2728_v29 = vpop.f32.mrf.mxu3 }
 0x6d3   :  { %v4016_v34 = vpop.eup %4015 }
 0x6d4   :  { %v4018_v8 = vpop.eup %4017  ;;  %v2790_v31 = vmul.f32 0.5, %v4016_v34 }
 0x6d5   :  { %v2787_v30 = vmul.f32 0.5, %v4018_v8 }
 0x6d6   :  { %v2791_v23 = vadd.f32 0.5, %v2790_v31 }
 0x6d7   :  { %v2788_v13 = vadd.f32 0.5, %v2787_v30 }
 0x6d8   :  { %v2796_v5 = vmul.f32 %v2791_v23, %v6329_v9 }
 0x6df   :  { %v2739_v1 = vpop.f32.mrf.mxu0  ;;  %v2752_v58 = vpop.f32.mrf.mxu1 }
 0x6e0   :  { %v2753_v35 = vadd.f32 %v2752_v58, %v2739_v1 }
 0x6e2   :  { %v2784_v24 = vadd.f32 %v2753_v35, %v5483_v53 }
 0x6e4   :  { %4019 = vtanh.f32 %v2784_v24 }
 0x6e7   :  { %v2765_v39 = vpop.f32.mrf.mxu2  ;;  %v2778_v62 = vpop.f32.mrf.mxu3 }
 0x6e8   :  { %v2779_v26 = vadd.f32 %v2778_v62, %v2765_v39  ;;  %v2741_v32 = vpop.f32.mrf.mxu0  ;;  %v2754_v38 = vpop.f32.mrf.mxu1 }
 0x6ea   :  { %v2785_v47 = vadd.f32 %v2779_v26, %v5486_v42  ;;  %v4020_v50 = vpop.eup %4019 }
 0x6eb   :  { %v2797_v22 = vmul.f32 %v4020_v50, %v2788_v13 }
 0x6ec   :  { %4021 = vtanh.f32 %v2785_v47 }
 0x6ed   :  { %v6494_v56 = vadd.f32 %v2797_v22, %v2796_v5  ;;  %v3871_v22 = vld [vmem:[%s6622_s5 + $0x38] sm:$0xff] }
 0x6ef   :  { %v2767_v52 = vpop.f32.mrf.mxu2  ;;  %v2780_v29 = vpop.f32.mrf.mxu3  ;;  %4023 = vtanh.f32 %v6494_v56 }
 0x6f0   :  { %v3870_v52 = vld [vmem:[%s6622_s5 + $0x30] sm:$0xff] }
 0x6f2   :  { %v4022_v63 = vpop.eup %4021 }
 0x6f3   :  { %v2794_v14 = vmul.f32 0.5, %v4022_v63 }
 0x6f5   :  { %v2795_v46 = vadd.f32 0.5, %v2794_v14  ;;  %v4024_v27 = vpop.eup %4023 }
 0x6f7   :  { %v2800_v1 = vmul.f32 %v4024_v27, %v2795_v46  ;;  %v3869_v27 = vld [vmem:[%s6622_s5 + $0x28] sm:$0xff] }
 0x6f9   :  { %v2801_v58 = vpack.c.bf16 %v2800_v1, %v2800_v1  ;;  %v3868_v1 = vld [vmem:[%s6622_s5 + $0x20] sm:$0xff] }
 0x6fb   :  { %2802 = vst [vmem:[#allocation5 + $0x4] sm:$0xf] %v2801_v58 }
 0x702   :  { %v2824_v34 = vld [vmem:[#allocation5] sm:$0xff] }
 0x703   :  { %v2826_v35 = vunpack.c.l.b16 %v2824_v34  ;;  %v2827_v8 = vunpack.c.h.b16 %v2824_v34 }
 0x705   :  { %v6497_v24 = vpack.c.b16 %v2826_v35, %v2826_v35  ;;  %v6499_v9 = vpack.c.b16 %v2827_v8, %v2827_v8 }
 0x707   :  { %2840 = vmatmul.bf16.vlgmr.msrb.gmra.mxu0 %v6497_v24  ;;  %2853 = vmatmul.bf16.vlgmr.msra.gmra.mxu1 %v6499_v9 }
 0x708   :  { %2866 = vmatmul.bf16.vlgmr.msrb.gmra.mxu2 %v6497_v24  ;;  %2879 = vmatmul.bf16.vlgmr.msrb.gmra.mxu3 %v6499_v9 }
 0x709   :  { %2936 = vmatpush.bf16.msrb.mxu0 %v7106_v2  ;;  %2949 = vmatpush.bf16.msra.mxu1 %v7107_v7  ;;  %v7700_v2 = vld [vmem:[#allocation110_spill] sm:$0xff]  ;;  %v7701_v7 = vld [vmem:[#allocation111_spill] sm:$0xff] }
 0x70a   :  { %2962 = vmatpush.bf16.msrb.mxu2 %v7108_v51  ;;  %2975 = vmatpush.bf16.msrb.mxu3 %v7109_v55  ;;  %v7702_v51 = vld [vmem:[#allocation112_spill] sm:$0xff]  ;;  %v7703_v55 = vld [vmem:[#allocation113_spill] sm:$0xff] }
 0x70d   :  { %2937 = vmatpush.bf16.msrb.mxu0 %v7110_v48  ;;  %2950 = vmatpush.bf16.msra.mxu1 %v7202_v60  ;;  %v7704_v48 = vld [vmem:[#allocation114_spill] sm:$0xff]  ;;  %v7707_v60 = vld [vmem:[#allocation117_spill] sm:$0xff] }
 0x70e   :  { %2963 = vmatpush.bf16.msrb.mxu2 %v7203_v4  ;;  %2976 = vmatpush.bf16.msrb.mxu3 %v7204_v54  ;;  %v7708_v4 = vld [vmem:[#allocation118_spill] sm:$0xff]  ;;  %v7709_v54 = vld [vmem:[#allocation119_spill] sm:$0xff] }
 0x711   :  { %2938 = vmatpush.bf16.msrb.mxu0 %v7205_v16  ;;  %2951 = vmatpush.bf16.msra.mxu1 %v7206_v17  ;;  %v7710_v16 = vld [vmem:[#allocation120_spill] sm:$0xff]  ;;  %v7711_v17 = vld [vmem:[#allocation121_spill] sm:$0xff] }
 0x712   :  { %2964 = vmatpush.bf16.msrb.mxu2 %v7207_v37  ;;  %2977 = vmatpush.bf16.msrb.mxu3 %v7208_v3  ;;  %v7712_v37 = vld [vmem:[#allocation122_spill] sm:$0xff]  ;;  %v7713_v3 = vld [vmem:[#allocation123_spill] sm:$0xff] }
 0x715   :  { %2939 = vmatpush.bf16.msrb.mxu0 %v7209_v41  ;;  %2952 = vmatpush.bf16.msra.mxu1 %v7210_v45  ;;  %v7714_v41 = vld [vmem:[#allocation124_spill] sm:$0xff]  ;;  %v7715_v45 = vld [vmem:[#allocation125_spill] sm:$0xff] }
 0x716   :  { %2965 = vmatpush.bf16.msrb.mxu2 %v7211_v33  ;;  %2978 = vmatpush.bf16.msrb.mxu3 %v7212_v40  ;;  %v7716_v33 = vld [vmem:[#allocation126_spill] sm:$0xff]  ;;  %v7717_v40 = vld [vmem:[#allocation127_spill] sm:$0xff] }
 0x717   :  { %2892 = vmatmul.bf16.vlgmr.msra.gmra.mxu0 %v6497_v24  ;;  %2905 = vmatmul.bf16.vlgmr.msrb.gmra.mxu1 %v6499_v9 }
 0x718   :  { %2918 = vmatmul.bf16.vlgmr.msra.gmra.mxu2 %v6497_v24  ;;  %2931 = vmatmul.bf16.vlgmr.msra.gmra.mxu3 %v6499_v9 }
 0x719   :  { %2940 = vmatpush.bf16.msrb.mxu0 %v7122_v57  ;;  %2953 = vmatpush.bf16.msra.mxu1 %v7123_v15  ;;  %v7705_v57 = vld [vmem:[#allocation115_spill] sm:$0xff]  ;;  %v7706_v15 = vld [vmem:[#allocation116_spill] sm:$0xff] }
 0x71a   :  { %2966 = vmatpush.bf16.msrb.mxu2 %v7300_v36  ;;  %2979 = vmatpush.bf16.msrb.mxu3 %v7301_v59  ;;  %v7720_v36 = vld [vmem:[#allocation130_spill] sm:$0xff]  ;;  %v7721_v59 = vld [vmem:[#allocation131_spill] sm:$0xff] }
 0x71d   :  { %2941 = vmatpush.bf16.msrb.mxu0 %v7302_v44  ;;  %2954 = vmatpush.bf16.msra.mxu1 %v7303_v6  ;;  %v7722_v44 = vld [vmem:[#allocation132_spill] sm:$0xff]  ;;  %v7723_v6 = vld [vmem:[#allocation133_spill] sm:$0xff] }
 0x71e   :  { %2967 = vmatpush.bf16.msrb.mxu2 %v7304_v21  ;;  %2980 = vmatpush.bf16.msrb.mxu3 %v7305_v61  ;;  %v7724_v21 = vld [vmem:[#allocation134_spill] sm:$0xff]  ;;  %v7725_v61 = vld [vmem:[#allocation135_spill] sm:$0xff] }
 0x721   :  { %2942 = vmatpush.bf16.msrb.mxu0 %v7306_v18  ;;  %2955 = vmatpush.bf16.msra.mxu1 %v7216_v12  ;;  %v7718_v12 = vld [vmem:[#allocation128_spill] sm:$0xff] }
 0x722   :  { %2968 = vmatpush.bf16.msrb.mxu2 %v7217_v0  ;;  %2981 = vmatpush.bf16.msrb.mxu3 %v7307_v25  ;;  %v7719_v0 = vld [vmem:[#allocation129_spill] sm:$0xff]  ;;  %v7726_v18 = vld [vmem:[#allocation136_spill] sm:$0xff] }
 0x723   :  { %v7727_v25 = vld [vmem:[#allocation137_spill] sm:$0xff] }
 0x725   :  { %2943 = vmatpush.bf16.msrb.mxu0 %v7308_v28  ;;  %2956 = vmatpush.bf16.msra.mxu1 %v7309_v20  ;;  %v7728_v28 = vld [vmem:[#allocation138_spill] sm:$0xff]  ;;  %v7729_v20 = vld [vmem:[#allocation139_spill] sm:$0xff] }
 0x726   :  { %2969 = vmatpush.bf16.msrb.mxu2 %v7310_v19  ;;  %2982 = vmatpush.bf16.msrb.mxu3 %v7311_v11  ;;  %v7730_v19 = vld [vmem:[#allocation140_spill] sm:$0xff] }
 0x728   :  { %2944 = vmatmul.bf16.vlgmr.msrb.gmra.mxu0 %v6497_v24  ;;  %2957 = vmatmul.bf16.vlgmr.msra.gmra.mxu1 %v6499_v9 }
 0x729   :  { %2988 = vmatpush.bf16.msra.mxu0 %v7312_v10  ;;  %3001 = vmatpush.bf16.msrb.mxu1 %v7700_v2 }
 0x72a   :  { %3014 = vmatpush.bf16.msra.mxu2 %v7701_v7  ;;  %3027 = vmatpush.bf16.msra.mxu3 %v7702_v51 }
 0x72b   :  { %2970 = vmatmul.bf16.vlgmr.msrb.gmra.mxu2 %v6497_v24  ;;  %2983 = vmatmul.bf16.vlgmr.msrb.gmra.mxu3 %v6499_v9 }
 0x72d   :  { %2989 = vmatpush.bf16.msra.mxu0 %v7703_v55  ;;  %3002 = vmatpush.bf16.msrb.mxu1 %v7704_v48  ;;  %v3865_v55 = vld [vmem:[%s6622_s5 + $0x8] sm:$0xff] }
 0x72e   :  { %3015 = vmatpush.bf16.msra.mxu2 %v7705_v57  ;;  %3028 = vmatpush.bf16.msra.mxu3 %v7706_v15  ;;  %v3864_v15 = vld [vmem:[%s6622_s5] sm:$0xff] }
 0x731   :  { %2990 = vmatpush.bf16.msra.mxu0 %v7707_v60  ;;  %3003 = vmatpush.bf16.msrb.mxu1 %v7708_v4 }
 0x732   :  { %3016 = vmatpush.bf16.msra.mxu2 %v7709_v54  ;;  %3029 = vmatpush.bf16.msra.mxu3 %v7710_v16 }
 0x735   :  { %2991 = vmatpush.bf16.msra.mxu0 %v7711_v17  ;;  %3004 = vmatpush.bf16.msrb.mxu1 %v7712_v37 }
 0x736   :  { %3017 = vmatpush.bf16.msra.mxu2 %v7713_v3  ;;  %3030 = vmatpush.bf16.msra.mxu3 %v7714_v41 }
 0x739   :  { %2992 = vmatpush.bf16.msra.mxu0 %v7715_v45  ;;  %3005 = vmatpush.bf16.msrb.mxu1 %v7716_v33 }
 0x73a   :  { %3018 = vmatpush.bf16.msra.mxu2 %v7717_v40  ;;  %3031 = vmatpush.bf16.msra.mxu3 %v7718_v12 }
 0x73d   :  { %2993 = vmatpush.bf16.msra.mxu0 %v7719_v0  ;;  %3006 = vmatpush.bf16.msrb.mxu1 %v7720_v36 }
 0x73e   :  { %3019 = vmatpush.bf16.msra.mxu2 %v7721_v59  ;;  %3032 = vmatpush.bf16.msra.mxu3 %v7722_v44 }
 0x741   :  { %2994 = vmatpush.bf16.msra.mxu0 %v7723_v6  ;;  %3007 = vmatpush.bf16.msrb.mxu1 %v7724_v21 }
 0x742   :  { %3020 = vmatpush.bf16.msra.mxu2 %v7725_v61  ;;  %3033 = vmatpush.bf16.msra.mxu3 %v7726_v18 }
 0x745   :  { %2995 = vmatpush.bf16.msra.mxu0 %v7727_v25  ;;  %3008 = vmatpush.bf16.msrb.mxu1 %v7728_v28 }
 0x746   :  { %3021 = vmatpush.bf16.msra.mxu2 %v7729_v20  ;;  %3034 = vmatpush.bf16.msra.mxu3 %v7730_v19 }
 0x748   :  { %2996 = vmatmul.bf16.vlgmr.msra.gmra.mxu0 %v6497_v24  ;;  %3009 = vmatmul.bf16.vlgmr.msrb.gmra.mxu1 %v6499_v9 }
 0x749   :  { %3022 = vmatmul.bf16.vlgmr.msra.gmra.mxu2 %v6497_v24  ;;  %3035 = vmatmul.bf16.vlgmr.msra.gmra.mxu3 %v6499_v9  ;;  %v3867_v24 = vld [vmem:[%s6622_s5 + $0x18] sm:$0xff]  ;;  %v3866_v9 = vld [vmem:[%s6622_s5 + $0x10] sm:$0xff] }
 0x74a   :  { %3138 = vmatpush.bf16.msrb.mxu0 %v3871_v22 }
 0x74e   :  { %3139 = vmatpush.bf16.msrb.mxu0 %v3870_v52 }
 0x752   :  { %3140 = vmatpush.bf16.msrb.mxu0 %v3869_v27 }
 0x756   :  { %3141 = vmatpush.bf16.msrb.mxu0 %v3868_v1 }
 0x75a   :  { %3142 = vmatpush.bf16.msrb.mxu0 %v3867_v24 }
 0x75e   :  { %3143 = vmatpush.bf16.msrb.mxu0 %v3866_v9 }
 0x762   :  { %3144 = vmatpush.bf16.msrb.mxu0 %v3865_v55 }
 0x766   :  { %3145 = vmatpush.bf16.msrb.mxu0 %v3864_v15 }
 0x784   :  { %v2841_v11 = vpop.f32.mrf.mxu0  ;;  %v2854_v10 = vpop.f32.mrf.mxu1 }
 0x78b   :  { %v2867_v31 = vpop.f32.mrf.mxu2  ;;  %v2880_v30 = vpop.f32.mrf.mxu3 }
 0x78c   :  { %v2843_v39 = vpop.f32.mrf.mxu0  ;;  %v2856_v62 = vpop.f32.mrf.mxu1 }
 0x793   :  { %v2869_v23 = vpop.f32.mrf.mxu2  ;;  %v2882_v26 = vpop.f32.mrf.mxu3 }
 0x794   :  { %v2893_v32 = vpop.f32.mrf.mxu0  ;;  %v2906_v38 = vpop.f32.mrf.mxu1 }
 0x79b   :  { %v2919_v13 = vpop.f32.mrf.mxu2  ;;  %v2932_v47 = vpop.f32.mrf.mxu3 }
 0x79c   :  { %v2895_v50 = vpop.f32.mrf.mxu0  ;;  %v2908_v5 = vpop.f32.mrf.mxu1 }
 0x7a3   :  { %v2921_v29 = vpop.f32.mrf.mxu2  ;;  %v2934_v63 = vpop.f32.mrf.mxu3 }
 0x7a5   :  { %v2945_v14 = vpop.f32.mrf.mxu0  ;;  %v2958_v46 = vpop.f32.mrf.mxu1 }
 0x7a6   :  { %v2959_v48 = vadd.f32 %v2958_v46, %v2945_v14 }
 0x7a8   :  { %v3040_v60 = vadd.f32 %v2959_v48, %v7201_v49 }
 0x7ad   :  { %v2947_v35 = vpop.f32.mrf.mxu0  ;;  %v2960_v8 = vpop.f32.mrf.mxu1 }
 0x7ae   :  { %v2971_v58 = vpop.f32.mrf.mxu2  ;;  %v2984_v34 = vpop.f32.mrf.mxu3 }
 0x7af   :  { %v2985_v51 = vadd.f32 %v2984_v34, %v2971_v58 }
 0x7b1   :  { %v3041_v57 = vadd.f32 %v2985_v51, %v7200_v43 }
 0x7b3   :  { %4025 = vtanh.f32 %v3041_v57 }
 0x7b4   :  { %4027 = vtanh.f32 %v3040_v60 }
 0x7b6   :  { %v2973_v2 = vpop.f32.mrf.mxu2  ;;  %v2986_v7 = vpop.f32.mrf.mxu3 }
 0x7b9   :  { %v4026_v16 = vpop.eup %4025 }
 0x7ba   :  { %v4028_v37 = vpop.eup %4027  ;;  %v3048_v41 = vmul.f32 0.5, %v4026_v16 }
 0x7bb   :  { %v3045_v45 = vmul.f32 0.5, %v4028_v37 }
 0x7bc   :  { %v3049_v40 = vadd.f32 0.5, %v3048_v41 }
 0x7bd   :  { %v3046_v49 = vadd.f32 0.5, %v3045_v45 }
 0x7be   :  { %v3054_v6 = vmul.f32 %v3049_v40, %v6494_v56 }
 0x7c5   :  { %v2997_v4 = vpop.f32.mrf.mxu0  ;;  %v3010_v54 = vpop.f32.mrf.mxu1 }
 0x7c6   :  { %v3011_v17 = vadd.f32 %v3010_v54, %v2997_v4 }
 0x7c8   :  { %v3042_v3 = vadd.f32 %v3011_v17, %v5483_v53 }
 0x7ca   :  { %4029 = vtanh.f32 %v3042_v3 }
 0x7cc   :  { %v3023_v43 = vpop.f32.mrf.mxu2  ;;  %v3036_v33 = vpop.f32.mrf.mxu3 }
 0x7cd   :  { %v3037_v12 = vadd.f32 %v3036_v33, %v3023_v43  ;;  %v2999_v0 = vpop.f32.mrf.mxu0  ;;  %v3012_v36 = vpop.f32.mrf.mxu1 }
 0x7cf   :  { %v3043_v59 = vadd.f32 %v3037_v12, %v5486_v42  ;;  %v3874_v42 = vld [vmem:[%s6621_s6] ss:$0 sm:$0xff] }
 0x7d0   :  { %v4030_v44 = vpop.eup %4029 }
 0x7d1   :  { %v3055_v21 = vmul.f32 %v4030_v44, %v3046_v49  ;;  %4031 = vtanh.f32 %v3043_v59 }
 0x7d3   :  { %v3056_v61 = vadd.f32 %v3055_v21, %v3054_v6 }
 0x7d4   :  { %v3025_v18 = vpop.f32.mrf.mxu2  ;;  %v3038_v53 = vpop.f32.mrf.mxu3 }
 0x7d5   :  { %4033 = vtanh.f32 %v3056_v61 }
 0x7d7   :  { %v4032_v25 = vpop.eup %4031 }
 0x7d8   :  { %v3052_v28 = vmul.f32 0.5, %v4032_v25 }
 0x7da   :  { %v3053_v20 = vadd.f32 0.5, %v3052_v28 }
 0x7db   :  { %v4034_v19 = vpop.eup %4033 }
 0x7dc   :  { %v3058_v11 = vmul.f32 %v4034_v19, %v3053_v20 }
 0x7de   :  { %v3059_v10 = vpack.c.bf16 %v3058_v11, %v3058_v11 }
 0x7e0   :  { %3060 = vst [vmem:[#allocation5 + $0x4] sm:$0xf] %v3059_v10  ;;  %3146 = vmatmul.bf16.vlgmr.msrb.gmra.mxu0 %v3059_v10 }
 0x85d   :  { %v3147_v31 = vpop.f32.mrf.mxu0 }
 0x85e   :  { %v3148_v56 = vadd.f32 %v3874_v42, %v3147_v31 }
 0x860   :  { %3151 = vst [vmem:[%s6623_s7] sm:$0xff] %v3148_v56 }
 0x865   :  { %v3149_v30 = vpop.f32.mrf.mxu0 }

</bundles_post_ra>
